<compile_context>
chip_gen: v6e
topology: v6e:2x2x1
jax: 0.10.0
libtpu: 0.0.40
codegen_flags: <defaults>
</compile_context>

<pallas_src>
import functools

import jax
import jax.numpy as jnp
from jax import lax
from jax.experimental import pallas as pl
from jax.experimental.pallas import tpu as pltpu


def _round_up(x, m):
    return ((x + m - 1) // m) * m


def _fc_encoder_kernel(x_ref, w1_ref, b1_ref, w2_ref, b2_ref, w3_ref, b3_ref,
                       wh_ref, bh_ref, out_ref, act0_ref, act1_ref, *,
                       n_latent, n_panels, panel):
    """One grid step = one 256-wide output-column panel of one layer.

    Steps [0, NP)        : fc1  -> act0[panel]
    Steps [NP, 2*NP)     : fc2  -> act1[panel]     (reads all of act0)
    Steps [2*NP, 3*NP)   : fc3  -> act0[panel]     (reads all of act1)
    Step  3*NP           : [fc_mean ++ fc_logvar] head -> out_ref
    All matmuls are bf16 x bf16 on the MXU with f32 accumulation; bias add,
    ReLU and the logvar clamp happen in f32 on the VPU.
    """
    i = pl.program_id(0)
    b_pad = x_ref.shape[0]

    def panel_matmul(src_ref, w_ref, b_ref):
        # src_ref: (n_panels, b_pad, panel) bf16 -- previous layer's activations.
        # w_ref  : (K_total, n_out) bf16 weight column-panel block.
        acc = jnp.zeros((b_pad, w_ref.shape[1]), jnp.float32)
        for k in range(n_panels):                      # static unroll over K chunks
            acc += jnp.dot(src_ref[k], w_ref[k * panel:(k + 1) * panel, :],
                           preferred_element_type=jnp.float32)
        return acc + b_ref[...]

    # ---- fc1: x @ w1-panel + b1-panel, ReLU -> act0[i] ----
    @pl.when(i < n_panels)
    def _():
        h = jnp.dot(x_ref[...], w1_ref[...],
                    preferred_element_type=jnp.float32) + b1_ref[...]
        act0_ref[i] = jnp.maximum(h, 0.0).astype(jnp.bfloat16)

    # ---- fc2: act0 @ w2-panel + b2-panel, ReLU -> act1[i - NP] ----
    @pl.when((i >= n_panels) & (i < 2 * n_panels))
    def _():
        h = panel_matmul(act0_ref, w2_ref, b2_ref)
        act1_ref[i - n_panels] = jnp.maximum(h, 0.0).astype(jnp.bfloat16)

    # ---- fc3: act1 @ w3-panel + b3-panel, ReLU -> act0[i - 2*NP] ----
    @pl.when((i >= 2 * n_panels) & (i < 3 * n_panels))
    def _():
        h = panel_matmul(act1_ref, w3_ref, b3_ref)
        act0_ref[i - 2 * n_panels] = jnp.maximum(h, 0.0).astype(jnp.bfloat16)

    # ---- combined head: columns [0, nl) = mean, [nl, 2*nl) = logvar ----
    @pl.when(i == 3 * n_panels)
    def _():
        y = panel_matmul(act0_ref, wh_ref, bh_ref)
        # clamp_max(0) only on the logvar lanes (no lane slicing -> dense store).
        col = lax.broadcasted_iota(jnp.int32, y.shape, dimension=1)
        is_logvar = (col >= n_latent) & (col < 2 * n_latent)
        y = jnp.where(is_logvar, jnp.minimum(y, 0.0), y)
        out_ref[...] = y.astype(out_ref.dtype)


def _fc_encoder_forward(xp, w1, b1, w2, b2, w3, b3, wh, bh, *, n_latent,
                        panel=256):
    """Single pallas_call, grid over weight column panels (DMA/compute overlap)."""
    b_pad, d_in_pad = xp.shape
    h_pad = w1.shape[1]
    head_n_pad = wh.shape[1]
    n_panels = h_pad // panel
    n_steps = 3 * n_panels + 1

    def panel_map(layer):
        first = layer * n_panels
        # Before this layer: hold panel 0 (prefetched once, cheap).
        # During: stream panel (i - first).  After: hold last panel (no re-DMA).
        return lambda i: (0, jnp.clip(i - first, 0, n_panels - 1))

    fixed = lambda i: (0, 0)

    kernel = functools.partial(_fc_encoder_kernel, n_latent=n_latent,
                               n_panels=n_panels, panel=panel)
    return pl.pallas_call(
        kernel,
        out_shape=jax.ShapeDtypeStruct((b_pad, head_n_pad), jnp.float32),
        grid=(n_steps,),
        in_specs=[
            pl.BlockSpec((b_pad, d_in_pad), fixed),         # x (small, resident)
            pl.BlockSpec((d_in_pad, panel), panel_map(0)),  # fc1 weight panel
            pl.BlockSpec((1, panel), panel_map(0)),         # fc1 bias panel
            pl.BlockSpec((h_pad, panel), panel_map(1)),     # fc2 weight panel
            pl.BlockSpec((1, panel), panel_map(1)),         # fc2 bias panel
            pl.BlockSpec((h_pad, panel), panel_map(2)),     # fc3 weight panel
            pl.BlockSpec((1, panel), panel_map(2)),         # fc3 bias panel
            pl.BlockSpec((h_pad, head_n_pad), fixed),       # mean ++ logvar weight
            pl.BlockSpec((1, head_n_pad), fixed),           # mean ++ logvar bias
        ],
        out_specs=pl.BlockSpec((b_pad, head_n_pad), fixed),
        scratch_shapes=[
            pltpu.VMEM((n_panels, b_pad, panel), jnp.bfloat16),  # act ping
            pltpu.VMEM((n_panels, b_pad, panel), jnp.bfloat16),  # act pong
        ],
        compiler_params=pltpu.CompilerParams(
            dimension_semantics=("arbitrary",),
        ),
    )(xp, w1, b1, w2, b2, w3, b3, wh, bh)


class FCEncoderPallas:
    """Mirror of the torch FCEncoder forward pass (MXU/lane-padded parameters)."""

    HIDDEN = 1200
    PANEL = 256

    def __init__(self, channels_in, size_in, n_latent, key):
        self.n_dims_in = channels_in * size_in * size_in
        self.n_latent = n_latent

        # MXU/lane-friendly padded dims (padding is zero-filled -> identical math).
        self.d_in_pad = _round_up(self.n_dims_in, 256)
        self.h_pad = _round_up(self.HIDDEN, 256)          # 1200 -> 1280
        self.head_n = 2 * n_latent                        # mean ++ logvar
        self.head_n_pad = _round_up(self.head_n, 128)     # lane-dense output

        def init_raw(key, fan_in, fan_out):
            # Deterministic init mimicking torch.nn.Linear default:
            # U(-1/sqrt(fan_in), 1/sqrt(fan_in)) for both weight and bias.
            kw, kb = jax.random.split(key)
            bound = 1.0 / (fan_in ** 0.5)
            w = jax.random.uniform(kw, (fan_in, fan_out), jnp.float32, -bound, bound)
            b = jax.random.uniform(kb, (fan_out,), jnp.float32, -bound, bound)
            return w, b

        def pad_linear(w, b, fan_in_pad, fan_out_pad):
            fan_in, fan_out = w.shape
            w_p = jnp.zeros((fan_in_pad, fan_out_pad), jnp.bfloat16)
            w_p = w_p.at[:fan_in, :fan_out].set(w.astype(jnp.bfloat16))
            b_p = jnp.zeros((1, fan_out_pad), jnp.float32)
            b_p = b_p.at[0, :fan_out].set(b)
            return w_p, b_p

        k1, k2, k3, k4, k5 = jax.random.split(key, 5)
        self.w1, self.b1 = pad_linear(*init_raw(k1, self.n_dims_in, self.HIDDEN),
                                      self.d_in_pad, self.h_pad)
        self.w2, self.b2 = pad_linear(*init_raw(k2, self.HIDDEN, self.HIDDEN),
                                      self.h_pad, self.h_pad)
        self.w3, self.b3 = pad_linear(*init_raw(k3, self.HIDDEN, self.HIDDEN),
                                      self.h_pad, self.h_pad)

        # Combined mean/logvar head: one (H, 2*n_latent) matmul, padded to 128 lanes.
        w_mean, b_mean = init_raw(k4, self.HIDDEN, n_latent)
        w_lv, b_lv = init_raw(k5, self.HIDDEN, n_latent)
        wh = jnp.zeros((self.h_pad, self.head_n_pad), jnp.bfloat16)
        wh = wh.at[:self.HIDDEN, :n_latent].set(w_mean.astype(jnp.bfloat16))
        wh = wh.at[:self.HIDDEN, n_latent:2 * n_latent].set(w_lv.astype(jnp.bfloat16))
        bh = jnp.zeros((1, self.head_n_pad), jnp.float32)
        bh = bh.at[0, :n_latent].set(b_mean)
        bh = bh.at[0, n_latent:2 * n_latent].set(b_lv)
        self.wh, self.bh = wh, bh

    def __call__(self, x):
        # x: (B, C, H, W) -> flatten like torch's x.reshape(-1, n_dims_in)
        x2 = x.reshape(-1, self.n_dims_in)
        batch = x2.shape[0]
        # bf16 native tile is (16, 128): pad batch to 16 sublanes.
        b_pad = _round_up(max(batch, 1), 16)

        xp = jnp.zeros((b_pad, self.d_in_pad), jnp.bfloat16)
        xp = xp.at[:batch, :self.n_dims_in].set(x2.astype(jnp.bfloat16))

        y = _fc_encoder_forward(xp, self.w1, self.b1, self.w2, self.b2,
                                self.w3, self.b3, self.wh, self.bh,
                                n_latent=self.n_latent, panel=self.PANEL)
        mean = y[:batch, :self.n_latent]
        logvar = y[:batch, self.n_latent:2 * self.n_latent]
        return mean, logvar


def _reference_forward(model, x):
    """Pure-JAX reference with the same numerics (bf16 weights/activations,
    f32 accumulation) on the unpadded parameter slices."""
    nl = model.n_latent
    d, H = model.n_dims_in, model.HIDDEN

    def lin(h, w_p, b_p, k_used, n_used):
        w = w_p[:k_used, :n_used]            # bf16
        b = b_p[0, :n_used]                  # f32
        y = jnp.dot(h.astype(jnp.bfloat16), w, preferred_element_type=jnp.float32)
        return y + b

    h = x.reshape(-1, d).astype(jnp.float32)
    h = jnp.maximum(lin(h, model.w1, model.b1, d, H), 0.0)
    h = jnp.maximum(lin(h, model.w2, model.b2, H, H), 0.0)
    h = jnp.maximum(lin(h, model.w3, model.b3, H, H), 0.0)
    y = lin(h, model.wh, model.bh, H, 2 * nl)
    mean = y[:, :nl]
    logvar = jnp.minimum(y[:, nl:2 * nl], 0.0)
    return mean, logvar


if __name__ == "__main__":
    key = jax.random.PRNGKey(0)
    k_param, k_x = jax.random.split(key)

    # Small, module-consistent shapes: NCHW input, flattened inside forward.
    B, C, HS, WS = 2, 4, 16, 16
    n_latent = 32

    model = FCEncoderPallas(channels_in=C, size_in=HS, n_latent=n_latent, key=k_param)
    x = jax.random.normal(k_x, (B, C, HS, WS), jnp.float32)

    mean, logvar = model(x)
    mean = jax.block_until_ready(mean)
    logvar = jax.block_until_ready(logvar)

    # Sanity check against a pure-JAX reference with matched precision.
    mean_ref, logvar_ref = _reference_forward(model, x)
    assert mean.shape == (B, n_latent) and logvar.shape == (B, n_latent)
    assert jnp.allclose(mean, mean_ref, atol=2e-3, rtol=2e-3)
    assert jnp.allclose(logvar, logvar_ref, atol=2e-3, rtol=2e-3)
    assert jnp.all(logvar <= 0.0)

    print("KERNEL_OK")
</pallas_src>

<mosaic_0001>
module attributes {stable_mosaic.version = 11 : i64} {
  func.func @_fc_encoder_kernel(%arg0: i32, %arg1: memref<16x1024xbf16, #tpu.memory_space<vmem>>, %arg2: memref<1024x256xbf16, #tpu.memory_space<vmem>>, %arg3: memref<1x256xf32, #tpu.memory_space<vmem>>, %arg4: memref<1280x256xbf16, #tpu.memory_space<vmem>>, %arg5: memref<1x256xf32, #tpu.memory_space<vmem>>, %arg6: memref<1280x256xbf16, #tpu.memory_space<vmem>>, %arg7: memref<1x256xf32, #tpu.memory_space<vmem>>, %arg8: memref<1280x128xbf16, #tpu.memory_space<vmem>>, %arg9: memref<1x128xf32, #tpu.memory_space<vmem>>, %arg10: memref<16x128xf32, #tpu.memory_space<vmem>>, %arg11: memref<5x16x256xbf16, #tpu.memory_space<vmem>>, %arg12: memref<5x16x256xbf16, #tpu.memory_space<vmem>>) attributes {dimension_semantics = [#tpu.dimension_semantics<arbitrary>], iteration_bounds = array<i64: 16>, scalar_prefetch = 0 : i64, scratch_operands = 2 : i64, tpu.core_type = #tpu.core_type<tc>, window_params = [{pipeline_mode = #tpu.pipeline_mode<synchronous>, transform_indices = @transform_0, window_bounds = array<i64: 16, 1024>}, {transform_indices = @transform_1, window_bounds = array<i64: 1024, 256>}, {transform_indices = @transform_2, window_bounds = array<i64: 1, 256>}, {transform_indices = @transform_3, window_bounds = array<i64: 1280, 256>}, {transform_indices = @transform_4, window_bounds = array<i64: 1, 256>}, {transform_indices = @transform_5, window_bounds = array<i64: 1280, 256>}, {transform_indices = @transform_6, window_bounds = array<i64: 1, 256>}, {pipeline_mode = #tpu.pipeline_mode<synchronous>, transform_indices = @transform_7, window_bounds = array<i64: 1280, 128>}, {pipeline_mode = #tpu.pipeline_mode<synchronous>, transform_indices = @transform_8, window_bounds = array<i64: 1, 128>}, {pipeline_mode = #tpu.pipeline_mode<synchronous>, transform_indices = @transform_9, window_bounds = array<i64: 16, 128>}]} {
    %c5_i32 = arith.constant 5 : i32
    %0 = arith.cmpi slt, %arg0, %c5_i32 : i32
    %1 = arith.extui %0 : i1 to i32
    %c0_i32 = arith.constant 0 : i32
    %2 = arith.cmpi ne, %1, %c0_i32 : i32
    scf.if %2 {
      %c0 = arith.constant 0 : index
      %c0_6 = arith.constant 0 : index
      %16 = vector.load %arg1[%c0, %c0_6] : memref<16x1024xbf16, #tpu.memory_space<vmem>>, vector<16x1024xbf16>
      %c0_7 = arith.constant 0 : index
      %c0_8 = arith.constant 0 : index
      %17 = vector.load %arg2[%c0_7, %c0_8] : memref<1024x256xbf16, #tpu.memory_space<vmem>>, vector<1024x256xbf16>
      %cst = arith.constant dense<0.000000e+00> : vector<16x256xf32>
      %18 = tpu.matmul %16, %17, %cst {dimension_numbers = #tpu.dot_dimension_numbers<[1], [0], [0], [1], [0, 0, 1, 1], [], []>} : vector<16x1024xbf16>, vector<1024x256xbf16>, vector<16x256xf32> -> vector<16x256xf32>
      %c0_9 = arith.constant 0 : index
      %c0_10 = arith.constant 0 : index
      %19 = vector.load %arg3[%c0_9, %c0_10] : memref<1x256xf32, #tpu.memory_space<vmem>>, vector<1x256xf32>
      %20 = vector.broadcast %19 : vector<1x256xf32> to vector<16x256xf32>
      %21 = arith.addf %18, %20 : vector<16x256xf32>
      %cst_11 = arith.constant 0.000000e+00 : f32
      %22 = vector.broadcast %cst_11 : f32 to vector<16x256xf32>
      %23 = arith.maximumf %21, %22 : vector<16x256xf32>
      %24 = arith.truncf %23 : vector<16x256xf32> to vector<16x256xbf16>
      %25 = arith.index_cast %arg0 : i32 to index
      %c0_12 = arith.constant 0 : index
      %c0_13 = arith.constant 0 : index
      %26 = vector.load %arg11[%25, %c0_12, %c0_13] : memref<5x16x256xbf16, #tpu.memory_space<vmem>>, vector<1x16x256xbf16>
      %27 = vector.shape_cast %26 : vector<1x16x256xbf16> to vector<16x256xbf16>
      %28 = vector.shape_cast %24 : vector<16x256xbf16> to vector<1x16x256xbf16>
      tpu.vector_store %arg11[%25, %c0_12, %c0_13], %28 {strides = array<i32>} : memref<5x16x256xbf16, #tpu.memory_space<vmem>>, vector<1x16x256xbf16>,
    } else {
    }
    %c5_i32_0 = arith.constant 5 : i32
    %3 = arith.cmpi sge, %arg0, %c5_i32_0 : i32
    %c10_i32 = arith.constant 10 : i32
    %4 = arith.cmpi slt, %arg0, %c10_i32 : i32
    %5 = arith.andi %3, %4 : i1
    %6 = arith.extui %5 : i1 to i32
    %c0_i32_1 = arith.constant 0 : i32
    %7 = arith.cmpi ne, %6, %c0_i32_1 : i32
    scf.if %7 {
      %cst = arith.constant 0.000000e+00 : f32
      %16 = vector.broadcast %cst : f32 to vector<16x256xf32>
      %c0 = arith.constant 0 : index
      %c0_6 = arith.constant 0 : index
      %c0_7 = arith.constant 0 : index
      %17 = vector.load %arg11[%c0, %c0_6, %c0_7] : memref<5x16x256xbf16, #tpu.memory_space<vmem>>, vector<1x16x256xbf16>
      %18 = vector.shape_cast %17 : vector<1x16x256xbf16> to vector<16x256xbf16>
      %c0_8 = arith.constant 0 : index
      %c0_9 = arith.constant 0 : index
      %19 = vector.load %arg4[%c0_8, %c0_9] : memref<1280x256xbf16, #tpu.memory_space<vmem>>, vector<256x256xbf16>
      %cst_10 = arith.constant dense<0.000000e+00> : vector<16x256xf32>
      %20 = tpu.matmul %18, %19, %cst_10 {dimension_numbers = #tpu.dot_dimension_numbers<[1], [0], [0], [1], [0, 0, 1, 1], [], []>} : vector<16x256xbf16>, vector<256x256xbf16>, vector<16x256xf32> -> vector<16x256xf32>
      %21 = arith.addf %16, %20 : vector<16x256xf32>
      %c1 = arith.constant 1 : index
      %c0_11 = arith.constant 0 : index
      %c0_12 = arith.constant 0 : index
      %22 = vector.load %arg11[%c1, %c0_11, %c0_12] : memref<5x16x256xbf16, #tpu.memory_space<vmem>>, vector<1x16x256xbf16>
      %23 = vector.shape_cast %22 : vector<1x16x256xbf16> to vector<16x256xbf16>
      %c256 = arith.constant 256 : index
      %c0_13 = arith.constant 0 : index
      %24 = vector.load %arg4[%c256, %c0_13] : memref<1280x256xbf16, #tpu.memory_space<vmem>>, vector<256x256xbf16>
      %cst_14 = arith.constant dense<0.000000e+00> : vector<16x256xf32>
      %25 = tpu.matmul %23, %24, %cst_14 {dimension_numbers = #tpu.dot_dimension_numbers<[1], [0], [0], [1], [0, 0, 1, 1], [], []>} : vector<16x256xbf16>, vector<256x256xbf16>, vector<16x256xf32> -> vector<16x256xf32>
      %26 = arith.addf %21, %25 : vector<16x256xf32>
      %c2 = arith.constant 2 : index
      %c0_15 = arith.constant 0 : index
      %c0_16 = arith.constant 0 : index
      %27 = vector.load %arg11[%c2, %c0_15, %c0_16] : memref<5x16x256xbf16, #tpu.memory_space<vmem>>, vector<1x16x256xbf16>
      %28 = vector.shape_cast %27 : vector<1x16x256xbf16> to vector<16x256xbf16>
      %c512 = arith.constant 512 : index
      %c0_17 = arith.constant 0 : index
      %29 = vector.load %arg4[%c512, %c0_17] : memref<1280x256xbf16, #tpu.memory_space<vmem>>, vector<256x256xbf16>
      %cst_18 = arith.constant dense<0.000000e+00> : vector<16x256xf32>
      %30 = tpu.matmul %28, %29, %cst_18 {dimension_numbers = #tpu.dot_dimension_numbers<[1], [0], [0], [1], [0, 0, 1, 1], [], []>} : vector<16x256xbf16>, vector<256x256xbf16>, vector<16x256xf32> -> vector<16x256xf32>
      %31 = arith.addf %26, %30 : vector<16x256xf32>
      %c3 = arith.constant 3 : index
      %c0_19 = arith.constant 0 : index
      %c0_20 = arith.constant 0 : index
      %32 = vector.load %arg11[%c3, %c0_19, %c0_20] : memref<5x16x256xbf16, #tpu.memory_space<vmem>>, vector<1x16x256xbf16>
      %33 = vector.shape_cast %32 : vector<1x16x256xbf16> to vector<16x256xbf16>
      %c768 = arith.constant 768 : index
      %c0_21 = arith.constant 0 : index
      %34 = vector.load %arg4[%c768, %c0_21] : memref<1280x256xbf16, #tpu.memory_space<vmem>>, vector<256x256xbf16>
      %cst_22 = arith.constant dense<0.000000e+00> : vector<16x256xf32>
      %35 = tpu.matmul %33, %34, %cst_22 {dimension_numbers = #tpu.dot_dimension_numbers<[1], [0], [0], [1], [0, 0, 1, 1], [], []>} : vector<16x256xbf16>, vector<256x256xbf16>, vector<16x256xf32> -> vector<16x256xf32>
      %36 = arith.addf %31, %35 : vector<16x256xf32>
      %c4 = arith.constant 4 : index
      %c0_23 = arith.constant 0 : index
      %c0_24 = arith.constant 0 : index
      %37 = vector.load %arg11[%c4, %c0_23, %c0_24] : memref<5x16x256xbf16, #tpu.memory_space<vmem>>, vector<1x16x256xbf16>
      %38 = vector.shape_cast %37 : vector<1x16x256xbf16> to vector<16x256xbf16>
      %c1024 = arith.constant 1024 : index
      %c0_25 = arith.constant 0 : index
      %39 = vector.load %arg4[%c1024, %c0_25] : memref<1280x256xbf16, #tpu.memory_space<vmem>>, vector<256x256xbf16>
      %cst_26 = arith.constant dense<0.000000e+00> : vector<16x256xf32>
      %40 = tpu.matmul %38, %39, %cst_26 {dimension_numbers = #tpu.dot_dimension_numbers<[1], [0], [0], [1], [0, 0, 1, 1], [], []>} : vector<16x256xbf16>, vector<256x256xbf16>, vector<16x256xf32> -> vector<16x256xf32>
      %41 = arith.addf %36, %40 : vector<16x256xf32>
      %c0_27 = arith.constant 0 : index
      %c0_28 = arith.constant 0 : index
      %42 = vector.load %arg5[%c0_27, %c0_28] : memref<1x256xf32, #tpu.memory_space<vmem>>, vector<1x256xf32>
      %43 = vector.broadcast %42 : vector<1x256xf32> to vector<16x256xf32>
      %44 = arith.addf %41, %43 : vector<16x256xf32>
      %cst_29 = arith.constant 0.000000e+00 : f32
      %45 = vector.broadcast %cst_29 : f32 to vector<16x256xf32>
      %46 = arith.maximumf %44, %45 : vector<16x256xf32>
      %47 = arith.truncf %46 : vector<16x256xf32> to vector<16x256xbf16>
      %c5_i32_30 = arith.constant 5 : i32
      %48 = arith.subi %arg0, %c5_i32_30 : i32
      %49 = arith.index_cast %48 : i32 to index
      %c0_31 = arith.constant 0 : index
      %c0_32 = arith.constant 0 : index
      %50 = vector.load %arg12[%49, %c0_31, %c0_32] : memref<5x16x256xbf16, #tpu.memory_space<vmem>>, vector<1x16x256xbf16>
      %51 = vector.shape_cast %50 : vector<1x16x256xbf16> to vector<16x256xbf16>
      %52 = vector.shape_cast %47 : vector<16x256xbf16> to vector<1x16x256xbf16>
      tpu.vector_store %arg12[%49, %c0_31, %c0_32], %52 {strides = array<i32>} : memref<5x16x256xbf16, #tpu.memory_space<vmem>>, vector<1x16x256xbf16>,
    } else {
    }
    %c10_i32_2 = arith.constant 10 : i32
    %8 = arith.cmpi sge, %arg0, %c10_i32_2 : i32
    %c15_i32 = arith.constant 15 : i32
    %9 = arith.cmpi slt, %arg0, %c15_i32 : i32
    %10 = arith.andi %8, %9 : i1
    %11 = arith.extui %10 : i1 to i32
    %c0_i32_3 = arith.constant 0 : i32
    %12 = arith.cmpi ne, %11, %c0_i32_3 : i32
    scf.if %12 {
      %cst = arith.constant 0.000000e+00 : f32
      %16 = vector.broadcast %cst : f32 to vector<16x256xf32>
      %c0 = arith.constant 0 : index
      %c0_6 = arith.constant 0 : index
      %c0_7 = arith.constant 0 : index
      %17 = vector.load %arg12[%c0, %c0_6, %c0_7] : memref<5x16x256xbf16, #tpu.memory_space<vmem>>, vector<1x16x256xbf16>
      %18 = vector.shape_cast %17 : vector<1x16x256xbf16> to vector<16x256xbf16>
      %c0_8 = arith.constant 0 : index
      %c0_9 = arith.constant 0 : index
      %19 = vector.load %arg6[%c0_8, %c0_9] : memref<1280x256xbf16, #tpu.memory_space<vmem>>, vector<256x256xbf16>
      %cst_10 = arith.constant dense<0.000000e+00> : vector<16x256xf32>
      %20 = tpu.matmul %18, %19, %cst_10 {dimension_numbers = #tpu.dot_dimension_numbers<[1], [0], [0], [1], [0, 0, 1, 1], [], []>} : vector<16x256xbf16>, vector<256x256xbf16>, vector<16x256xf32> -> vector<16x256xf32>
      %21 = arith.addf %16, %20 : vector<16x256xf32>
      %c1 = arith.constant 1 : index
      %c0_11 = arith.constant 0 : index
      %c0_12 = arith.constant 0 : index
      %22 = vector.load %arg12[%c1, %c0_11, %c0_12] : memref<5x16x256xbf16, #tpu.memory_space<vmem>>, vector<1x16x256xbf16>
      %23 = vector.shape_cast %22 : vector<1x16x256xbf16> to vector<16x256xbf16>
      %c256 = arith.constant 256 : index
      %c0_13 = arith.constant 0 : index
      %24 = vector.load %arg6[%c256, %c0_13] : memref<1280x256xbf16, #tpu.memory_space<vmem>>, vector<256x256xbf16>
      %cst_14 = arith.constant dense<0.000000e+00> : vector<16x256xf32>
      %25 = tpu.matmul %23, %24, %cst_14 {dimension_numbers = #tpu.dot_dimension_numbers<[1], [0], [0], [1], [0, 0, 1, 1], [], []>} : vector<16x256xbf16>, vector<256x256xbf16>, vector<16x256xf32> -> vector<16x256xf32>
      %26 = arith.addf %21, %25 : vector<16x256xf32>
      %c2 = arith.constant 2 : index
      %c0_15 = arith.constant 0 : index
      %c0_16 = arith.constant 0 : index
      %27 = vector.load %arg12[%c2, %c0_15, %c0_16] : memref<5x16x256xbf16, #tpu.memory_space<vmem>>, vector<1x16x256xbf16>
      %28 = vector.shape_cast %27 : vector<1x16x256xbf16> to vector<16x256xbf16>
      %c512 = arith.constant 512 : index
      %c0_17 = arith.constant 0 : index
      %29 = vector.load %arg6[%c512, %c0_17] : memref<1280x256xbf16, #tpu.memory_space<vmem>>, vector<256x256xbf16>
      %cst_18 = arith.constant dense<0.000000e+00> : vector<16x256xf32>
      %30 = tpu.matmul %28, %29, %cst_18 {dimension_numbers = #tpu.dot_dimension_numbers<[1], [0], [0], [1], [0, 0, 1, 1], [], []>} : vector<16x256xbf16>, vector<256x256xbf16>, vector<16x256xf32> -> vector<16x256xf32>
      %31 = arith.addf %26, %30 : vector<16x256xf32>
      %c3 = arith.constant 3 : index
      %c0_19 = arith.constant 0 : index
      %c0_20 = arith.constant 0 : index
      %32 = vector.load %arg12[%c3, %c0_19, %c0_20] : memref<5x16x256xbf16, #tpu.memory_space<vmem>>, vector<1x16x256xbf16>
      %33 = vector.shape_cast %32 : vector<1x16x256xbf16> to vector<16x256xbf16>
      %c768 = arith.constant 768 : index
      %c0_21 = arith.constant 0 : index
      %34 = vector.load %arg6[%c768, %c0_21] : memref<1280x256xbf16, #tpu.memory_space<vmem>>, vector<256x256xbf16>
      %cst_22 = arith.constant dense<0.000000e+00> : vector<16x256xf32>
      %35 = tpu.matmul %33, %34, %cst_22 {dimension_numbers = #tpu.dot_dimension_numbers<[1], [0], [0], [1], [0, 0, 1, 1], [], []>} : vector<16x256xbf16>, vector<256x256xbf16>, vector<16x256xf32> -> vector<16x256xf32>
      %36 = arith.addf %31, %35 : vector<16x256xf32>
      %c4 = arith.constant 4 : index
      %c0_23 = arith.constant 0 : index
      %c0_24 = arith.constant 0 : index
      %37 = vector.load %arg12[%c4, %c0_23, %c0_24] : memref<5x16x256xbf16, #tpu.memory_space<vmem>>, vector<1x16x256xbf16>
      %38 = vector.shape_cast %37 : vector<1x16x256xbf16> to vector<16x256xbf16>
      %c1024 = arith.constant 1024 : index
      %c0_25 = arith.constant 0 : index
      %39 = vector.load %arg6[%c1024, %c0_25] : memref<1280x256xbf16, #tpu.memory_space<vmem>>, vector<256x256xbf16>
      %cst_26 = arith.constant dense<0.000000e+00> : vector<16x256xf32>
      %40 = tpu.matmul %38, %39, %cst_26 {dimension_numbers = #tpu.dot_dimension_numbers<[1], [0], [0], [1], [0, 0, 1, 1], [], []>} : vector<16x256xbf16>, vector<256x256xbf16>, vector<16x256xf32> -> vector<16x256xf32>
      %41 = arith.addf %36, %40 : vector<16x256xf32>
      %c0_27 = arith.constant 0 : index
      %c0_28 = arith.constant 0 : index
      %42 = vector.load %arg7[%c0_27, %c0_28] : memref<1x256xf32, #tpu.memory_space<vmem>>, vector<1x256xf32>
      %43 = vector.broadcast %42 : vector<1x256xf32> to vector<16x256xf32>
      %44 = arith.addf %41, %43 : vector<16x256xf32>
      %cst_29 = arith.constant 0.000000e+00 : f32
      %45 = vector.broadcast %cst_29 : f32 to vector<16x256xf32>
      %46 = arith.maximumf %44, %45 : vector<16x256xf32>
      %47 = arith.truncf %46 : vector<16x256xf32> to vector<16x256xbf16>
      %c10_i32_30 = arith.constant 10 : i32
      %48 = arith.subi %arg0, %c10_i32_30 : i32
      %49 = arith.index_cast %48 : i32 to index
      %c0_31 = arith.constant 0 : index
      %c0_32 = arith.constant 0 : index
      %50 = vector.load %arg11[%49, %c0_31, %c0_32] : memref<5x16x256xbf16, #tpu.memory_space<vmem>>, vector<1x16x256xbf16>
      %51 = vector.shape_cast %50 : vector<1x16x256xbf16> to vector<16x256xbf16>
      %52 = vector.shape_cast %47 : vector<16x256xbf16> to vector<1x16x256xbf16>
      tpu.vector_store %arg11[%49, %c0_31, %c0_32], %52 {strides = array<i32>} : memref<5x16x256xbf16, #tpu.memory_space<vmem>>, vector<1x16x256xbf16>,
    } else {
    }
    %c15_i32_4 = arith.constant 15 : i32
    %13 = arith.cmpi eq, %arg0, %c15_i32_4 : i32
    %14 = arith.extui %13 : i1 to i32
    %c0_i32_5 = arith.constant 0 : i32
    %15 = arith.cmpi ne, %14, %c0_i32_5 : i32
    scf.if %15 {
      %cst = arith.constant 0.000000e+00 : f32
      %16 = vector.broadcast %cst : f32 to vector<16x128xf32>
      %c0 = arith.constant 0 : index
      %c0_6 = arith.constant 0 : index
      %c0_7 = arith.constant 0 : index
      %17 = vector.load %arg11[%c0, %c0_6, %c0_7] : memref<5x16x256xbf16, #tpu.memory_space<vmem>>, vector<1x16x256xbf16>
      %18 = vector.shape_cast %17 : vector<1x16x256xbf16> to vector<16x256xbf16>
      %c0_8 = arith.constant 0 : index
      %c0_9 = arith.constant 0 : index
      %19 = vector.load %arg8[%c0_8, %c0_9] : memref<1280x128xbf16, #tpu.memory_space<vmem>>, vector<256x128xbf16>
      %cst_10 = arith.constant dense<0.000000e+00> : vector<16x128xf32>
      %20 = tpu.matmul %18, %19, %cst_10 {dimension_numbers = #tpu.dot_dimension_numbers<[1], [0], [0], [1], [0, 0, 1, 1], [], []>} : vector<16x256xbf16>, vector<256x128xbf16>, vector<16x128xf32> -> vector<16x128xf32>
      %21 = arith.addf %16, %20 : vector<16x128xf32>
      %c1 = arith.constant 1 : index
      %c0_11 = arith.constant 0 : index
      %c0_12 = arith.constant 0 : index
      %22 = vector.load %arg11[%c1, %c0_11, %c0_12] : memref<5x16x256xbf16, #tpu.memory_space<vmem>>, vector<1x16x256xbf16>
      %23 = vector.shape_cast %22 : vector<1x16x256xbf16> to vector<16x256xbf16>
      %c256 = arith.constant 256 : index
      %c0_13 = arith.constant 0 : index
      %24 = vector.load %arg8[%c256, %c0_13] : memref<1280x128xbf16, #tpu.memory_space<vmem>>, vector<256x128xbf16>
      %cst_14 = arith.constant dense<0.000000e+00> : vector<16x128xf32>
      %25 = tpu.matmul %23, %24, %cst_14 {dimension_numbers = #tpu.dot_dimension_numbers<[1], [0], [0], [1], [0, 0, 1, 1], [], []>} : vector<16x256xbf16>, vector<256x128xbf16>, vector<16x128xf32> -> vector<16x128xf32>
      %26 = arith.addf %21, %25 : vector<16x128xf32>
      %c2 = arith.constant 2 : index
      %c0_15 = arith.constant 0 : index
      %c0_16 = arith.constant 0 : index
      %27 = vector.load %arg11[%c2, %c0_15, %c0_16] : memref<5x16x256xbf16, #tpu.memory_space<vmem>>, vector<1x16x256xbf16>
      %28 = vector.shape_cast %27 : vector<1x16x256xbf16> to vector<16x256xbf16>
      %c512 = arith.constant 512 : index
      %c0_17 = arith.constant 0 : index
      %29 = vector.load %arg8[%c512, %c0_17] : memref<1280x128xbf16, #tpu.memory_space<vmem>>, vector<256x128xbf16>
      %cst_18 = arith.constant dense<0.000000e+00> : vector<16x128xf32>
      %30 = tpu.matmul %28, %29, %cst_18 {dimension_numbers = #tpu.dot_dimension_numbers<[1], [0], [0], [1], [0, 0, 1, 1], [], []>} : vector<16x256xbf16>, vector<256x128xbf16>, vector<16x128xf32> -> vector<16x128xf32>
      %31 = arith.addf %26, %30 : vector<16x128xf32>
      %c3 = arith.constant 3 : index
      %c0_19 = arith.constant 0 : index
      %c0_20 = arith.constant 0 : index
      %32 = vector.load %arg11[%c3, %c0_19, %c0_20] : memref<5x16x256xbf16, #tpu.memory_space<vmem>>, vector<1x16x256xbf16>
      %33 = vector.shape_cast %32 : vector<1x16x256xbf16> to vector<16x256xbf16>
      %c768 = arith.constant 768 : index
      %c0_21 = arith.constant 0 : index
      %34 = vector.load %arg8[%c768, %c0_21] : memref<1280x128xbf16, #tpu.memory_space<vmem>>, vector<256x128xbf16>
      %cst_22 = arith.constant dense<0.000000e+00> : vector<16x128xf32>
      %35 = tpu.matmul %33, %34, %cst_22 {dimension_numbers = #tpu.dot_dimension_numbers<[1], [0], [0], [1], [0, 0, 1, 1], [], []>} : vector<16x256xbf16>, vector<256x128xbf16>, vector<16x128xf32> -> vector<16x128xf32>
      %36 = arith.addf %31, %35 : vector<16x128xf32>
      %c4 = arith.constant 4 : index
      %c0_23 = arith.constant 0 : index
      %c0_24 = arith.constant 0 : index
      %37 = vector.load %arg11[%c4, %c0_23, %c0_24] : memref<5x16x256xbf16, #tpu.memory_space<vmem>>, vector<1x16x256xbf16>
      %38 = vector.shape_cast %37 : vector<1x16x256xbf16> to vector<16x256xbf16>
      %c1024 = arith.constant 1024 : index
      %c0_25 = arith.constant 0 : index
      %39 = vector.load %arg8[%c1024, %c0_25] : memref<1280x128xbf16, #tpu.memory_space<vmem>>, vector<256x128xbf16>
      %cst_26 = arith.constant dense<0.000000e+00> : vector<16x128xf32>
      %40 = tpu.matmul %38, %39, %cst_26 {dimension_numbers = #tpu.dot_dimension_numbers<[1], [0], [0], [1], [0, 0, 1, 1], [], []>} : vector<16x256xbf16>, vector<256x128xbf16>, vector<16x128xf32> -> vector<16x128xf32>
      %41 = arith.addf %36, %40 : vector<16x128xf32>
      %c0_27 = arith.constant 0 : index
      %c0_28 = arith.constant 0 : index
      %42 = vector.load %arg9[%c0_27, %c0_28] : memref<1x128xf32, #tpu.memory_space<vmem>>, vector<1x128xf32>
      %43 = vector.broadcast %42 : vector<1x128xf32> to vector<16x128xf32>
      %44 = arith.addf %41, %43 : vector<16x128xf32>
      %45 = tpu.iota {dimensions = array<i32: 1>} : vector<16x128xi32>
      %c32_i32 = arith.constant 32 : i32
      %46 = vector.broadcast %c32_i32 : i32 to vector<16x128xi32>
      %47 = arith.cmpi sge, %45, %46 : vector<16x128xi32>
      %c64_i32 = arith.constant 64 : i32
      %48 = vector.broadcast %c64_i32 : i32 to vector<16x128xi32>
      %49 = arith.cmpi slt, %45, %48 : vector<16x128xi32>
      %50 = arith.andi %47, %49 : vector<16x128xi1>
      %cst_29 = arith.constant 0.000000e+00 : f32
      %51 = vector.broadcast %cst_29 : f32 to vector<16x128xf32>
      %52 = arith.minimumf %44, %51 : vector<16x128xf32>
      %53 = arith.select %50, %52, %44 : vector<16x128xi1>, vector<16x128xf32>
      %c0_30 = arith.constant 0 : index
      %c0_31 = arith.constant 0 : index
      %54 = vector.load %arg10[%c0_30, %c0_31] : memref<16x128xf32, #tpu.memory_space<vmem>>, vector<16x128xf32>
      tpu.vector_store %arg10[%c0_30, %c0_31], %53 {strides = array<i32>} : memref<16x128xf32, #tpu.memory_space<vmem>>, vector<16x128xf32>,
    } else {
    }
    return
  }
  func.func @transform_0(%arg0: i32) -> (i32, i32) {
    %c0_i32 = arith.constant 0 : i32
    %c0_i32_0 = arith.constant 0 : i32
    %c0_i32_1 = arith.constant 0 : i32
    return %c0_i32, %c0_i32_0 : i32, i32
  }
  func.func @transform_1(%arg0: i32) -> (i32, i32) {
    %c0_i32 = arith.constant 0 : i32
    %0 = arith.subi %arg0, %c0_i32 : i32
    %c0_i32_0 = arith.constant 0 : i32
    %c4_i32 = arith.constant 4 : i32
    %1 = arith.maxsi %c0_i32_0, %0 : i32
    %2 = arith.minsi %c4_i32, %1 : i32
    %c0_i32_1 = arith.constant 0 : i32
    %c0_i32_2 = arith.constant 0 : i32
    return %c0_i32_1, %2 : i32, i32
  }
  func.func @transform_2(%arg0: i32) -> (i32, i32) {
    %c0_i32 = arith.constant 0 : i32
    %0 = arith.subi %arg0, %c0_i32 : i32
    %c0_i32_0 = arith.constant 0 : i32
    %c4_i32 = arith.constant 4 : i32
    %1 = arith.maxsi %c0_i32_0, %0 : i32
    %2 = arith.minsi %c4_i32, %1 : i32
    %c0_i32_1 = arith.constant 0 : i32
    %c0_i32_2 = arith.constant 0 : i32
    return %c0_i32_1, %2 : i32, i32
  }
  func.func @transform_3(%arg0: i32) -> (i32, i32) {
    %c5_i32 = arith.constant 5 : i32
    %0 = arith.subi %arg0, %c5_i32 : i32
    %c0_i32 = arith.constant 0 : i32
    %c4_i32 = arith.constant 4 : i32
    %1 = arith.maxsi %c0_i32, %0 : i32
    %2 = arith.minsi %c4_i32, %1 : i32
    %c0_i32_0 = arith.constant 0 : i32
    %c0_i32_1 = arith.constant 0 : i32
    return %c0_i32_0, %2 : i32, i32
  }
  func.func @transform_4(%arg0: i32) -> (i32, i32) {
    %c5_i32 = arith.constant 5 : i32
    %0 = arith.subi %arg0, %c5_i32 : i32
    %c0_i32 = arith.constant 0 : i32
    %c4_i32 = arith.constant 4 : i32
    %1 = arith.maxsi %c0_i32, %0 : i32
    %2 = arith.minsi %c4_i32, %1 : i32
    %c0_i32_0 = arith.constant 0 : i32
    %c0_i32_1 = arith.constant 0 : i32
    return %c0_i32_0, %2 : i32, i32
  }
  func.func @transform_5(%arg0: i32) -> (i32, i32) {
    %c10_i32 = arith.constant 10 : i32
    %0 = arith.subi %arg0, %c10_i32 : i32
    %c0_i32 = arith.constant 0 : i32
    %c4_i32 = arith.constant 4 : i32
    %1 = arith.maxsi %c0_i32, %0 : i32
    %2 = arith.minsi %c4_i32, %1 : i32
    %c0_i32_0 = arith.constant 0 : i32
    %c0_i32_1 = arith.constant 0 : i32
    return %c0_i32_0, %2 : i32, i32
  }
  func.func @transform_6(%arg0: i32) -> (i32, i32) {
    %c10_i32 = arith.constant 10 : i32
    %0 = arith.subi %arg0, %c10_i32 : i32
    %c0_i32 = arith.constant 0 : i32
    %c4_i32 = arith.constant 4 : i32
    %1 = arith.maxsi %c0_i32, %0 : i32
    %2 = arith.minsi %c4_i32, %1 : i32
    %c0_i32_0 = arith.constant 0 : i32
    %c0_i32_1 = arith.constant 0 : i32
    return %c0_i32_0, %2 : i32, i32
  }
  func.func @transform_7(%arg0: i32) -> (i32, i32) {
    %c0_i32 = arith.constant 0 : i32
    %c0_i32_0 = arith.constant 0 : i32
    %c0_i32_1 = arith.constant 0 : i32
    return %c0_i32, %c0_i32_0 : i32, i32
  }
  func.func @transform_8(%arg0: i32) -> (i32, i32) {
    %c0_i32 = arith.constant 0 : i32
    %c0_i32_0 = arith.constant 0 : i32
    %c0_i32_1 = arith.constant 0 : i32
    return %c0_i32, %c0_i32_0 : i32, i32
  }
  func.func @transform_9(%arg0: i32) -> (i32, i32) {
    %c0_i32 = arith.constant 0 : i32
    %c0_i32_0 = arith.constant 0 : i32
    %c0_i32_1 = arith.constant 0 : i32
    return %c0_i32, %c0_i32_0 : i32, i32
  }
}

</mosaic_0001>

<bundles_post_ra>
// kernel: tpu_custom_call.1
= control target key start
LH: loop header
LB: loop body
LE: loop exit
PB: predicated region body
PF: predicated region fallthrough
CT: control target
= control target key end

     0   :  { %s8685_s0 = inlined_call_operand.hbm [shape: bf16[16,1024], index: 0, kind: input, shape index: {}]   ;;  %s8686_s1 = inlined_call_operand.hbm [shape: bf16[1024,1280], index: 1, kind: input, shape index: {}]   ;;  %s8687_s2 = inlined_call_operand.hbm [shape: f32[1,1280], index: 2, kind: input, shape index: {}]   ;;  %s8688_s3 = inlined_call_operand.hbm [shape: bf16[1280,1280], index: 3, kind: input, shape index: {}]   ;;  %s8689_s4 = inlined_call_operand.hbm [shape: f32[1,1280], index: 4, kind: input, shape index: {}]   ;;  %s8690_s5 = inlined_call_operand.hbm [shape: bf16[1280,1280], index: 5, kind: input, shape index: {}]   ;;  %s8691_s6 = inlined_call_operand.hbm [shape: f32[1,1280], index: 6, kind: input, shape index: {}]   ;;  %s8692_s7 = inlined_call_operand.hbm [shape: bf16[1280,128], index: 7, kind: input, shape index: {}]   ;;  %s8693_s8 = inlined_call_operand.hbm [shape: f32[1,128], index: 8, kind: input, shape index: {}]   ;;  %s8694_s9 = inlined_call_operand.hbm [shape: f32[16,128], index: 9, kind: output, shape index: {}]  }
   0x1   :  { %8734 = sst [smem:[#allocation36_spill]] %s8686_s1 }
   0x2   :  { %8735 = sst [smem:[#allocation37_spill]] %s8688_s3 }
   0x3   :  { %8736 = sst [smem:[#allocation38_spill]] %s8689_s4 }
   0x4   :  { %8737 = sst [smem:[#allocation39_spill]] %s8691_s6 }
   0x5   :  { %8738 = sst [smem:[#allocation40_spill]] %s8692_s7 }
   0x6   :  { %8739 = sst [smem:[#allocation41_spill]] %s8694_s9 }
   0x7   :  { %14 = vsyncpa [#allocation5], 0 }
   0x8   :  { %15 = vsyncpa [#allocation8], 0 }
   0x9   :  { %17 = vsyncpa [#allocation8 + $0x1], 0 }
   0xa   :  { %18 = vsyncpa [#allocation11], 0 }
   0xb   :  { %20 = vsyncpa [#allocation11 + $0x1], 0 }
   0xc   :  { %21 = vsyncpa [#allocation14], 0 }
   0xd   :  { %23 = vsyncpa [#allocation14 + $0x1], 0 }
   0xe   :  { %24 = vsyncpa [#allocation17], 0 }
   0xf   :  { %25 = vsyncpa [#allocation6], 0  ;;  %s7724_s30 = smov 0   ;;  %s7726_s10 = smov 0  }
  0x10   :  { %s7728_s11 = smov 0   ;;  %s7730_s12 = smov 0  }
  0x11   :  { %s7732_s13 = smov 0   ;;  %s7734_s14 = smov 0  }
  0x12   :  { %s7736_s15 = smov 0   ;;  %s7738_s16 = smov 0  }
  0x13   :  { %s7740_s17 = smov 0   ;;  %s7742_s18 = smov 0  }
  0x14 LB: > { %8740 = sst [smem:[#allocation26_spill]] %s7633_s13  ;;  %s7655_s19 = smov [#allocation16]   ;;  %s7653_s18 = sphi %s7742_s18, %s8807_s18   ;;  %s7649_s17 = sphi %s7740_s17, %s8819_s17   ;;  %s7645_s16 = sphi %s7738_s16, %s8818_s16   ;;  %s7641_s15 = sphi %s7736_s15, %s8811_s15   ;;  %s7637_s14 = sphi %s7734_s14, %s8817_s14   ;;  %s7633_s13 = sphi %s7732_s13, %s8816_s13   ;;  %s7629_s12 = sphi %s7730_s12, %s8809_s12   ;;  %s7625_s11 = sphi %s7728_s11, %s8815_s11   ;;  %s7621_s10 = sphi %s7726_s10, %s8814_s10   ;;  %s7617_s30 = sphi %s7724_s30, %s8813_s30  }
  0x15   : > { %8741 = sst [smem:[#allocation27_spill]] %s7645_s16  ;;  %s357_s20 = sshll.u32 %s7655_s19, 4  ;;  %s358_s20 = int_to_ptr.vmem [resolvable:$true] %s357_s20 }
  0x16   : > { %s7775_s21 = sadd.s32 4294967295, %s7653_s18   ;;  %p5510_p0 = scmp.ge.s32.totalorder %s7653_s18, 1 }
  0x17   : > { %p8702_p1 = scmp.eq.s32.totalorder %s7775_s21, 0  ;;  %p332_p2 = scmp.lt.s32.totalorder %s7653_s18, 17 }
  0x18   : > { %s7793_s24 = sadd.s32 1, %s7653_s18   ;;  %s7292_s25 = scalar_lea.vmem %s358_s20, 10240 }
  0x19   : > { %p7780_p3 = pnand %p5510_p0, %p332_p2  ;;  %8745 = sst [smem:[#allocation29_spill]] %s7793_s24 }
  0x1a   : > { %p7293_p7 = scmp.ne.s32.totalorder %s358_s20, %s7292_s25  ;;  %p7300_p10 = scmp.lt.s32.totalorder %s358_s20, %s358_s20 }
  0x1b   : > { %s8742_s22 = scalar_select %p7780_p3, 1, 0 }
  0x1c   : > { %p6353_p4 = pneg %p7780_p3  ;;  %p7301_p11 = scmp.lt.s32.totalorder %s7292_s25, %s7292_s25 }
  0x1d   : > { %8743 = sst [smem:[#allocation28_spill]] %s8742_s22 }
  0x1e   : > { %p7788_p5 = pnand %p6353_p4, %p8702_p1  ;;  %p7302_p12 = por %p7301_p11, %p7300_p10 }
  0x20   : > { %p8700_p6 = pneg %p7788_p5 }
  0x22   : > { %p7295_p8 = pnand %p7293_p7, %p8700_p6 }
  0x24   : > { %p7296_p9 = pneg %p7295_p8 }
  0x26   : > { %p7303_p13 = pnand %p7302_p12, %p7296_p9 }
  0x28   : > { %7306 = shalt.err (!%p7303_p13)
}
  0x29   : > { %s7656_s26 = smov 64   ;;  %s7657_s27 = smov 4  }
  0x2a   : > { %s8746_s7 = sld [smem:[#allocation40_spill]]  ;;  %p56_p0 = scmp.gt.s32.totalorder %s7653_s18, 0 }
  0x2b   : > { %p5442_p2 = scmp.lt.s32.totalorder %s7653_s18, 4  ;;  %p60_p4 = scmp.gt.s32.totalorder %s7793_s24, 0 }
  0x2c   : > { %p5447_p7 = scmp.lt.s32.totalorder %s7793_s24, 4  ;;  %s67_s28 = sadd.s32 1, %s7649_s17 }
  0x2d   : > { %s57_s19 = scalar_select %p56_p0, %s7653_s18, 0 }
  0x2e   : > { %s61_s25 = scalar_select %p60_p4, %s7793_s24, 0 }
  0x2f   : > { %s8821_s19 = smov (!%p5442_p2, %s57_s19), 4  ;;  %p74_p8 = scmp.ne.s32.totalorder %s7649_s17, %s7645_s16 }
  0x30   : > { %6359 = dma.hbm_to_vmem [thread:$0]  (!%p7788_p5), %s8746_s7, 10240, %s358_s20, [#allocation17], %s7656_s26, %s7656_s26, %s7657_s27  }
  0x31   : > { %s8823_s25 = smov (!%p5447_p7, %s61_s25), 4  ;;  %p8704_p9 = scmp.eq.s32.totalorder %s7653_s18, 0 }
  0x32   : > { %s64_s20 = ssub.s32 %s8821_s19, %s8823_s25  ;;  %p80_p11 = scmp.ne.s32.totalorder %s7645_s16, %s7641_s15 }
  0x33   : > { %p65_p10 = scmp.eq.s32.totalorder %s64_s20, 0  ;;  %p76_p12 = por %p8704_p9, %p74_p8 }
  0x34   : > { %p8701_p13 = scmp.lt.s32.totalorder %s7653_s18, 16  ;;  %p7828_p0 = por %p8702_p1, %p80_p11 }
  0x35   : > { %s7824_s26 = scalar_select %p65_p10, %s7649_s17, %s67_s28  }
  0x36   : > { %s8748_s27 = scalar_select %p7828_p0, 1, 0 }
  0x37   : > { %8747 = sst [smem:[#allocation30_spill]] %s7824_s26  ;;  %s7833_s29 = sand.u32 1, %s7653_s18  }
  0x38   : > { %8749 = sst [smem:[#allocation31_spill]] %s8748_s27  ;;  %s8698_s7 = sand.u32 1, %s7649_s17  }
  0x39   : > { %s5515_s9 = sshll.u32 %s8698_s7, 10  ;;  %s6186_s25 = sshll.u32 %s8821_s19, 7 }
  0x3a   : > { %s8750_s1 = sld [smem:[#allocation36_spill]]  ;;  %s386_s28 = scalar_lea.vmem [#allocation7], %s5515_s9 }
  0x3b   : > { %s397_s26 = sshll.u32 %s386_s28, 4  ;;  %p7846_p2 = pnand %p8701_p13, %p76_p12  ;;  %s7850_s26 = int_to_ptr.vmem [resolvable:$true] %s397_s26 }
  0x3d   : > { %s8751_s27 = scalar_select %p7846_p2, 1, 0 }
  0x3e   : > { %p8716_p7 = pneg %p7846_p2 }
  0x40   : > { %s7842_s15 = scalar_lea.hbm %s8750_s1, %s6186_s25  ;;  %s7312_s25 = scalar_lea.hbm %s8750_s1, 81920 }
  0x41   : > { %s7307_s16 = scalar_lea.hbm %s7842_s15, 16384  ;;  %p7313_p11 = scmp.lt.s32.totalorder %s7842_s15, %s8750_s1 }
  0x42   : > { %p7308_p4 = scmp.ne.s32.totalorder %s7842_s15, %s7307_s16  ;;  %p7314_p12 = scmp.lt.s32.totalorder %s7312_s25, %s7307_s16 }
  0x44   : > { %p7310_p8 = pnand %p8716_p7, %p7308_p4  ;;  %p7315_p6 = por %p7314_p12, %p7313_p11 }
  0x46   : > { %p7311_p10 = pneg %p7310_p8 }
  0x48   : > { %p7316_p13 = pnand %p7315_p6, %p7311_p10 }
  0x4a   : > { %7319 = shalt.err (!%p7316_p13)
}
  0x4b   : > { %s7320_s7 = scalar_lea.vmem %s7850_s26, 16384  ;;  %s7658_s9 = smov [#allocation7]  }
  0x4c   : > { %p7321_p1 = scmp.ne.s32.totalorder %s7850_s26, %s7320_s7  ;;  %s7325_s22 = sshll.u32 %s7658_s9, 4  ;;  %s7326_s22 = int_to_ptr.vmem [resolvable:$false] %s7325_s22 }
  0x4d   : > { %s7327_s6 = scalar_lea.vmem %s7326_s22, 32768  ;;  %p7328_p9 = scmp.lt.s32.totalorder %s7850_s26, %s7326_s22 }
  0x4e   : > { %p7323_p4 = pnand %p7321_p1, %p8716_p7  ;;  %p7329_p0 = scmp.lt.s32.totalorder %s7327_s6, %s7320_s7 }
  0x50   : > { %p7324_p8 = pneg %p7323_p4  ;;  %p7330_p3 = por %p7329_p0, %p7328_p9 }
  0x52   : > { %p7331_p11 = pnand %p7330_p3, %p7324_p8 }
  0x54   : > { %7334 = shalt.err (!%p7331_p11)
}
  0x55   : > { %s8707_s16 = smov 640   ;;  %s8709_s25 = smov 128  }
  0x56   : > { %s8711_s20 = smov 8   ;;  %s8752_s6 = scalar_lea.sflag [#allocation8], %s7833_s29 }
  0x57   : > { %6366 = dma.hbm_to_vmem [thread:$0]  (!%p7846_p2), %s7842_s15, 16384, %s7850_s26, %s8752_s6, %s8707_s16, %s8709_s25, %s8711_s20  }
  0x58   : > { %s5462_s7 = sadd.s32 4294967291, %s7653_s18  ;;  %s5468_s28 = sadd.s32 4294967291, %s7793_s24 }
  0x59   : > { %p125_p1 = scmp.gt.s32.totalorder %s5462_s7, 0  ;;  %p5463_p3 = scmp.lt.s32.totalorder %s5462_s7, 4 }
  0x5a   : > { %s137_s9 = sadd.s32 1, %s7637_s14  ;;  %p130_p6 = scmp.gt.s32.totalorder %s5468_s28, 0 }
  0x5b   : > { %s8825_s7 = smov (!%p125_p1, %s5462_s7), 0  ;;  %p5469_p9 = scmp.lt.s32.totalorder %s5468_s28, 4 }
  0x5c   : > { %s8827_s7 = smov (!%p5463_p3, %s8825_s7), 4  ;;  %s8829_s28 = smov (!%p130_p6, %s5468_s28), 0 }
  0x5d   : > { %p144_p13 = scmp.ne.s32.totalorder %s7637_s14, %s7633_s13  ;;  %p150_p0 = scmp.ne.s32.totalorder %s7633_s13, %s7629_s12 }
  0x5e   : > { %s8831_s28 = smov (!%p5469_p9, %s8829_s28), 4  ;;  %p8753_p10 = scmp.eq.s32.totalorder %s7653_s18, 0 }
  0x5f   : > { %p8754_p4 = scmp.eq.s32.totalorder %s7775_s21, 0  ;;  %s134_s15 = ssub.s32 %s8827_s7, %s8831_s28 }
  0x60   : > { %p146_p12 = por %p144_p13, %p8753_p10  ;;  %p135_p11 = scmp.eq.s32.totalorder %s134_s15, 0 }
  0x61   : > { %p7895_p8 = por %p150_p0, %p8754_p4  ;;  %s8715_s22 = sand.u32 1, %s7637_s14  }
  0x62   : > { %s6321_s6 = smul.u32 1280, %s8715_s22  ;;  %s6192_s16 = sshll.u32 %s8827_s7, 7 }
  0x63   : > { %s8755_s26 = scalar_select %p7895_p8, 1, 0 }
  0x64   : > { %s7905_s25 = scalar_select %p135_p11, %s7637_s14, %s137_s9  }
  0x65   : > { %8756 = sst [smem:[#allocation32_spill]] %s8755_s26  ;;  %s434_s13 = scalar_lea.vmem [#allocation10], %s6321_s6 }
  0x66   : > { %8757 = sst [smem:[#allocation33_spill]] %s7905_s25  ;;  %s446_s4 = sshll.u32 %s434_s13, 4  ;;  %s7918_s4 = int_to_ptr.vmem [resolvable:$true] %s446_s4 }
  0x67   : > { %s8758_s3 = sld [smem:[#allocation37_spill]]  ;;  %p8759_p1 = scmp.lt.s32.totalorder %s7653_s18, 16 }
  0x69   : > { %p7914_p3 = pnand %p8759_p1, %p146_p12 }
  0x6b   : > { %s8760_s28 = scalar_select %p7914_p3, 1, 0 }
  0x6c   : > { %p8727_p9 = pneg %p7914_p3 }
  0x6d   : > { %s7910_s12 = scalar_lea.hbm %s8758_s3, %s6192_s16  ;;  %s7340_s16 = scalar_lea.hbm %s8758_s3, 102400 }
  0x6e   : > { %s7335_s15 = scalar_lea.hbm %s7910_s12, 20480  ;;  %p7341_p10 = scmp.lt.s32.totalorder %s7910_s12, %s8758_s3 }
  0x6f   : > { %p7336_p6 = scmp.ne.s32.totalorder %s7910_s12, %s7335_s15  ;;  %p7342_p12 = scmp.lt.s32.totalorder %s7340_s16, %s7335_s15 }
  0x71   : > { %p7338_p13 = pnand %p8727_p9, %p7336_p6  ;;  %p7343_p4 = por %p7342_p12, %p7341_p10 }
  0x73   : > { %p7339_p0 = pneg %p7338_p13 }
  0x75   : > { %p7344_p11 = pnand %p7343_p4, %p7339_p0 }
  0x77   : > { %7347 = shalt.err (!%p7344_p11)
}
  0x78   : > { %s7348_s22 = scalar_lea.vmem %s7918_s4, 20480  ;;  %s7662_s1 = smov [#allocation10]  }
  0x79   : > { %p7349_p1 = scmp.ne.s32.totalorder %s7918_s4, %s7348_s22  ;;  %s7353_s13 = sshll.u32 %s7662_s1, 4  ;;  %s7354_s13 = int_to_ptr.vmem [resolvable:$false] %s7353_s13 }
  0x7a   : > { %s7355_s9 = scalar_lea.vmem %s7354_s13, 40960  ;;  %p7356_p7 = scmp.lt.s32.totalorder %s7918_s4, %s7354_s13 }
  0x7b   : > { %p7351_p6 = pnand %p7349_p1, %p8727_p9  ;;  %p7357_p8 = scmp.lt.s32.totalorder %s7355_s9, %s7348_s22 }
  0x7d   : > { %p7352_p13 = pneg %p7351_p6  ;;  %p7358_p2 = por %p7357_p8, %p7356_p7 }
  0x7f   : > { %p7359_p10 = pnand %p7358_p2, %p7352_p13 }
  0x81   : > { %7362 = shalt.err (!%p7359_p10)
}
  0x82   : > { %s8761_s15 = smov 8   ;;  %s8762_s16 = smov 128  }
  0x83   : > { %s8763_s20 = smov 640   ;;  %s8764_s6 = scalar_lea.sflag [#allocation11], %s7833_s29 }
  0x84   : > { %6372 = dma.hbm_to_vmem [thread:$0]  (!%p7914_p3), %s7910_s12, 20480, %s7918_s4, %s8764_s6, %s8763_s20, %s8762_s16, %s8761_s15  }
  0x85   : > { %s5486_s22 = sadd.s32 4294967286, %s7653_s18  ;;  %s5492_s9 = sadd.s32 4294967286, %s7793_s24 }
  0x86   : > { %p197_p2 = scmp.gt.s32.totalorder %s5486_s22, 0  ;;  %p5487_p7 = scmp.lt.s32.totalorder %s5486_s22, 4 }
  0x87   : > { %p202_p8 = scmp.gt.s32.totalorder %s5492_s9, 0  ;;  %p5493_p0 = scmp.lt.s32.totalorder %s5492_s9, 4 }
  0x88   : > { %s8833_s22 = smov (!%p197_p2, %s5486_s22), 0  ;;  %s209_s4 = sadd.s32 1, %s7625_s11 }
  0x89   : > { %s8835_s9 = smov (!%p202_p8, %s5492_s9), 0  ;;  %s8837_s22 = smov (!%p5487_p7, %s8833_s22), 4 }
  0x8a   : > { %s8839_s9 = smov (!%p5493_p0, %s8835_s9), 4  ;;  %p216_p12 = scmp.ne.s32.totalorder %s7625_s11, %s7621_s10 }
  0x8b   : > { %s206_s12 = ssub.s32 %s8837_s22, %s8839_s9  ;;  %p222_p4 = scmp.ne.s32.totalorder %s7621_s10, %s7617_s30 }
  0x8c   : > { %p207_p11 = scmp.eq.s32.totalorder %s206_s12, 0  ;;  %p8765_p1 = scmp.eq.s32.totalorder %s7653_s18, 0 }
  0x8d   : > { %p8766_p13 = scmp.eq.s32.totalorder %s7775_s21, 0  ;;  %s8726_s6 = sand.u32 1, %s7625_s11  }
  0x8e   : > { %p218_p6 = por %p216_p12, %p8765_p1  ;;  %s6198_s3 = sshll.u32 %s8837_s22, 7 }
  0x8f   : > { %p7964_p10 = por %p222_p4, %p8766_p13  ;;  %s6322_s25 = smul.u32 1280, %s8726_s6 }
  0x90   : > { %s7969_s13 = scalar_select %p207_p11, %s7625_s11, %s209_s4  }
  0x91   : > { %s8767_s1 = scalar_select %p7964_p10, 1, 0 }
  0x92   : > { %8769 = sst [smem:[#allocation35_spill]] %s7969_s13  ;;  %s7978_s9 = scalar_lea.hbm %s8690_s5, %s6198_s3 }
  0x93   : > { %8768 = sst [smem:[#allocation34_spill]] %s8767_s1  ;;  %p8770_p2 = scmp.lt.s32.totalorder %s7653_s18, 16 }
  0x94   : > { %s7663_s4 = smov [#allocation4]   ;;  %s484_s13 = scalar_lea.vmem [#allocation13], %s6322_s25 }
  0x95   : > { %p7982_p7 = pnand %p8770_p2, %p218_p6  ;;  %s344_s12 = sshll.u32 %s7663_s4, 4  ;;  %s7988_s12 = int_to_ptr.vmem [resolvable:$true] %s344_s12 }
  0x96   : > { %s496_s1 = sshll.u32 %s484_s13, 4  ;;  %s7363_s24 = scalar_lea.hbm %s7978_s9, 20480  ;;  %s7986_s1 = int_to_ptr.vmem [resolvable:$true] %s496_s1 }
  0x97   : > { %s8771_s30 = scalar_select %p7982_p7, 1, 0 }
  0x98   : > { %p7364_p8 = scmp.ne.s32.totalorder %s7978_s9, %s7363_s24  ;;  %p8731_p0 = pneg %p7982_p7 }
  0x99   : > { %s7368_s6 = scalar_lea.hbm %s8690_s5, 102400  ;;  %p7369_p11 = scmp.lt.s32.totalorder %s7978_s9, %s8690_s5 }
  0x9a   : > { %p7366_p12 = pnand %p8731_p0, %p7364_p8  ;;  %p7370_p1 = scmp.lt.s32.totalorder %s7368_s6, %s7363_s24 }
  0x9c   : > { %p7367_p4 = pneg %p7366_p12  ;;  %p7371_p6 = por %p7370_p1, %p7369_p11 }
  0x9e   : > { %p7372_p13 = pnand %p7371_p6, %p7367_p4 }
  0xa0   : > { %7375 = shalt.err (!%p7372_p13)
}
  0xa1   : > { %s7376_s13 = scalar_lea.vmem %s7986_s1, 20480  ;;  %s7664_s18 = smov [#allocation13]  }
  0xa2   : > { %p7377_p2 = scmp.ne.s32.totalorder %s7986_s1, %s7376_s13  ;;  %s7381_s26 = sshll.u32 %s7664_s18, 4  ;;  %s7382_s26 = int_to_ptr.vmem [resolvable:$false] %s7381_s26 }
  0xa3   : > { %s7383_s3 = scalar_lea.vmem %s7382_s26, 40960  ;;  %p7384_p9 = scmp.lt.s32.totalorder %s7986_s1, %s7382_s26 }
  0xa4   : > { %p7379_p8 = pnand %p7377_p2, %p8731_p0  ;;  %p7385_p10 = scmp.lt.s32.totalorder %s7383_s3, %s7376_s13 }
  0xa6   : > { %p7380_p12 = pneg %p7379_p8  ;;  %p7386_p3 = por %p7385_p10, %p7384_p9 }
  0xa8   : > { %p7387_p11 = pnand %p7386_p3, %p7380_p12 }
  0xaa   : > { %7390 = shalt.err (!%p7387_p11)
}
  0xab   : > { %s8772_s6 = scalar_lea.sflag [#allocation14], %s7833_s29  ;;  %s7402_s24 = scalar_lea.vmem %s7988_s12, 1024 }
  0xac   : > { %6378 = dma.hbm_to_vmem [thread:$0]  (!%p7982_p7), %s7978_s9, 20480, %s7986_s1, %s8772_s6, %s8763_s20, %s8762_s16, %s8761_s15  }
  0xad   : > { %p7403_p4 = scmp.ne.s32.totalorder %s7988_s12, %s7402_s24  ;;  %p8773_p9 = pneg %p7788_p5 }
  0xae   : > { %p7410_p1 = scmp.lt.s32.totalorder %s7988_s12, %s7988_s12  ;;  %p7411_p6 = scmp.lt.s32.totalorder %s7402_s24, %s7402_s24 }
  0xaf   : > { %p7405_p3 = pnand %p7403_p4, %p8773_p9 }
  0xb0   : > { %p7412_p13 = por %p7411_p6, %p7410_p1 }
  0xb1   : > { %p7406_p10 = pneg %p7405_p3 }
  0xb3   : > { %p7413_p2 = pnand %p7412_p13, %p7406_p10 }
  0xb5   : > { %7416 = shalt.err (!%p7413_p2)
}
  0xb6   : > { %s7665_s3 = smov 512   ;;  %s7666_s4 = smov 32  }
  0xb7   : > { %6356 = dma.hbm_to_vmem [thread:$0]  (!%p7788_p5), %s8685_s0, 1024, %s7988_s12, [#allocation5], %s7665_s3, %s7665_s3, %s7666_s4  }
  0xb8   : > { %s8774_s20 = sand.u32 1, %s7649_s17   ;;  %s7667_s9 = smov [#allocation18]  }
  0xb9   : > { %s5523_s1 = sshll.u32 %s8774_s20, 1  ;;  %s371_s25 = sshll.u32 %s7667_s9, 4  ;;  %s372_s25 = int_to_ptr.vmem [resolvable:$true] %s371_s25 }
  0xba   : > { %s6189_s13 = sshll.u32 %s8821_s19, 5  ;;  %s7428_s18 = scalar_lea.vmem %s372_s25, 16 }
  0xbb   : > { %p7429_p8 = scmp.ne.s32.totalorder %s372_s25, %s7428_s18  ;;  %p8775_p12 = pmov %p8773_p9 }
  0xbc   : > { %s7435_s26 = scalar_lea.vmem %s372_s25, 32  ;;  %p7436_p9 = scmp.lt.s32.totalorder %s372_s25, %s372_s25 }
  0xbd   : > { %p7431_p11 = pnand %p7429_p8, %p8775_p12  ;;  %p7437_p3 = scmp.lt.s32.totalorder %s7435_s26, %s7428_s18 }
  0xbf   : > { %p7432_p4 = pneg %p7431_p11  ;;  %p7438_p10 = por %p7437_p3, %p7436_p9 }
  0xc1   : > { %p7439_p1 = pnand %p7438_p10, %p7432_p4 }
  0xc3   : > { %7442 = shalt.err (!%p7439_p1)
}
  0xc4   : > { %6362 = dma.hbm_to_vmem [thread:$0]  (!%p7788_p5), %s8693_s8, 16, %s372_s25, [#allocation17]  }
  0xc5   : > { %s8047_s3 = scalar_lea.hbm %s8687_s2, %s6189_s13  ;;  %s411_s4 = scalar_lea.vmem [#allocation9], %s5523_s1 }
  0xc6   : > { %s423_s15 = sshll.u32 %s411_s4, 4  ;;  %s8776_s16 = sand.u32 1, %s7637_s14   ;;  %s424_s15 = int_to_ptr.vmem [resolvable:$true] %s423_s15 }
  0xc7   : > { %s5539_s20 = sshll.u32 %s8776_s16, 1  ;;  %s7443_s23 = scalar_lea.hbm %s8047_s3, 32 }
  0xc8   : > { %p7444_p6 = scmp.ne.s32.totalorder %s8047_s3, %s7443_s23  ;;  %p8777_p13 = scmp.ne.s32.totalorder %s8751_s27, 0 }
  0xc9   : > { %s7448_s18 = scalar_lea.hbm %s8687_s2, 160  ;;  %p7449_p5 = scmp.lt.s32.totalorder %s8047_s3, %s8687_s2 }
  0xca   : > { %p8778_p2 = pneg %p8777_p13  ;;  %p7450_p11 = scmp.lt.s32.totalorder %s7448_s18, %s7443_s23 }
  0xcc   : > { %p7446_p8 = pnand %p7444_p6, %p8778_p2  ;;  %p7451_p4 = por %p7450_p11, %p7449_p5 }
  0xce   : > { %p7447_p12 = pneg %p7446_p8 }
  0xd0   : > { %p7452_p9 = pnand %p7451_p4, %p7447_p12 }
  0xd2   : > { %7455 = shalt.err (!%p7452_p9)
}
  0xd3   : > { %s7456_s1 = scalar_lea.vmem %s424_s15, 32  ;;  %p8779_p10 = pmov %p8778_p2 }
  0xd4   : > { %p7457_p3 = scmp.ne.s32.totalorder %s424_s15, %s7456_s1  ;;  %s7668_s12 = smov [#allocation9]  }
  0xd5   : > { %s7461_s6 = sshll.u32 %s7668_s12, 4  ;;  %s7462_s6 = int_to_ptr.vmem [resolvable:$false] %s7461_s6 }
  0xd6   : > { %p7459_p1 = pnand %p7457_p3, %p8779_p10  ;;  %s7463_s19 = scalar_lea.vmem %s7462_s6, 64 }
  0xd7   : > { %p7464_p2 = scmp.lt.s32.totalorder %s424_s15, %s7462_s6  ;;  %p7465_p8 = scmp.lt.s32.totalorder %s7463_s19, %s7456_s1 }
  0xd8   : > { %p7460_p6 = pneg %p7459_p1 }
  0xd9   : > { %p7466_p0 = por %p7465_p8, %p7464_p2 }
  0xdb   : > { %p7467_p7 = pnand %p7466_p0, %p7460_p6 }
  0xdd   : > { %7470 = shalt.err (!%p7467_p7)
}
  0xde   : > { %s8780_s24 = scalar_lea.sflag [#allocation8], %s7833_s29  ;;  %s6195_s4 = sshll.u32 %s8827_s7, 5 }
  0xdf   : > { %6369 = dma.hbm_to_vmem [thread:$0]  (!%p8777_p13), %s8047_s3, 32, %s424_s15, %s8780_s24  }
  0xe0   : > { %s8781_s9 = sld [smem:[#allocation38_spill]]  ;;  %s460_s18 = scalar_lea.vmem [#allocation12], %s5539_s20 }
  0xe1   : > { %s473_s13 = sshll.u32 %s460_s18, 4  ;;  %s8782_s27 = sand.u32 1, %s7625_s11   ;;  %s474_s13 = int_to_ptr.vmem [resolvable:$true] %s473_s13 }
  0xe2   : > { %s5556_s26 = sshll.u32 %s8782_s27, 1  ;;  %p8783_p0 = scmp.ne.s32.totalorder %s8760_s28, 0 }
  0xe4   : > { %p8784_p12 = pneg %p8783_p0 }
  0xe6   : > { %s8075_s25 = scalar_lea.hbm %s8781_s9, %s6195_s4  ;;  %s7476_s15 = scalar_lea.hbm %s8781_s9, 160 }
  0xe7   : > { %s7471_s1 = scalar_lea.hbm %s8075_s25, 32  ;;  %p7477_p11 = scmp.lt.s32.totalorder %s8075_s25, %s8781_s9 }
  0xe8   : > { %p7472_p7 = scmp.ne.s32.totalorder %s8075_s25, %s7471_s1  ;;  %p7478_p4 = scmp.lt.s32.totalorder %s7476_s15, %s7471_s1 }
  0xea   : > { %p7474_p5 = pnand %p7472_p7, %p8784_p12  ;;  %p7479_p9 = por %p7478_p4, %p7477_p11 }
  0xec   : > { %p7475_p13 = pneg %p7474_p5 }
  0xee   : > { %p7480_p3 = pnand %p7479_p9, %p7475_p13 }
  0xf0   : > { %7483 = shalt.err (!%p7480_p3)
}
  0xf1   : > { %s7484_s20 = scalar_lea.vmem %s474_s13, 32  ;;  %p8785_p1 = pmov %p8784_p12 }
  0xf2   : > { %p7485_p10 = scmp.ne.s32.totalorder %s474_s13, %s7484_s20  ;;  %s7669_s19 = smov [#allocation12]  }
  0xf3   : > { %s7489_s24 = sshll.u32 %s7669_s19, 4  ;;  %s7490_s24 = int_to_ptr.vmem [resolvable:$false] %s7489_s24 }
  0xf4   : > { %p7487_p6 = pnand %p7485_p10, %p8785_p1  ;;  %s7491_s4 = scalar_lea.vmem %s7490_s24, 64 }
  0xf5   : > { %p7492_p8 = scmp.lt.s32.totalorder %s474_s13, %s7490_s24  ;;  %p7493_p7 = scmp.lt.s32.totalorder %s7491_s4, %s7484_s20 }
  0xf6   : > { %p7488_p2 = pneg %p7487_p6 }
  0xf7   : > { %p7494_p12 = por %p7493_p7, %p7492_p8 }
  0xf9   : > { %p7495_p5 = pnand %p7494_p12, %p7488_p2 }
  0xfb   : > { %7498 = shalt.err (!%p7495_p5)
}
  0xfc   : > { %s8786_s16 = scalar_lea.sflag [#allocation11], %s7833_s29  ;;  %s6201_s23 = sshll.u32 %s8837_s22, 5 }
  0xfd   : > { %6375 = dma.hbm_to_vmem [thread:$0]  (!%p8783_p0), %s8075_s25, 32, %s474_s13, %s8786_s16  }
  0xfe   : > { %s8787_s1 = sld [smem:[#allocation39_spill]]  ;;  %s510_s3 = scalar_lea.vmem [#allocation15], %s5556_s26 }
  0xff   : > { %s523_s15 = sshll.u32 %s510_s3, 4  ;;  %p8788_p11 = scmp.ne.s32.totalorder %s8771_s30, 0  ;;  %s524_s15 = int_to_ptr.vmem [resolvable:$true] %s523_s15 }
 0x101   : > { %p8789_p4 = pneg %p8788_p11 }
 0x104   : > { %s521_s7 = scalar_lea.hbm %s8787_s1, %s6201_s23  ;;  %s7504_s20 = scalar_lea.hbm %s8787_s1, 160 }
 0x105   : > { %s7499_s12 = scalar_lea.hbm %s521_s7, 32  ;;  %p7505_p0 = scmp.lt.s32.totalorder %s521_s7, %s8787_s1 }
 0x106   : > { %p7500_p13 = scmp.ne.s32.totalorder %s521_s7, %s7499_s12  ;;  %p7506_p10 = scmp.lt.s32.totalorder %s7504_s20, %s7499_s12 }
 0x108   : > { %p7502_p9 = pnand %p7500_p13, %p8789_p4  ;;  %p7507_p1 = por %p7506_p10, %p7505_p0 }
 0x10a   : > { %p7503_p3 = pneg %p7502_p9 }
 0x10c   : > { %p7508_p6 = pnand %p7507_p1, %p7503_p3 }
 0x10e   : > { %7511 = shalt.err (!%p7508_p6)
}
 0x10f   : > { %s7512_s22 = scalar_lea.vmem %s524_s15, 32  ;;  %p8790_p8 = pmov %p8789_p4 }
 0x110   : > { %p7513_p2 = scmp.ne.s32.totalorder %s524_s15, %s7512_s22  ;;  %s7670_s13 = smov [#allocation15]  }
 0x111   : > { %s7517_s26 = sshll.u32 %s7670_s13, 4  ;;  %s7518_s26 = int_to_ptr.vmem [resolvable:$false] %s7517_s26 }
 0x112   : > { %p7515_p7 = pnand %p7513_p2, %p8790_p8  ;;  %s7519_s24 = scalar_lea.vmem %s7518_s26, 64 }
 0x113   : > { %p7520_p5 = scmp.lt.s32.totalorder %s524_s15, %s7518_s26  ;;  %p7521_p13 = scmp.lt.s32.totalorder %s7519_s24, %s7512_s22 }
 0x114   : > { %p7516_p12 = pneg %p7515_p7 }
 0x115   : > { %p7522_p4 = por %p7521_p13, %p7520_p5 }
 0x117   : > { %p7523_p9 = pnand %p7522_p4, %p7516_p12 }
 0x119   : > { %7526 = shalt.err (!%p7523_p9)
}
 0x11a   : > { %s8791_s4 = scalar_lea.sflag [#allocation14], %s7833_s29  ;;  %s8792_s16 = sld [smem:[#allocation28_spill]] }
 0x11b   : > { %6381 = dma.hbm_to_vmem [thread:$0]  (!%p8788_p11), %s521_s7, 32, %s524_s15, %s8791_s4  }
 0x120   : > { %p8793_p3 = scmp.ne.s32.totalorder %s8792_s16, 0 }
 0x121   : > { %p8794_p0 = scmp.eq.s32.totalorder (!%p8793_p3), %s7775_s21, 0 }
 0x122   : > { %532 = sbr.rel (%p8793_p3) target bundleno = 1829 (0x725), region = 56 }
 0x127   : > { %7592 = dma.done.wait (%p8794_p0), [#allocation5], 1024   ;;  %p8795_p10 = pmov %p8794_p0 }
 0x128   : > { %s8796_s23 = sld [smem:[#allocation27_spill]]  ;;  %s538_s27 = sand.u32 1, %s7775_s21  }
 0x129   : > { %7594 = vsyncadd (%p8795_p10), [#allocation5], 4294966272  ;;  %s8797_s18 = sld [smem:[#allocation31_spill]]  ;;  %s539_s28 = scalar_lea.sflag [#allocation8], %s538_s27 }
 0x12e   : > { %s540_s3 = sand.u32 1, %s8796_s23  }
 0x12f   : > { %s5567_s12 = sshll.u32 %s540_s3, 10  ;;  %p8798_p1 = scmp.ne.s32.totalorder %s8797_s18, 0 }
 0x130   : > { %s8127_s30 = scalar_lea.vmem [#allocation7], %s5567_s12 }
 0x131   : > { %7596 = dma.done.wait (%p8798_p1), %s539_s28, 16416  }
 0x132   : > { %7598 = vsyncadd (%p8798_p1), %s539_s28, 4294950880  ;;  %s8799_s29 = sld [smem:[#allocation26_spill]]  ;;  %s8133_s15 = sshll.u32 %s540_s3, 1 }
 0x133   : > { %s8800_s7 = sld [smem:[#allocation32_spill]]  ;;  %s551_s19 = scalar_lea.vmem [#allocation9], %s8133_s15 }
 0x134   : > { %s557_s25 = scalar_lea.sflag [#allocation11], %s538_s27 }
 0x138   : > { %s558_s6 = sand.u32 1, %s8799_s29  }
 0x139   : > { %s6323_s20 = smul.u32 1280, %s558_s6  ;;  %p8801_p11 = scmp.ne.s32.totalorder %s8800_s7, 0 }
 0x13b   : > { %s8137_s22 = scalar_lea.vmem [#allocation10], %s6323_s20 }
 0x13c   : > { %7600 = dma.done.wait (%p8801_p11), %s557_s25, 20512  }
 0x13d   : > { %7602 = vsyncadd (%p8801_p11), %s557_s25, 4294946784  ;;  %s8802_s13 = sld [smem:[#allocation34_spill]]  ;;  %s8143_s26 = sshll.u32 %s558_s6, 1 }
 0x13e   : > { %s576_s24 = sand.u32 1, %s7621_s10   ;;  %s569_s16 = scalar_lea.vmem [#allocation12], %s8143_s26 }
 0x13f   : > { %s6324_s4 = smul.u32 1280, %s576_s24  ;;  %s575_s23 = scalar_lea.sflag [#allocation14], %s538_s27 }
 0x141   : > { %s8147_s18 = scalar_lea.vmem [#allocation13], %s6324_s4 }
 0x143   : > { %p8803_p6 = scmp.ne.s32.totalorder %s8802_s13, 0 }
 0x145   : > { %7604 = dma.done.wait (%p8803_p6), %s575_s23, 20512  }
 0x146   : > { %7606 = vsyncadd (%p8803_p6), %s575_s23, 4294946784  ;;  %s8153_s3 = sshll.u32 %s576_s24, 1  ;;  %p8804_p2 = pmov %p8794_p0 }
 0x147   : > { %s587_s12 = scalar_lea.vmem [#allocation15], %s8153_s3 }
 0x148   : > { %7608 = dma.done.wait (%p8804_p2), [#allocation17], 10256   ;;  %p8805_p8 = pmov %p8794_p0 }
 0x149   : > { %p5573_p7 = scmp.ge.s32.totalorder %s7775_s21, 5 }
 0x14a   : > { %7610 = vsyncadd (%p8805_p8), [#allocation17], 4294957040  ;;  %s6204_s27 = sshll.u32 (!%p5573_p7), %s7775_s21, 4 }
 0x14b   : > { %688 = sbr.rel (%p5573_p7) target bundleno = 673 (0x2a1), region = 96  ;;  %s1707_s28 = scalar_lea.vmem (!%p5573_p7), [#allocation2], %s6204_s27 }
 0x150   : > { %v6484_v0 = vld [vmem:[%s8127_s30 + $0x74] ss:$8 sps:$4 sm:$0xff]   ;;  %v6488_v2 = vld [vmem:[%s8127_s30 + $0x70] ss:$8 sps:$4 sm:$0xff]   ;;  %v6490_v4 = vld [vmem:[%s8127_s30 + $0x64] ss:$8 sps:$4 sm:$0xff]  }
 0x151   : > { %v6486_v1 = vld [vmem:[%s8127_s30 + $0x174] ss:$8 sps:$4 sm:$0xff]   ;;  %1517 = vmatprep.subr.bf16.mxu0 %v6484_v0  ;;  %v6489_v3 = vld [vmem:[%s8127_s30 + $0x170] ss:$8 sps:$4 sm:$0xff]   ;;  %v6492_v5 = vld [vmem:[%s8127_s30 + $0x164] ss:$8 sps:$4 sm:$0xff]  }
 0x152   : > { %1560 = vmatprep.subr.bf16.mxu1 %v6486_v1  ;;  %1518 = vmatpush1.bf16.msra.mxu0 %v6488_v2  ;;  %v6494_v6 = vld [vmem:[%s8127_s30 + $0x60] ss:$8 sps:$4 sm:$0xff]   ;;  %v6496_v8 = vld [vmem:[%s8127_s30 + $0x54] ss:$8 sps:$4 sm:$0xff]   ;;  %v6500_v10 = vld [vmem:[%s8127_s30 + $0x50] ss:$8 sps:$4 sm:$0xff]  }
 0x153   : > { %1561 = vmatpush1.bf16.msra.mxu1 %v6489_v3  ;;  %1519 = vmatprep.subr.bf16.mxu0 %v6490_v4  ;;  %v6495_v7 = vld [vmem:[%s8127_s30 + $0x160] ss:$8 sps:$4 sm:$0xff]   ;;  %v6498_v9 = vld [vmem:[%s8127_s30 + $0x154] ss:$8 sps:$4 sm:$0xff]   ;;  %v6501_v11 = vld [vmem:[%s8127_s30 + $0x150] ss:$8 sps:$4 sm:$0xff]  }
 0x154   : > { %1562 = vmatprep.subr.bf16.mxu1 %v6492_v5  ;;  %v6502_v12 = vld [vmem:[%s8127_s30 + $0x44] ss:$8 sps:$4 sm:$0xff]   ;;  %v6506_v14 = vld [vmem:[%s8127_s30 + $0x40] ss:$8 sps:$4 sm:$0xff]   ;;  %v6508_v16 = vld [vmem:[%s8127_s30 + $0x34] ss:$8 sps:$4 sm:$0xff]  }
 0x155   : > { %v6504_v13 = vld [vmem:[%s8127_s30 + $0x144] ss:$8 sps:$4 sm:$0xff]   ;;  %v6507_v15 = vld [vmem:[%s8127_s30 + $0x140] ss:$8 sps:$4 sm:$0xff]   ;;  %v6510_v17 = vld [vmem:[%s8127_s30 + $0x134] ss:$8 sps:$4 sm:$0xff]  }
 0x156   : > { %1520 = vmatpush1.bf16.msra.mxu0 %v6494_v6  ;;  %v6512_v18 = vld [vmem:[%s8127_s30 + $0x30] ss:$8 sps:$4 sm:$0xff]   ;;  %v6514_v20 = vld [vmem:[%s8127_s30 + $0x24] ss:$8 sps:$4 sm:$0xff]   ;;  %v6518_v22 = vld [vmem:[%s8127_s30 + $0x20] ss:$8 sps:$4 sm:$0xff]  }
 0x157   : > { %1563 = vmatpush1.bf16.msra.mxu1 %v6495_v7  ;;  %1521 = vmatprep.subr.bf16.mxu0 %v6496_v8  ;;  %v6513_v19 = vld [vmem:[%s8127_s30 + $0x130] ss:$8 sps:$4 sm:$0xff]   ;;  %v6516_v21 = vld [vmem:[%s8127_s30 + $0x124] ss:$8 sps:$4 sm:$0xff]   ;;  %v6519_v23 = vld [vmem:[%s8127_s30 + $0x120] ss:$8 sps:$4 sm:$0xff]  }
 0x158   : > { %1564 = vmatprep.subr.bf16.mxu1 %v6498_v9  ;;  %v6520_v24 = vld [vmem:[%s8127_s30 + $0x14] ss:$8 sps:$4 sm:$0xff]   ;;  %v6524_v26 = vld [vmem:[%s8127_s30 + $0x10] ss:$8 sps:$4 sm:$0xff]   ;;  %v6526_v28 = vld [vmem:[%s8127_s30 + $0x4] ss:$8 sps:$4 sm:$0xff]  }
 0x159   : > { %v6522_v25 = vld [vmem:[%s8127_s30 + $0x114] ss:$8 sps:$4 sm:$0xff]   ;;  %v6525_v27 = vld [vmem:[%s8127_s30 + $0x110] ss:$8 sps:$4 sm:$0xff]   ;;  %v6528_v29 = vld [vmem:[%s8127_s30 + $0x104] ss:$8 sps:$4 sm:$0xff]  }
 0x15a   : > { %1522 = vmatpush1.bf16.msra.mxu0 %v6500_v10  ;;  %v6530_v30 = vld [vmem:[%s8127_s30] ss:$8 sps:$4 sm:$0xff]   ;;  %v6532_v32 = vld [vmem:[%s8127_s30 + $0xf4] ss:$8 sps:$4 sm:$0xff]   ;;  %v6536_v34 = vld [vmem:[%s8127_s30 + $0xf0] ss:$8 sps:$4 sm:$0xff]  }
 0x15b   : > { %1565 = vmatpush1.bf16.msra.mxu1 %v6501_v11  ;;  %1523 = vmatprep.subr.bf16.mxu0 %v6502_v12  ;;  %v6531_v31 = vld [vmem:[%s8127_s30 + $0x100] ss:$8 sps:$4 sm:$0xff]   ;;  %v6534_v33 = vld [vmem:[%s8127_s30 + $0x1f4] ss:$8 sps:$4 sm:$0xff]   ;;  %v6537_v35 = vld [vmem:[%s8127_s30 + $0x1f0] ss:$8 sps:$4 sm:$0xff]  }
 0x15c   : > { %1566 = vmatprep.subr.bf16.mxu1 %v6504_v13  ;;  %v6538_v36 = vld [vmem:[%s8127_s30 + $0xe4] ss:$8 sps:$4 sm:$0xff]   ;;  %v6542_v38 = vld [vmem:[%s8127_s30 + $0xe0] ss:$8 sps:$4 sm:$0xff]   ;;  %v6544_v40 = vld [vmem:[%s8127_s30 + $0xd4] ss:$8 sps:$4 sm:$0xff]  }
 0x15d   : > { %v6540_v37 = vld [vmem:[%s8127_s30 + $0x1e4] ss:$8 sps:$4 sm:$0xff]   ;;  %v6543_v39 = vld [vmem:[%s8127_s30 + $0x1e0] ss:$8 sps:$4 sm:$0xff]   ;;  %v6546_v41 = vld [vmem:[%s8127_s30 + $0x1d4] ss:$8 sps:$4 sm:$0xff]  }
 0x15e   : > { %1524 = vmatpush1.bf16.msra.mxu0 %v6506_v14  ;;  %v6548_v42 = vld [vmem:[%s8127_s30 + $0xd0] ss:$8 sps:$4 sm:$0xff]   ;;  %v6550_v44 = vld [vmem:[%s8127_s30 + $0xc4] ss:$8 sps:$4 sm:$0xff]   ;;  %v6554_v46 = vld [vmem:[%s8127_s30 + $0xc0] ss:$8 sps:$4 sm:$0xff]  }
 0x15f   : > { %1567 = vmatpush1.bf16.msra.mxu1 %v6507_v15  ;;  %1525 = vmatprep.subr.bf16.mxu0 %v6508_v16  ;;  %v6549_v43 = vld [vmem:[%s8127_s30 + $0x1d0] ss:$8 sps:$4 sm:$0xff]   ;;  %v6552_v45 = vld [vmem:[%s8127_s30 + $0x1c4] ss:$8 sps:$4 sm:$0xff]   ;;  %v6555_v47 = vld [vmem:[%s8127_s30 + $0x1c0] ss:$8 sps:$4 sm:$0xff]  }
 0x160   : > { %1568 = vmatprep.subr.bf16.mxu1 %v6510_v17  ;;  %v689_v48 = vld [vmem:[#allocation4] sm:$0xff]  ;;  %v690_v50 = vld [vmem:[#allocation4 + $0x8] sm:$0xff]  ;;  %v6556_v52 = vld [vmem:[%s8127_s30 + $0xb4] ss:$8 sps:$4 sm:$0xff]  }
 0x161   : > { %v693_v49 = vld [vmem:[#allocation4 + $0x20] sm:$0xff]  ;;  %v694_v51 = vld [vmem:[#allocation4 + $0x28] sm:$0xff]  ;;  %v6558_v54 = vld [vmem:[%s8127_s30 + $0x1b4] ss:$8 sps:$4 sm:$0xff]  }
 0x162   : > { %1526 = vmatpush1.bf16.msra.mxu0 %v6512_v18  ;;  %v5575_v53 = vcombine.high %v689_v48, %v693_v49  ;;  %v5577_v55 = vcombine.high %v690_v50, %v694_v51  ;;  %v6560_v56 = vld [vmem:[%s8127_s30 + $0xb0] ss:$8 sps:$4 sm:$0xff]   ;;  %v6562_v58 = vld [vmem:[%s8127_s30 + $0xa4] ss:$8 sps:$4 sm:$0xff]   ;;  %v6566_v60 = vld [vmem:[%s8127_s30 + $0xa0] ss:$8 sps:$4 sm:$0xff]   ;;  %v5574_v8 = vcombine.low %v689_v48, %v693_v49  ;;  %v5576_v9 = vcombine.low %v690_v50, %v694_v51 }
 0x163   : > { %1569 = vmatpush1.bf16.msra.mxu1 %v6513_v19  ;;  %1527 = vmatprep.subr.bf16.mxu0 %v6514_v20  ;;  %v6561_v57 = vld [vmem:[%s8127_s30 + $0x1b0] ss:$8 sps:$4 sm:$0xff]   ;;  %v6564_v59 = vld [vmem:[%s8127_s30 + $0x1a4] ss:$8 sps:$4 sm:$0xff]   ;;  %v6567_v61 = vld [vmem:[%s8127_s30 + $0x1a0] ss:$8 sps:$4 sm:$0xff]  }
 0x164   : > { %1570 = vmatprep.subr.bf16.mxu1 %v6516_v21  ;;  %1549 = vmatprep.mubr.bf16.mxu0 %v5575_v53  ;;  %v6568_v62 = vld [vmem:[%s8127_s30 + $0x94] ss:$8 sps:$4 sm:$0xff]   ;;  %v6572_v0 = vld [vmem:[%s8127_s30 + $0x90] ss:$8 sps:$4 sm:$0xff]   ;;  %v6574_v2 = vld [vmem:[%s8127_s30 + $0x84] ss:$8 sps:$4 sm:$0xff]  }
 0x165   : > { %1592 = vmatprep.mubr.bf16.mxu1 %v5577_v55  ;;  %v6570_v63 = vld [vmem:[%s8127_s30 + $0x194] ss:$8 sps:$4 sm:$0xff]   ;;  %v6573_v1 = vld [vmem:[%s8127_s30 + $0x190] ss:$8 sps:$4 sm:$0xff]   ;;  %v6576_v3 = vld [vmem:[%s8127_s30 + $0x184] ss:$8 sps:$4 sm:$0xff]  }
 0x166   : > { %1528 = vmatpush1.bf16.msra.mxu0 %v6518_v22  ;;  %v6578_v4 = vld [vmem:[%s8127_s30 + $0x80] ss:$8 sps:$4 sm:$0xff]   ;;  %v6582_v6 = vld [vmem:[%s8127_s30 + $0x274] ss:$8 sps:$4 sm:$0xff]   ;;  %v6580_v10 = vld [vmem:[%s8127_s30 + $0x270] ss:$8 sps:$4 sm:$0xff]  }
 0x167   : > { %1571 = vmatpush1.bf16.msra.mxu1 %v6519_v23  ;;  %1529 = vmatprep.subr.bf16.mxu0 %v6520_v24  ;;  %v6579_v5 = vld [vmem:[%s8127_s30 + $0x180] ss:$8 sps:$4 sm:$0xff]   ;;  %v6585_v7 = vld [vmem:[%s8127_s30 + $0x374] ss:$8 sps:$4 sm:$0xff]   ;;  %v6583_v11 = vld [vmem:[%s8127_s30 + $0x370] ss:$8 sps:$4 sm:$0xff]  }
 0x168   : > { %1572 = vmatprep.subr.bf16.mxu1 %v6522_v25  ;;  %v6588_v12 = vld [vmem:[%s8127_s30 + $0x264] ss:$8 sps:$4 sm:$0xff]   ;;  %v6586_v14 = vld [vmem:[%s8127_s30 + $0x260] ss:$8 sps:$4 sm:$0xff]   ;;  %v6594_v16 = vld [vmem:[%s8127_s30 + $0x254] ss:$8 sps:$4 sm:$0xff]  }
 0x169   : > { %v6591_v13 = vld [vmem:[%s8127_s30 + $0x364] ss:$8 sps:$4 sm:$0xff]   ;;  %v6589_v15 = vld [vmem:[%s8127_s30 + $0x360] ss:$8 sps:$4 sm:$0xff]   ;;  %v6597_v17 = vld [vmem:[%s8127_s30 + $0x354] ss:$8 sps:$4 sm:$0xff]  }
 0x16a   : > { %1530 = vmatpush1.bf16.msra.mxu0 %v6524_v26  ;;  %v6592_v18 = vld [vmem:[%s8127_s30 + $0x250] ss:$8 sps:$4 sm:$0xff]   ;;  %v6600_v20 = vld [vmem:[%s8127_s30 + $0x244] ss:$8 sps:$4 sm:$0xff]   ;;  %v6598_v22 = vld [vmem:[%s8127_s30 + $0x240] ss:$8 sps:$4 sm:$0xff]  }
 0x16b   : > { %1573 = vmatpush1.bf16.msra.mxu1 %v6525_v27  ;;  %1531 = vmatprep.subr.bf16.mxu0 %v6526_v28  ;;  %v6595_v19 = vld [vmem:[%s8127_s30 + $0x350] ss:$8 sps:$4 sm:$0xff]   ;;  %v6603_v21 = vld [vmem:[%s8127_s30 + $0x344] ss:$8 sps:$4 sm:$0xff]   ;;  %v6601_v23 = vld [vmem:[%s8127_s30 + $0x340] ss:$8 sps:$4 sm:$0xff]  }
 0x16c   : > { %1574 = vmatprep.subr.bf16.mxu1 %v6528_v29  ;;  %v6606_v24 = vld [vmem:[%s8127_s30 + $0x234] ss:$8 sps:$4 sm:$0xff]   ;;  %v6604_v26 = vld [vmem:[%s8127_s30 + $0x230] ss:$8 sps:$4 sm:$0xff]   ;;  %v6612_v28 = vld [vmem:[%s8127_s30 + $0x224] ss:$8 sps:$4 sm:$0xff]  }
 0x16d   : > { %v6609_v25 = vld [vmem:[%s8127_s30 + $0x334] ss:$8 sps:$4 sm:$0xff]   ;;  %v6607_v27 = vld [vmem:[%s8127_s30 + $0x330] ss:$8 sps:$4 sm:$0xff]   ;;  %v6615_v29 = vld [vmem:[%s8127_s30 + $0x324] ss:$8 sps:$4 sm:$0xff]  }
 0x16e   : > { %1532 = vmatpush1.bf16.msra.mxu0 %v6530_v30  ;;  %v6610_v30 = vld [vmem:[%s8127_s30 + $0x220] ss:$8 sps:$4 sm:$0xff]   ;;  %v6628_v48 = vld [vmem:[%s8127_s30 + $0x2f0] ss:$8 sps:$4 sm:$0xff]   ;;  %v6636_v50 = vld [vmem:[%s8127_s30 + $0x2e4] ss:$8 sps:$4 sm:$0xff]  }
 0x16f   : > { %1575 = vmatpush1.bf16.msra.mxu1 %v6531_v31  ;;  %1533 = vmatprep.subr.bf16.mxu0 %v6532_v32  ;;  %v6613_v31 = vld [vmem:[%s8127_s30 + $0x320] ss:$8 sps:$4 sm:$0xff]   ;;  %v6618_v32 = vld [vmem:[%s8127_s30 + $0x214] ss:$8 sps:$4 sm:$0xff]   ;;  %v6631_v49 = vld [vmem:[%s8127_s30 + $0x3f0] ss:$8 sps:$4 sm:$0xff]  }
 0x170   : > { %1576 = vmatprep.subr.bf16.mxu1 %v6534_v33  ;;  %v6621_v33 = vld [vmem:[%s8127_s30 + $0x314] ss:$8 sps:$4 sm:$0xff]   ;;  %v6639_v51 = vld [vmem:[%s8127_s30 + $0x3e4] ss:$8 sps:$4 sm:$0xff]   ;;  %v6637_v53 = vld [vmem:[%s8127_s30 + $0x3e0] ss:$8 sps:$4 sm:$0xff]  }
 0x171   : > { %v6645_v55 = vld [vmem:[%s8127_s30 + $0x3d4] ss:$8 sps:$4 sm:$0xff]  }
 0x172   : > { %1534 = vmatpush2.bf16.msra.mxu0 %v6536_v34  ;;  %v8253_v34 = vld [vmem:[#allocation4 + $0x10] sm:$0xff] }
 0x173   : > { %1577 = vmatpush2.bf16.msra.mxu1 %v6537_v35  ;;  %1535 = vmatprep.subr.bf16.mxu0 %v6538_v36  ;;  %v8255_v35 = vld [vmem:[#allocation4 + $0x30] sm:$0xff]  ;;  %v8257_v36 = vld [vmem:[#allocation4 + $0x18] sm:$0xff] }
 0x174   : > { %1578 = vmatprep.subr.bf16.mxu1 %v6540_v37  ;;  %v8259_v37 = vld [vmem:[#allocation4 + $0x38] sm:$0xff] }
 0x176   : > { %1536 = vmatpush2.bf16.msra.mxu0 %v6542_v38  ;;  %v6616_v38 = vld [vmem:[%s8127_s30 + $0x210] ss:$8 sps:$4 sm:$0xff]  }
 0x177   : > { %1579 = vmatpush2.bf16.msra.mxu1 %v6543_v39  ;;  %1537 = vmatprep.subr.bf16.mxu0 %v6544_v40  ;;  %v6619_v39 = vld [vmem:[%s8127_s30 + $0x310] ss:$8 sps:$4 sm:$0xff]   ;;  %v5579_v40 = vcombine.high %v8253_v34, %v8255_v35 }
 0x178   : > { %1580 = vmatprep.subr.bf16.mxu1 %v6546_v41  ;;  %v6624_v41 = vld [vmem:[%s8127_s30 + $0x204] ss:$8 sps:$4 sm:$0xff]  }
 0x17a   : > { %1538 = vmatpush2.bf16.msra.mxu0 %v6548_v42  ;;  %v6627_v42 = vld [vmem:[%s8127_s30 + $0x304] ss:$8 sps:$4 sm:$0xff]  }
 0x17b   : > { %1581 = vmatpush2.bf16.msra.mxu1 %v6549_v43  ;;  %1539 = vmatprep.subr.bf16.mxu0 %v6550_v44  ;;  %v5581_v43 = vcombine.high %v8257_v36, %v8259_v37  ;;  %v6622_v44 = vld [vmem:[%s8127_s30 + $0x200] ss:$8 sps:$4 sm:$0xff]  }
 0x17c   : > { %1582 = vmatprep.subr.bf16.mxu1 %v6552_v45  ;;  %v6625_v45 = vld [vmem:[%s8127_s30 + $0x300] ss:$8 sps:$4 sm:$0xff]  }
 0x17e   : > { %1540 = vmatpush2.bf16.msra.mxu0 %v6554_v46  ;;  %v6630_v46 = vld [vmem:[%s8127_s30 + $0x2f4] ss:$8 sps:$4 sm:$0xff]  }
 0x17f   : > { %1583 = vmatpush2.bf16.msra.mxu1 %v6555_v47  ;;  %1541 = vmatprep.subr.bf16.mxu0 %v6556_v52  ;;  %v6633_v47 = vld [vmem:[%s8127_s30 + $0x3f4] ss:$8 sps:$4 sm:$0xff]   ;;  %v6634_v52 = vld [vmem:[%s8127_s30 + $0x2e0] ss:$8 sps:$4 sm:$0xff]  }
 0x180   : > { %1584 = vmatprep.subr.bf16.mxu1 %v6558_v54  ;;  %v6642_v54 = vld [vmem:[%s8127_s30 + $0x2d4] ss:$8 sps:$4 sm:$0xff]  }
 0x182   : > { %1542 = vmatpush2.bf16.msra.mxu0 %v6560_v56  ;;  %v6640_v56 = vld [vmem:[%s8127_s30 + $0x2d0] ss:$8 sps:$4 sm:$0xff]  }
 0x183   : > { %1585 = vmatpush2.bf16.msra.mxu1 %v6561_v57  ;;  %1543 = vmatprep.subr.bf16.mxu0 %v6562_v58  ;;  %v6643_v57 = vld [vmem:[%s8127_s30 + $0x3d0] ss:$8 sps:$4 sm:$0xff]   ;;  %v6648_v58 = vld [vmem:[%s8127_s30 + $0x2c4] ss:$8 sps:$4 sm:$0xff]  }
 0x184   : > { %1586 = vmatprep.subr.bf16.mxu1 %v6564_v59  ;;  %v6651_v59 = vld [vmem:[%s8127_s30 + $0x3c4] ss:$8 sps:$4 sm:$0xff]  }
 0x186   : > { %1544 = vmatpush2.bf16.msra.mxu0 %v6566_v60  ;;  %v6646_v60 = vld [vmem:[%s8127_s30 + $0x2c0] ss:$8 sps:$4 sm:$0xff]  }
 0x187   : > { %1587 = vmatpush2.bf16.msra.mxu1 %v6567_v61  ;;  %1545 = vmatprep.subr.bf16.mxu0 %v6568_v62  ;;  %v6649_v61 = vld [vmem:[%s8127_s30 + $0x3c0] ss:$8 sps:$4 sm:$0xff]   ;;  %v6654_v62 = vld [vmem:[%s8127_s30 + $0x2b4] ss:$8 sps:$4 sm:$0xff]  }
 0x188   : > { %1588 = vmatprep.subr.bf16.mxu1 %v6570_v63  ;;  %v6657_v63 = vld [vmem:[%s8127_s30 + $0x3b4] ss:$8 sps:$4 sm:$0xff]  }
 0x18a   : > { %1546 = vmatpush2.bf16.msra.mxu0 %v6572_v0  ;;  %v6652_v0 = vld [vmem:[%s8127_s30 + $0x2b0] ss:$8 sps:$4 sm:$0xff]  }
 0x18b   : > { %1589 = vmatpush2.bf16.msra.mxu1 %v6573_v1  ;;  %1547 = vmatprep.subr.bf16.mxu0 %v6574_v2  ;;  %v6655_v1 = vld [vmem:[%s8127_s30 + $0x3b0] ss:$8 sps:$4 sm:$0xff]   ;;  %v6660_v2 = vld [vmem:[%s8127_s30 + $0x2a4] ss:$8 sps:$4 sm:$0xff]  }
 0x18c   : > { %1590 = vmatprep.subr.bf16.mxu1 %v6576_v3  ;;  %v6663_v3 = vld [vmem:[%s8127_s30 + $0x3a4] ss:$8 sps:$4 sm:$0xff]  }
 0x18e   : > { %1548 = vmatpush2.bf16.msra.mxu0 %v6578_v4  ;;  %v6658_v4 = vld [vmem:[%s8127_s30 + $0x2a0] ss:$8 sps:$4 sm:$0xff]  }
 0x18f   : > { %1591 = vmatpush2.bf16.msra.mxu1 %v6579_v5  ;;  %1603 = vmatprep.subr.bf16.mxu0 %v6582_v6  ;;  %v6661_v5 = vld [vmem:[%s8127_s30 + $0x3a0] ss:$8 sps:$4 sm:$0xff]   ;;  %v6666_v6 = vld [vmem:[%s8127_s30 + $0x294] ss:$8 sps:$4 sm:$0xff]  }
 0x190   : > { %1646 = vmatprep.subr.bf16.mxu1 %v6585_v7  ;;  %v6669_v7 = vld [vmem:[%s8127_s30 + $0x394] ss:$8 sps:$4 sm:$0xff]  }
 0x191   : > { %1550 = vmatmul.mubr.bf16.vlgmr.msra.gmra.mxu0 %v5574_v8  ;;  %v6664_v8 = vld [vmem:[%s8127_s30 + $0x290] ss:$8 sps:$4 sm:$0xff]  }
 0x192   : > { %1593 = vmatmul.mubr.bf16.vlgmr.msra.gmra.mxu1 %v5576_v9  ;;  %1604 = vmatpush1.bf16.msra.mxu0 %v6580_v10  ;;  %v6667_v9 = vld [vmem:[%s8127_s30 + $0x390] ss:$8 sps:$4 sm:$0xff]   ;;  %v6672_v10 = vld [vmem:[%s8127_s30 + $0x284] ss:$8 sps:$4 sm:$0xff]  }
 0x193   : > { %1647 = vmatpush1.bf16.msra.mxu1 %v6583_v11  ;;  %1605 = vmatprep.subr.bf16.mxu0 %v6588_v12  ;;  %v6675_v11 = vld [vmem:[%s8127_s30 + $0x384] ss:$8 sps:$4 sm:$0xff]   ;;  %v6670_v12 = vld [vmem:[%s8127_s30 + $0x280] ss:$8 sps:$4 sm:$0xff]  }
 0x194   : > { %1648 = vmatprep.subr.bf16.mxu1 %v6591_v13  ;;  %1635 = vmatprep.mubr.bf16.mxu0 %v5579_v40  ;;  %v6673_v13 = vld [vmem:[%s8127_s30 + $0x380] ss:$8 sps:$4 sm:$0xff]  }
 0x195   : > { %1678 = vmatprep.mubr.bf16.mxu1 %v5581_v43 }
 0x196   : > { %1606 = vmatpush1.bf16.msra.mxu0 %v6586_v14  ;;  %v5578_v14 = vcombine.low %v8253_v34, %v8255_v35 }
 0x197   : > { %1649 = vmatpush1.bf16.msra.mxu1 %v6589_v15  ;;  %1607 = vmatprep.subr.bf16.mxu0 %v6594_v16  ;;  %v5580_v15 = vcombine.low %v8257_v36, %v8259_v37  ;;  %v827_v16 = vlaneseq }
 0x198   : > { %1650 = vmatprep.subr.bf16.mxu1 %v6597_v17 }
 0x199   : > { %v828_v17 = vshrl.u32 %v827_v16, 7 }
 0x19a   : > { %1608 = vmatpush1.bf16.msra.mxu0 %v6592_v18 }
 0x19b   : > { %1651 = vmatpush1.bf16.msra.mxu1 %v6595_v19  ;;  %1609 = vmatprep.subr.bf16.mxu0 %v6600_v20  ;;  %v829_v20 = vsub.s32 0, %v828_v17 }
 0x19c   : > { %1652 = vmatprep.subr.bf16.mxu1 %v6603_v21  ;;  %v825_v21 = vld [vmem:[%s551_s19] sm:$0x3] }
 0x19e   : > { %1610 = vmatpush1.bf16.msra.mxu0 %v6598_v22  ;;  %v833_v22 = vsub.s32 1, %v828_v17 }
 0x19f   : > { %1653 = vmatpush1.bf16.msra.mxu1 %v6601_v23  ;;  %1611 = vmatprep.subr.bf16.mxu0 %v6606_v24 }
 0x1a0   : > { %1654 = vmatprep.subr.bf16.mxu1 %v6609_v25  ;;  %v830_v25 = vrot.slane %v825_v21, %v829_v20 }
 0x1a2   : > { %1612 = vmatpush1.bf16.msra.mxu0 %v6604_v26  ;;  %v834_v26 = vrot.slane %v825_v21, %v833_v22 }
 0x1a3   : > { %1655 = vmatpush1.bf16.msra.mxu1 %v6607_v27  ;;  %1613 = vmatprep.subr.bf16.mxu0 %v6612_v28 }
 0x1a4   : > { %1656 = vmatprep.subr.bf16.mxu1 %v6615_v29 }
 0x1a6   : > { %1614 = vmatpush1.bf16.msra.mxu0 %v6610_v30 }
 0x1a7   : > { %1657 = vmatpush1.bf16.msra.mxu1 %v6613_v31  ;;  %1615 = vmatprep.subr.bf16.mxu0 %v6618_v32 }
 0x1a8   : > { %1658 = vmatprep.subr.bf16.mxu1 %v6621_v33 }
 0x1aa   : > { %1616 = vmatpush1.bf16.msra.mxu0 %v6616_v38 }
 0x1ab   : > { %1659 = vmatpush1.bf16.msra.mxu1 %v6619_v39  ;;  %1617 = vmatprep.subr.bf16.mxu0 %v6624_v41 }
 0x1ac   : > { %1660 = vmatprep.subr.bf16.mxu1 %v6627_v42 }
 0x1ae   : > { %1618 = vmatpush1.bf16.msra.mxu0 %v6622_v44 }
 0x1af   : > { %1661 = vmatpush1.bf16.msra.mxu1 %v6625_v45  ;;  %1619 = vmatprep.subr.bf16.mxu0 %v6630_v46 }
 0x1b0   : > { %1662 = vmatprep.subr.bf16.mxu1 %v6633_v47 }
 0x1b2   : > { %1620 = vmatpush2.bf16.msra.mxu0 %v6628_v48 }
 0x1b3   : > { %1663 = vmatpush2.bf16.msra.mxu1 %v6631_v49  ;;  %1621 = vmatprep.subr.bf16.mxu0 %v6636_v50 }
 0x1b4   : > { %1664 = vmatprep.subr.bf16.mxu1 %v6639_v51 }
 0x1b6   : > { %1622 = vmatpush2.bf16.msra.mxu0 %v6634_v52 }
 0x1b7   : > { %1665 = vmatpush2.bf16.msra.mxu1 %v6637_v53  ;;  %1623 = vmatprep.subr.bf16.mxu0 %v6642_v54 }
 0x1b8   : > { %1666 = vmatprep.subr.bf16.mxu1 %v6645_v55 }
 0x1ba   : > { %1624 = vmatpush2.bf16.msra.mxu0 %v6640_v56 }
 0x1bb   : > { %1667 = vmatpush2.bf16.msra.mxu1 %v6643_v57  ;;  %1625 = vmatprep.subr.bf16.mxu0 %v6648_v58 }
 0x1bc   : > { %1668 = vmatprep.subr.bf16.mxu1 %v6651_v59 }
 0x1be   : > { %1626 = vmatpush2.bf16.msra.mxu0 %v6646_v60 }
 0x1bf   : > { %1669 = vmatpush2.bf16.msra.mxu1 %v6649_v61  ;;  %1627 = vmatprep.subr.bf16.mxu0 %v6654_v62 }
 0x1c0   : > { %1670 = vmatprep.subr.bf16.mxu1 %v6657_v63 }
 0x1c2   : > { %1628 = vmatpush2.bf16.msra.mxu0 %v6652_v0 }
 0x1c3   : > { %1671 = vmatpush2.bf16.msra.mxu1 %v6655_v1  ;;  %1629 = vmatprep.subr.bf16.mxu0 %v6660_v2 }
 0x1c4   : > { %1672 = vmatprep.subr.bf16.mxu1 %v6663_v3 }
 0x1c6   : > { %1630 = vmatpush2.bf16.msra.mxu0 %v6658_v4 }
 0x1c7   : > { %1673 = vmatpush2.bf16.msra.mxu1 %v6661_v5  ;;  %1631 = vmatprep.subr.bf16.mxu0 %v6666_v6 }
 0x1c8   : > { %1674 = vmatprep.subr.bf16.mxu1 %v6669_v7 }
 0x1ca   : > { %1632 = vmatpush2.bf16.msra.mxu0 %v6664_v8 }
 0x1cb   : > { %1675 = vmatpush2.bf16.msra.mxu1 %v6667_v9  ;;  %1633 = vmatprep.subr.bf16.mxu0 %v6672_v10 }
 0x1cc   : > { %1676 = vmatprep.subr.bf16.mxu1 %v6675_v11 }
 0x1ce   : > { %1634 = vmatpush2.bf16.msra.mxu0 %v6670_v12 }
 0x1cf   : > { %1677 = vmatpush2.bf16.msra.mxu1 %v6673_v13 }
 0x1d1   : > { %1636 = vmatmul.mubr.bf16.vlgmr.msra.gmra.mxu0 %v5578_v14 }
 0x1d2   : > { %1679 = vmatmul.mubr.bf16.vlgmr.msra.gmra.mxu1 %v5580_v15 }
 0x251   : > { %v1551_v18 = vpop.f32.mrf.mxu0 }
 0x252   : > { %v1594_v19 = vpop.f32.mrf.mxu1  ;;  %v1552_v29 = vadd.f32 %v1551_v18, %v830_v25 }
 0x253   : > { %v1553_v23 = vpop.f32.mrf.mxu0 }
 0x254   : > { %v1596_v24 = vpop.f32.mrf.mxu1  ;;  %v1554_v30 = vadd.f32 %v1553_v23, %v834_v26  ;;  %v1595_v33 = vadd.f32 %v1594_v19, %v1552_v29 }
 0x255   : > { %v1555_v27 = vpop.f32.mrf.mxu0 }
 0x256   : > { %v1598_v28 = vpop.f32.mrf.mxu1  ;;  %v1556_v34 = vadd.f32 %v1555_v27, %v830_v25  ;;  %v1597_v37 = vadd.f32 %v1596_v24, %v1554_v30 }
 0x257   : > { %v1557_v31 = vpop.f32.mrf.mxu0 }
 0x258   : > { %v1600_v32 = vpop.f32.mrf.mxu1  ;;  %v1558_v38 = vadd.f32 %v1557_v31, %v834_v26  ;;  %v1599_v42 = vadd.f32 %v1598_v28, %v1556_v34 }
 0x25a   : > { %v1601_v47 = vadd.f32 %v1600_v32, %v1558_v38 }
 0x291   : > { %v1637_v35 = vpop.f32.mrf.mxu0 }
 0x292   : > { %v1680_v36 = vpop.f32.mrf.mxu1  ;;  %v1638_v39 = vadd.f32 %v1637_v35, %v1595_v33 }
 0x293   : > { %v1639_v40 = vpop.f32.mrf.mxu0 }
 0x294   : > { %v1682_v41 = vpop.f32.mrf.mxu1  ;;  %v1681_v43 = vadd.f32 %v1680_v36, %v1638_v39  ;;  %v1640_v44 = vadd.f32 %v1639_v40, %v1597_v37 }
 0x295   : > { %v1641_v45 = vpop.f32.mrf.mxu0 }
 0x296   : > { %v1684_v46 = vpop.f32.mrf.mxu1  ;;  %v1683_v48 = vadd.f32 %v1682_v41, %v1640_v44  ;;  %v1642_v49 = vadd.f32 %v1641_v45, %v1599_v42  ;;  %v1689_v51 = vmax.f32 %v1681_v43, 0.0 }
 0x297   : > { %v1643_v50 = vpop.f32.mrf.mxu0 }
 0x298   : > { %v1690_v52 = vmax.f32 %v1683_v48, 0.0  ;;  %v1685_v53 = vadd.f32 %v1684_v46, %v1642_v49  ;;  %v1644_v54 = vadd.f32 %v1643_v50, %v1601_v47  ;;  %v1686_v55 = vpop.f32.mrf.mxu1 }
 0x29a   : > { %v6202_v56 = vpack.c.bf16 %v1690_v52, %v1689_v51  ;;  %v1687_v57 = vadd.f32 %v1686_v55, %v1644_v54  ;;  %v1691_v58 = vmax.f32 %v1685_v53, 0.0 }
 0x29c   : > { %1708 = vst [vmem:[%s1707_s28] sm:$0xff] %v6202_v56  ;;  %v1692_v59 = vmax.f32 %v1687_v57, 0.0 }
 0x29e   : > { %v6203_v60 = vpack.c.bf16 %v1692_v59, %v1691_v58 }
 0x2a0   : > { %1709 = vst [vmem:[%s1707_s28 + $0x8] sm:$0xff] %v6203_v60 }
 0x2a1 PF: > { %p1711_p12 = scmp.lt.s32.totalorder %s7775_s21, 10 }
 0x2a3   : > { %p1712_p5 = pnand %p5573_p7, %p1711_p12 }
 0x2a4   : > { %s5884_s30 = sadd.s32 (!%p1712_p5), 4294967291, %s7775_s21 }
 0x2a5   : > { %1715 = sbr.rel (%p1712_p5) target bundleno = 1083 (0x43b), region = 100  ;;  %s6207_s29 = sshll.u32 (!%p1712_p5), %s5884_s30, 4 }
 0x2a6   : > { %s3002_s7 = scalar_lea.vmem (!%p1712_p5), [#allocation3], %s6207_s29 }
 0x2aa   : > { %v6676_v61 = vld [vmem:[%s8137_s22 + $0x174] ss:$8 sps:$4 sm:$0xff]   ;;  %v6680_v63 = vld [vmem:[%s8137_s22 + $0x170] ss:$8 sps:$4 sm:$0xff]   ;;  %v6682_v1 = vld [vmem:[%s8137_s22 + $0x164] ss:$8 sps:$4 sm:$0xff]  }
 0x2ab   : > { %v6678_v62 = vld [vmem:[%s8137_s22 + $0x74] ss:$8 sps:$4 sm:$0xff]   ;;  %1955 = vmatprep.subr.bf16.mxu0 %v6676_v61  ;;  %v6681_v0 = vld [vmem:[%s8137_s22 + $0x70] ss:$8 sps:$4 sm:$0xff]   ;;  %v6684_v2 = vld [vmem:[%s8137_s22 + $0x64] ss:$8 sps:$4 sm:$0xff]  }
 0x2ac   : > { %2168 = vmatprep.subr.bf16.mxu1 %v6678_v62  ;;  %1956 = vmatpush1.bf16.msra.mxu0 %v6680_v63  ;;  %v6686_v3 = vld [vmem:[%s8137_s22 + $0x160] ss:$8 sps:$4 sm:$0xff]   ;;  %v6688_v5 = vld [vmem:[%s8137_s22 + $0x154] ss:$8 sps:$4 sm:$0xff]   ;;  %v6692_v7 = vld [vmem:[%s8137_s22 + $0x150] ss:$8 sps:$4 sm:$0xff]  }
 0x2ad   : > { %2169 = vmatpush1.bf16.msra.mxu1 %v6681_v0  ;;  %1957 = vmatprep.subr.bf16.mxu0 %v6682_v1  ;;  %v6687_v4 = vld [vmem:[%s8137_s22 + $0x60] ss:$8 sps:$4 sm:$0xff]   ;;  %v6690_v6 = vld [vmem:[%s8137_s22 + $0x54] ss:$8 sps:$4 sm:$0xff]   ;;  %v6693_v8 = vld [vmem:[%s8137_s22 + $0x50] ss:$8 sps:$4 sm:$0xff]  }
 0x2ae   : > { %2170 = vmatprep.subr.bf16.mxu1 %v6684_v2  ;;  %v6694_v9 = vld [vmem:[%s8137_s22 + $0x144] ss:$8 sps:$4 sm:$0xff]   ;;  %v6698_v11 = vld [vmem:[%s8137_s22 + $0x140] ss:$8 sps:$4 sm:$0xff]   ;;  %v6700_v13 = vld [vmem:[%s8137_s22 + $0x134] ss:$8 sps:$4 sm:$0xff]  }
 0x2af   : > { %v6696_v10 = vld [vmem:[%s8137_s22 + $0x44] ss:$8 sps:$4 sm:$0xff]   ;;  %v6699_v12 = vld [vmem:[%s8137_s22 + $0x40] ss:$8 sps:$4 sm:$0xff]   ;;  %v6702_v14 = vld [vmem:[%s8137_s22 + $0x34] ss:$8 sps:$4 sm:$0xff]  }
 0x2b0   : > { %1958 = vmatpush1.bf16.msra.mxu0 %v6686_v3  ;;  %v6704_v15 = vld [vmem:[%s8137_s22 + $0x130] ss:$8 sps:$4 sm:$0xff]   ;;  %v6706_v17 = vld [vmem:[%s8137_s22 + $0x124] ss:$8 sps:$4 sm:$0xff]   ;;  %v6710_v19 = vld [vmem:[%s8137_s22 + $0x120] ss:$8 sps:$4 sm:$0xff]  }
 0x2b1   : > { %2171 = vmatpush1.bf16.msra.mxu1 %v6687_v4  ;;  %1959 = vmatprep.subr.bf16.mxu0 %v6688_v5  ;;  %v6705_v16 = vld [vmem:[%s8137_s22 + $0x30] ss:$8 sps:$4 sm:$0xff]   ;;  %v6708_v18 = vld [vmem:[%s8137_s22 + $0x24] ss:$8 sps:$4 sm:$0xff]   ;;  %v6711_v20 = vld [vmem:[%s8137_s22 + $0x20] ss:$8 sps:$4 sm:$0xff]  }
 0x2b2   : > { %2172 = vmatprep.subr.bf16.mxu1 %v6690_v6  ;;  %v6712_v21 = vld [vmem:[%s8137_s22 + $0x114] ss:$8 sps:$4 sm:$0xff]   ;;  %v6716_v23 = vld [vmem:[%s8137_s22 + $0x110] ss:$8 sps:$4 sm:$0xff]   ;;  %v6718_v25 = vld [vmem:[%s8137_s22 + $0x104] ss:$8 sps:$4 sm:$0xff]  }
 0x2b3   : > { %v6714_v22 = vld [vmem:[%s8137_s22 + $0x14] ss:$8 sps:$4 sm:$0xff]   ;;  %v6717_v24 = vld [vmem:[%s8137_s22 + $0x10] ss:$8 sps:$4 sm:$0xff]   ;;  %v6720_v26 = vld [vmem:[%s8137_s22 + $0x4] ss:$8 sps:$4 sm:$0xff]  }
 0x2b4   : > { %1960 = vmatpush1.bf16.msra.mxu0 %v6692_v7  ;;  %v6722_v27 = vld [vmem:[%s8137_s22 + $0x100] ss:$8 sps:$4 sm:$0xff]   ;;  %v6724_v29 = vld [vmem:[%s8137_s22 + $0x1f4] ss:$8 sps:$4 sm:$0xff]   ;;  %v6728_v31 = vld [vmem:[%s8137_s22 + $0x1f0] ss:$8 sps:$4 sm:$0xff]  }
 0x2b5   : > { %2173 = vmatpush1.bf16.msra.mxu1 %v6693_v8  ;;  %1961 = vmatprep.subr.bf16.mxu0 %v6694_v9  ;;  %v6723_v28 = vld [vmem:[%s8137_s22] ss:$8 sps:$4 sm:$0xff]   ;;  %v6726_v30 = vld [vmem:[%s8137_s22 + $0xf4] ss:$8 sps:$4 sm:$0xff]   ;;  %v6729_v32 = vld [vmem:[%s8137_s22 + $0xf0] ss:$8 sps:$4 sm:$0xff]  }
 0x2b6   : > { %2174 = vmatprep.subr.bf16.mxu1 %v6696_v10  ;;  %v6730_v33 = vld [vmem:[%s8137_s22 + $0x1e4] ss:$8 sps:$4 sm:$0xff]   ;;  %v6734_v35 = vld [vmem:[%s8137_s22 + $0x1e0] ss:$8 sps:$4 sm:$0xff]   ;;  %v6736_v37 = vld [vmem:[%s8137_s22 + $0x1d4] ss:$8 sps:$4 sm:$0xff]  }
 0x2b7   : > { %v6732_v34 = vld [vmem:[%s8137_s22 + $0xe4] ss:$8 sps:$4 sm:$0xff]   ;;  %v6735_v36 = vld [vmem:[%s8137_s22 + $0xe0] ss:$8 sps:$4 sm:$0xff]   ;;  %v6738_v38 = vld [vmem:[%s8137_s22 + $0xd4] ss:$8 sps:$4 sm:$0xff]  }
 0x2b8   : > { %1962 = vmatpush1.bf16.msra.mxu0 %v6698_v11  ;;  %v6740_v39 = vld [vmem:[%s8137_s22 + $0x1d0] ss:$8 sps:$4 sm:$0xff]   ;;  %v6742_v41 = vld [vmem:[%s8137_s22 + $0x1c4] ss:$8 sps:$4 sm:$0xff]   ;;  %v6746_v43 = vld [vmem:[%s8137_s22 + $0x1c0] ss:$8 sps:$4 sm:$0xff]  }
 0x2b9   : > { %2175 = vmatpush1.bf16.msra.mxu1 %v6699_v12  ;;  %1963 = vmatprep.subr.bf16.mxu0 %v6700_v13  ;;  %v6741_v40 = vld [vmem:[%s8137_s22 + $0xd0] ss:$8 sps:$4 sm:$0xff]   ;;  %v6744_v42 = vld [vmem:[%s8137_s22 + $0xc4] ss:$8 sps:$4 sm:$0xff]   ;;  %v6747_v44 = vld [vmem:[%s8137_s22 + $0xc0] ss:$8 sps:$4 sm:$0xff]  }
 0x2ba   : > { %2176 = vmatprep.subr.bf16.mxu1 %v6702_v14  ;;  %v6748_v45 = vld [vmem:[%s8137_s22 + $0x1b4] ss:$8 sps:$4 sm:$0xff]   ;;  %v6774_v46 = vld [vmem:[#allocation2 + $0x14] ss:$8 sps:$4 sm:$0xff]   ;;  %v6777_v48 = vld [vmem:[#allocation2 + $0x4] ss:$8 sps:$4 sm:$0xff]  }
 0x2bb   : > { %v6750_v47 = vld [vmem:[%s8137_s22 + $0xb4] ss:$8 sps:$4 sm:$0xff]   ;;  %1987 = vmatprep.mubr.bf16.mxu0 %v6774_v46  ;;  %v6752_v49 = vld [vmem:[%s8137_s22 + $0x1b0] ss:$8 sps:$4 sm:$0xff]   ;;  %2200 = vmatprep.mubr.bf16.mxu1 %v6777_v48  ;;  %v6754_v51 = vld [vmem:[%s8137_s22 + $0x1a4] ss:$8 sps:$4 sm:$0xff]  }
 0x2bc   : > { %1964 = vmatpush1.bf16.msra.mxu0 %v6704_v15  ;;  %v6753_v50 = vld [vmem:[%s8137_s22 + $0xb0] ss:$8 sps:$4 sm:$0xff]   ;;  %v6756_v52 = vld [vmem:[%s8137_s22 + $0xa4] ss:$8 sps:$4 sm:$0xff]   ;;  %v6758_v53 = vld [vmem:[%s8137_s22 + $0x1a0] ss:$8 sps:$4 sm:$0xff]  }
 0x2bd   : > { %2177 = vmatpush1.bf16.msra.mxu1 %v6705_v16  ;;  %1965 = vmatprep.subr.bf16.mxu0 %v6706_v17  ;;  %v6759_v54 = vld [vmem:[%s8137_s22 + $0xa0] ss:$8 sps:$4 sm:$0xff]   ;;  %v6760_v55 = vld [vmem:[%s8137_s22 + $0x194] ss:$8 sps:$4 sm:$0xff]   ;;  %v6764_v57 = vld [vmem:[%s8137_s22 + $0x190] ss:$8 sps:$4 sm:$0xff]  }
 0x2be   : > { %2178 = vmatprep.subr.bf16.mxu1 %v6708_v18  ;;  %v6762_v56 = vld [vmem:[%s8137_s22 + $0x94] ss:$8 sps:$4 sm:$0xff]   ;;  %v6765_v58 = vld [vmem:[%s8137_s22 + $0x90] ss:$8 sps:$4 sm:$0xff]   ;;  %v6766_v59 = vld [vmem:[%s8137_s22 + $0x184] ss:$8 sps:$4 sm:$0xff]  }
 0x2bf   : > { %v6768_v60 = vld [vmem:[%s8137_s22 + $0x84] ss:$8 sps:$4 sm:$0xff]   ;;  %v6770_v61 = vld [vmem:[%s8137_s22 + $0x180] ss:$8 sps:$4 sm:$0xff]   ;;  %v6780_v63 = vld [vmem:[%s8137_s22 + $0x274] ss:$8 sps:$4 sm:$0xff]  }
 0x2c0   : > { %1966 = vmatpush1.bf16.msra.mxu0 %v6710_v19  ;;  %v6771_v62 = vld [vmem:[%s8137_s22 + $0x80] ss:$8 sps:$4 sm:$0xff]   ;;  %v6783_v0 = vld [vmem:[%s8137_s22 + $0x374] ss:$8 sps:$4 sm:$0xff]   ;;  %v6778_v3 = vld [vmem:[%s8137_s22 + $0x270] ss:$8 sps:$4 sm:$0xff]  }
 0x2c1   : > { %2179 = vmatpush1.bf16.msra.mxu1 %v6711_v20  ;;  %1967 = vmatprep.subr.bf16.mxu0 %v6712_v21  ;;  %v6772_v1 = vld [vmem:[#allocation2 + $0x10] ss:$8 sps:$4 sm:$0xff]   ;;  %v6775_v2 = vld [vmem:[#allocation2] ss:$8 sps:$4 sm:$0xff]   ;;  %v6781_v4 = vld [vmem:[%s8137_s22 + $0x370] ss:$8 sps:$4 sm:$0xff]  }
 0x2c2   : > { %2180 = vmatprep.subr.bf16.mxu1 %v6714_v22  ;;  %v6786_v5 = vld [vmem:[%s8137_s22 + $0x264] ss:$8 sps:$4 sm:$0xff]   ;;  %v6784_v7 = vld [vmem:[%s8137_s22 + $0x260] ss:$8 sps:$4 sm:$0xff]   ;;  %v6792_v9 = vld [vmem:[%s8137_s22 + $0x254] ss:$8 sps:$4 sm:$0xff]  }
 0x2c3   : > { %v6789_v6 = vld [vmem:[%s8137_s22 + $0x364] ss:$8 sps:$4 sm:$0xff]   ;;  %v6787_v8 = vld [vmem:[%s8137_s22 + $0x360] ss:$8 sps:$4 sm:$0xff]   ;;  %v6795_v10 = vld [vmem:[%s8137_s22 + $0x354] ss:$8 sps:$4 sm:$0xff]  }
 0x2c4   : > { %1968 = vmatpush1.bf16.msra.mxu0 %v6716_v23  ;;  %v6790_v11 = vld [vmem:[%s8137_s22 + $0x250] ss:$8 sps:$4 sm:$0xff]   ;;  %v6798_v13 = vld [vmem:[%s8137_s22 + $0x244] ss:$8 sps:$4 sm:$0xff]   ;;  %v6796_v15 = vld [vmem:[%s8137_s22 + $0x240] ss:$8 sps:$4 sm:$0xff]  }
 0x2c5   : > { %2181 = vmatpush1.bf16.msra.mxu1 %v6717_v24  ;;  %1969 = vmatprep.subr.bf16.mxu0 %v6718_v25  ;;  %v6793_v12 = vld [vmem:[%s8137_s22 + $0x350] ss:$8 sps:$4 sm:$0xff]   ;;  %v6801_v14 = vld [vmem:[%s8137_s22 + $0x344] ss:$8 sps:$4 sm:$0xff]   ;;  %v6799_v16 = vld [vmem:[%s8137_s22 + $0x340] ss:$8 sps:$4 sm:$0xff]  }
 0x2c6   : > { %2182 = vmatprep.subr.bf16.mxu1 %v6720_v26  ;;  %v6804_v17 = vld [vmem:[%s8137_s22 + $0x234] ss:$8 sps:$4 sm:$0xff]   ;;  %v6802_v19 = vld [vmem:[%s8137_s22 + $0x230] ss:$8 sps:$4 sm:$0xff]   ;;  %v6810_v21 = vld [vmem:[%s8137_s22 + $0x224] ss:$8 sps:$4 sm:$0xff]  }
 0x2c7   : > { %v6807_v18 = vld [vmem:[%s8137_s22 + $0x334] ss:$8 sps:$4 sm:$0xff]   ;;  %v6805_v20 = vld [vmem:[%s8137_s22 + $0x330] ss:$8 sps:$4 sm:$0xff]   ;;  %v6813_v22 = vld [vmem:[%s8137_s22 + $0x324] ss:$8 sps:$4 sm:$0xff]  }
 0x2c8   : > { %1970 = vmatpush1.bf16.msra.mxu0 %v6722_v27  ;;  %v6808_v23 = vld [vmem:[%s8137_s22 + $0x220] ss:$8 sps:$4 sm:$0xff]   ;;  %v6816_v25 = vld [vmem:[%s8137_s22 + $0x214] ss:$8 sps:$4 sm:$0xff]   ;;  %v6814_v27 = vld [vmem:[%s8137_s22 + $0x210] ss:$8 sps:$4 sm:$0xff]  }
 0x2c9   : > { %2183 = vmatpush1.bf16.msra.mxu1 %v6723_v28  ;;  %1971 = vmatprep.subr.bf16.mxu0 %v6724_v29  ;;  %v6811_v24 = vld [vmem:[%s8137_s22 + $0x320] ss:$8 sps:$4 sm:$0xff]   ;;  %v6819_v26 = vld [vmem:[%s8137_s22 + $0x314] ss:$8 sps:$4 sm:$0xff]   ;;  %v6817_v28 = vld [vmem:[%s8137_s22 + $0x310] ss:$8 sps:$4 sm:$0xff]  }
 0x2ca   : > { %2184 = vmatprep.subr.bf16.mxu1 %v6726_v30  ;;  %v6822_v29 = vld [vmem:[%s8137_s22 + $0x204] ss:$8 sps:$4 sm:$0xff]   ;;  %v6841_v46 = vld [vmem:[%s8137_s22 + $0x3d0] ss:$8 sps:$4 sm:$0xff]  }
 0x2cb   : > { %v6825_v30 = vld [vmem:[%s8137_s22 + $0x304] ss:$8 sps:$4 sm:$0xff]  }
 0x2cc   : > { %1972 = vmatpush2.bf16.msra.mxu0 %v6728_v31  ;;  %v6876_v31 = vld [vmem:[#allocation2 + $0x24] ss:$8 sps:$4 sm:$0xff]   ;;  %v6849_v48 = vld [vmem:[%s8137_s22 + $0x3c4] ss:$8 sps:$4 sm:$0xff]  }
 0x2cd   : > { %2185 = vmatpush2.bf16.msra.mxu1 %v6729_v32  ;;  %1973 = vmatprep.subr.bf16.mxu0 %v6730_v33  ;;  %v6820_v32 = vld [vmem:[%s8137_s22 + $0x200] ss:$8 sps:$4 sm:$0xff]  }
 0x2ce   : > { %2186 = vmatprep.subr.bf16.mxu1 %v6732_v34  ;;  %v6823_v33 = vld [vmem:[%s8137_s22 + $0x300] ss:$8 sps:$4 sm:$0xff]   ;;  %v6882_v34 = vld [vmem:[#allocation2 + $0x34] ss:$8 sps:$4 sm:$0xff]  }
 0x2d0   : > { %1974 = vmatpush2.bf16.msra.mxu0 %v6734_v35  ;;  %v6828_v35 = vld [vmem:[%s8137_s22 + $0x2f4] ss:$8 sps:$4 sm:$0xff]  }
 0x2d1   : > { %2187 = vmatpush2.bf16.msra.mxu1 %v6735_v36  ;;  %1975 = vmatprep.subr.bf16.mxu0 %v6736_v37  ;;  %v6831_v36 = vld [vmem:[%s8137_s22 + $0x3f4] ss:$8 sps:$4 sm:$0xff]   ;;  %v6826_v37 = vld [vmem:[%s8137_s22 + $0x2f0] ss:$8 sps:$4 sm:$0xff]  }
 0x2d2   : > { %2188 = vmatprep.subr.bf16.mxu1 %v6738_v38  ;;  %v6829_v38 = vld [vmem:[%s8137_s22 + $0x3f0] ss:$8 sps:$4 sm:$0xff]  }
 0x2d4   : > { %1976 = vmatpush2.bf16.msra.mxu0 %v6740_v39  ;;  %v6834_v39 = vld [vmem:[%s8137_s22 + $0x2e4] ss:$8 sps:$4 sm:$0xff]  }
 0x2d5   : > { %2189 = vmatpush2.bf16.msra.mxu1 %v6741_v40  ;;  %1977 = vmatprep.subr.bf16.mxu0 %v6742_v41  ;;  %v6837_v40 = vld [vmem:[%s8137_s22 + $0x3e4] ss:$8 sps:$4 sm:$0xff]   ;;  %v6832_v41 = vld [vmem:[%s8137_s22 + $0x2e0] ss:$8 sps:$4 sm:$0xff]  }
 0x2d6   : > { %2190 = vmatprep.subr.bf16.mxu1 %v6744_v42  ;;  %v6835_v42 = vld [vmem:[%s8137_s22 + $0x3e0] ss:$8 sps:$4 sm:$0xff]  }
 0x2d8   : > { %1978 = vmatpush2.bf16.msra.mxu0 %v6746_v43  ;;  %v6840_v43 = vld [vmem:[%s8137_s22 + $0x2d4] ss:$8 sps:$4 sm:$0xff]  }
 0x2d9   : > { %2191 = vmatpush2.bf16.msra.mxu1 %v6747_v44  ;;  %1979 = vmatprep.subr.bf16.mxu0 %v6748_v45  ;;  %v6843_v44 = vld [vmem:[%s8137_s22 + $0x3d4] ss:$8 sps:$4 sm:$0xff]   ;;  %v6838_v45 = vld [vmem:[%s8137_s22 + $0x2d0] ss:$8 sps:$4 sm:$0xff]  }
 0x2da   : > { %2192 = vmatprep.subr.bf16.mxu1 %v6750_v47  ;;  %v6846_v47 = vld [vmem:[%s8137_s22 + $0x2c4] ss:$8 sps:$4 sm:$0xff]  }
 0x2dc   : > { %1980 = vmatpush2.bf16.msra.mxu0 %v6752_v49  ;;  %v6844_v49 = vld [vmem:[%s8137_s22 + $0x2c0] ss:$8 sps:$4 sm:$0xff]  }
 0x2dd   : > { %2193 = vmatpush2.bf16.msra.mxu1 %v6753_v50  ;;  %1981 = vmatprep.subr.bf16.mxu0 %v6754_v51  ;;  %v6847_v50 = vld [vmem:[%s8137_s22 + $0x3c0] ss:$8 sps:$4 sm:$0xff]   ;;  %v6852_v51 = vld [vmem:[%s8137_s22 + $0x2b4] ss:$8 sps:$4 sm:$0xff]  }
 0x2de   : > { %2194 = vmatprep.subr.bf16.mxu1 %v6756_v52  ;;  %v6855_v52 = vld [vmem:[%s8137_s22 + $0x3b4] ss:$8 sps:$4 sm:$0xff]  }
 0x2e0   : > { %1982 = vmatpush2.bf16.msra.mxu0 %v6758_v53  ;;  %v6850_v53 = vld [vmem:[%s8137_s22 + $0x2b0] ss:$8 sps:$4 sm:$0xff]  }
 0x2e1   : > { %2195 = vmatpush2.bf16.msra.mxu1 %v6759_v54  ;;  %1983 = vmatprep.subr.bf16.mxu0 %v6760_v55  ;;  %v6853_v54 = vld [vmem:[%s8137_s22 + $0x3b0] ss:$8 sps:$4 sm:$0xff]   ;;  %v6858_v55 = vld [vmem:[%s8137_s22 + $0x2a4] ss:$8 sps:$4 sm:$0xff]  }
 0x2e2   : > { %2196 = vmatprep.subr.bf16.mxu1 %v6762_v56  ;;  %v6861_v56 = vld [vmem:[%s8137_s22 + $0x3a4] ss:$8 sps:$4 sm:$0xff]  }
 0x2e4   : > { %1984 = vmatpush2.bf16.msra.mxu0 %v6764_v57  ;;  %v6856_v57 = vld [vmem:[%s8137_s22 + $0x2a0] ss:$8 sps:$4 sm:$0xff]  }
 0x2e5   : > { %2197 = vmatpush2.bf16.msra.mxu1 %v6765_v58  ;;  %1985 = vmatprep.subr.bf16.mxu0 %v6766_v59  ;;  %v6859_v58 = vld [vmem:[%s8137_s22 + $0x3a0] ss:$8 sps:$4 sm:$0xff]   ;;  %v6864_v59 = vld [vmem:[%s8137_s22 + $0x294] ss:$8 sps:$4 sm:$0xff]  }
 0x2e6   : > { %2198 = vmatprep.subr.bf16.mxu1 %v6768_v60  ;;  %v6867_v60 = vld [vmem:[%s8137_s22 + $0x394] ss:$8 sps:$4 sm:$0xff]  }
 0x2e8   : > { %1986 = vmatpush2.bf16.msra.mxu0 %v6770_v61  ;;  %v6862_v61 = vld [vmem:[%s8137_s22 + $0x290] ss:$8 sps:$4 sm:$0xff]  }
 0x2e9   : > { %2199 = vmatpush2.bf16.msra.mxu1 %v6771_v62  ;;  %2416 = vmatprep.subr.bf16.mxu0 %v6780_v63  ;;  %v6865_v62 = vld [vmem:[%s8137_s22 + $0x390] ss:$8 sps:$4 sm:$0xff]   ;;  %v6870_v63 = vld [vmem:[%s8137_s22 + $0x284] ss:$8 sps:$4 sm:$0xff]  }
 0x2ea   : > { %2668 = vmatprep.subr.bf16.mxu1 %v6783_v0  ;;  %v6873_v0 = vld [vmem:[%s8137_s22 + $0x384] ss:$8 sps:$4 sm:$0xff]  }
 0x2eb   : > { %1988 = vmatmul.mubr.bf16.vlgmr.msra.gmra.mxu0 %v6772_v1  ;;  %v6868_v1 = vld [vmem:[%s8137_s22 + $0x280] ss:$8 sps:$4 sm:$0xff]  }
 0x2ec   : > { %2201 = vmatmul.mubr.bf16.vlgmr.msra.gmra.mxu1 %v6775_v2  ;;  %2417 = vmatpush1.bf16.msra.mxu0 %v6778_v3  ;;  %v6871_v2 = vld [vmem:[%s8137_s22 + $0x380] ss:$8 sps:$4 sm:$0xff]   ;;  %v6879_v3 = vld [vmem:[%s8137_s22 + $0x474] ss:$8 sps:$4 sm:$0xff]  }
 0x2ed   : > { %2669 = vmatpush1.bf16.msra.mxu1 %v6781_v4  ;;  %2418 = vmatprep.subr.bf16.mxu0 %v6786_v5  ;;  %v6874_v4 = vld [vmem:[#allocation2 + $0x20] ss:$8 sps:$4 sm:$0xff]   ;;  %v6880_v5 = vld [vmem:[#allocation2 + $0x30] ss:$8 sps:$4 sm:$0xff]  }
 0x2ee   : > { %2670 = vmatprep.subr.bf16.mxu1 %v6789_v6  ;;  %2448 = vmatprep.mubr.bf16.mxu0 %v6876_v31  ;;  %v6877_v6 = vld [vmem:[%s8137_s22 + $0x470] ss:$8 sps:$4 sm:$0xff]  }
 0x2ef   : > { %2700 = vmatprep.mubr.bf16.mxu1 %v6882_v34  ;;  %v6916_v31 = vld [vmem:[%s8137_s22 + $0x4b0] ss:$8 sps:$4 sm:$0xff]   ;;  %v6924_v34 = vld [vmem:[%s8137_s22 + $0x494] ss:$8 sps:$4 sm:$0xff]  }
 0x2f0   : > { %2419 = vmatpush1.bf16.msra.mxu0 %v6784_v7  ;;  %v6930_v7 = vld [vmem:[#allocation2 + $0x44] ss:$8 sps:$4 sm:$0xff]  }
 0x2f1   : > { %2671 = vmatpush1.bf16.msra.mxu1 %v6787_v8  ;;  %2420 = vmatprep.subr.bf16.mxu0 %v6792_v9  ;;  %v6885_v8 = vld [vmem:[%s8137_s22 + $0x464] ss:$8 sps:$4 sm:$0xff]   ;;  %v6883_v9 = vld [vmem:[%s8137_s22 + $0x460] ss:$8 sps:$4 sm:$0xff]  }
 0x2f2   : > { %2672 = vmatprep.subr.bf16.mxu1 %v6795_v10  ;;  %v6888_v10 = vld [vmem:[%s8137_s22 + $0x454] ss:$8 sps:$4 sm:$0xff]  }
 0x2f4   : > { %2421 = vmatpush1.bf16.msra.mxu0 %v6790_v11  ;;  %v6886_v11 = vld [vmem:[%s8137_s22 + $0x450] ss:$8 sps:$4 sm:$0xff]  }
 0x2f5   : > { %2673 = vmatpush1.bf16.msra.mxu1 %v6793_v12  ;;  %2422 = vmatprep.subr.bf16.mxu0 %v6798_v13  ;;  %v6891_v12 = vld [vmem:[%s8137_s22 + $0x444] ss:$8 sps:$4 sm:$0xff]   ;;  %v6889_v13 = vld [vmem:[%s8137_s22 + $0x440] ss:$8 sps:$4 sm:$0xff]  }
 0x2f6   : > { %2674 = vmatprep.subr.bf16.mxu1 %v6801_v14  ;;  %v6894_v14 = vld [vmem:[%s8137_s22 + $0x434] ss:$8 sps:$4 sm:$0xff]  }
 0x2f8   : > { %2423 = vmatpush1.bf16.msra.mxu0 %v6796_v15  ;;  %v6892_v15 = vld [vmem:[%s8137_s22 + $0x430] ss:$8 sps:$4 sm:$0xff]  }
 0x2f9   : > { %2675 = vmatpush1.bf16.msra.mxu1 %v6799_v16  ;;  %2424 = vmatprep.subr.bf16.mxu0 %v6804_v17  ;;  %v6897_v16 = vld [vmem:[%s8137_s22 + $0x424] ss:$8 sps:$4 sm:$0xff]   ;;  %v6895_v17 = vld [vmem:[%s8137_s22 + $0x420] ss:$8 sps:$4 sm:$0xff]  }
 0x2fa   : > { %2676 = vmatprep.subr.bf16.mxu1 %v6807_v18  ;;  %v6900_v18 = vld [vmem:[%s8137_s22 + $0x414] ss:$8 sps:$4 sm:$0xff]  }
 0x2fc   : > { %2425 = vmatpush1.bf16.msra.mxu0 %v6802_v19  ;;  %v6898_v19 = vld [vmem:[%s8137_s22 + $0x410] ss:$8 sps:$4 sm:$0xff]  }
 0x2fd   : > { %2677 = vmatpush1.bf16.msra.mxu1 %v6805_v20  ;;  %2426 = vmatprep.subr.bf16.mxu0 %v6810_v21  ;;  %v6903_v20 = vld [vmem:[%s8137_s22 + $0x404] ss:$8 sps:$4 sm:$0xff]   ;;  %v6901_v21 = vld [vmem:[%s8137_s22 + $0x400] ss:$8 sps:$4 sm:$0xff]  }
 0x2fe   : > { %2678 = vmatprep.subr.bf16.mxu1 %v6813_v22  ;;  %v6906_v22 = vld [vmem:[%s8137_s22 + $0x4f4] ss:$8 sps:$4 sm:$0xff]  }
 0x300   : > { %2427 = vmatpush1.bf16.msra.mxu0 %v6808_v23  ;;  %v6904_v23 = vld [vmem:[%s8137_s22 + $0x4f0] ss:$8 sps:$4 sm:$0xff]  }
 0x301   : > { %2679 = vmatpush1.bf16.msra.mxu1 %v6811_v24  ;;  %2428 = vmatprep.subr.bf16.mxu0 %v6816_v25  ;;  %v6909_v24 = vld [vmem:[%s8137_s22 + $0x4e4] ss:$8 sps:$4 sm:$0xff]   ;;  %v6907_v25 = vld [vmem:[%s8137_s22 + $0x4e0] ss:$8 sps:$4 sm:$0xff]  }
 0x302   : > { %2680 = vmatprep.subr.bf16.mxu1 %v6819_v26  ;;  %v6912_v26 = vld [vmem:[%s8137_s22 + $0x4d4] ss:$8 sps:$4 sm:$0xff]  }
 0x304   : > { %2429 = vmatpush1.bf16.msra.mxu0 %v6814_v27  ;;  %v6910_v27 = vld [vmem:[%s8137_s22 + $0x4d0] ss:$8 sps:$4 sm:$0xff]  }
 0x305   : > { %2681 = vmatpush1.bf16.msra.mxu1 %v6817_v28  ;;  %2430 = vmatprep.subr.bf16.mxu0 %v6822_v29  ;;  %v6915_v28 = vld [vmem:[%s8137_s22 + $0x4c4] ss:$8 sps:$4 sm:$0xff]   ;;  %v6913_v29 = vld [vmem:[%s8137_s22 + $0x4c0] ss:$8 sps:$4 sm:$0xff]  }
 0x306   : > { %2682 = vmatprep.subr.bf16.mxu1 %v6825_v30  ;;  %v6918_v30 = vld [vmem:[%s8137_s22 + $0x4b4] ss:$8 sps:$4 sm:$0xff]  }
 0x308   : > { %2431 = vmatpush1.bf16.msra.mxu0 %v6820_v32  ;;  %v6921_v32 = vld [vmem:[%s8137_s22 + $0x4a4] ss:$8 sps:$4 sm:$0xff]  }
 0x309   : > { %2683 = vmatpush1.bf16.msra.mxu1 %v6823_v33  ;;  %2432 = vmatprep.subr.bf16.mxu0 %v6828_v35  ;;  %v6919_v33 = vld [vmem:[%s8137_s22 + $0x4a0] ss:$8 sps:$4 sm:$0xff]   ;;  %v6922_v35 = vld [vmem:[%s8137_s22 + $0x490] ss:$8 sps:$4 sm:$0xff]  }
 0x30a   : > { %2684 = vmatprep.subr.bf16.mxu1 %v6831_v36  ;;  %v6927_v36 = vld [vmem:[%s8137_s22 + $0x484] ss:$8 sps:$4 sm:$0xff]  }
 0x30c   : > { %2433 = vmatpush2.bf16.msra.mxu0 %v6826_v37  ;;  %v6925_v37 = vld [vmem:[%s8137_s22 + $0x480] ss:$8 sps:$4 sm:$0xff]  }
 0x30d   : > { %2685 = vmatpush2.bf16.msra.mxu1 %v6829_v38  ;;  %2434 = vmatprep.subr.bf16.mxu0 %v6834_v39  ;;  %v6928_v38 = vld [vmem:[#allocation2 + $0x40] ss:$8 sps:$4 sm:$0xff]  }
 0x30e   : > { %2686 = vmatprep.subr.bf16.mxu1 %v6837_v40 }
 0x310   : > { %2435 = vmatpush2.bf16.msra.mxu0 %v6832_v41 }
 0x311   : > { %2687 = vmatpush2.bf16.msra.mxu1 %v6835_v42  ;;  %2436 = vmatprep.subr.bf16.mxu0 %v6840_v43 }
 0x312   : > { %2688 = vmatprep.subr.bf16.mxu1 %v6843_v44 }
 0x314   : > { %2437 = vmatpush2.bf16.msra.mxu0 %v6838_v45 }
 0x315   : > { %2689 = vmatpush2.bf16.msra.mxu1 %v6841_v46  ;;  %2438 = vmatprep.subr.bf16.mxu0 %v6846_v47  ;;  %v2969_v47 = vlaneseq }
 0x316   : > { %2690 = vmatprep.subr.bf16.mxu1 %v6849_v48 }
 0x318   : > { %2439 = vmatpush2.bf16.msra.mxu0 %v6844_v49 }
 0x319   : > { %2691 = vmatpush2.bf16.msra.mxu1 %v6847_v50  ;;  %2440 = vmatprep.subr.bf16.mxu0 %v6852_v51  ;;  %v2970_v51 = vshrl.u32 %v2969_v47, 7 }
 0x31a   : > { %2692 = vmatprep.subr.bf16.mxu1 %v6855_v52 }
 0x31c   : > { %2441 = vmatpush2.bf16.msra.mxu0 %v6850_v53 }
 0x31d   : > { %2693 = vmatpush2.bf16.msra.mxu1 %v6853_v54  ;;  %2442 = vmatprep.subr.bf16.mxu0 %v6858_v55 }
 0x31e   : > { %2694 = vmatprep.subr.bf16.mxu1 %v6861_v56 }
 0x320   : > { %2443 = vmatpush2.bf16.msra.mxu0 %v6856_v57  ;;  %v2971_v57 = vsub.s32 0, %v2970_v51 }
 0x321   : > { %2695 = vmatpush2.bf16.msra.mxu1 %v6859_v58  ;;  %2444 = vmatprep.subr.bf16.mxu0 %v6864_v59  ;;  %v2967_v58 = vld [vmem:[%s569_s16] sm:$0x3] }
 0x322   : > { %2696 = vmatprep.subr.bf16.mxu1 %v6867_v60 }
 0x324   : > { %2445 = vmatpush2.bf16.msra.mxu0 %v6862_v61  ;;  %v2975_v61 = vsub.s32 1, %v2970_v51 }
 0x325   : > { %2697 = vmatpush2.bf16.msra.mxu1 %v6865_v62  ;;  %2446 = vmatprep.subr.bf16.mxu0 %v6870_v63 }
 0x326   : > { %2698 = vmatprep.subr.bf16.mxu1 %v6873_v0 }
 0x328   : > { %2447 = vmatpush2.bf16.msra.mxu0 %v6868_v1 }
 0x329   : > { %2699 = vmatpush2.bf16.msra.mxu1 %v6871_v2  ;;  %2920 = vmatprep.subr.bf16.mxu0 %v6879_v3  ;;  %v2972_v3 = vrot.slane %v2967_v58, %v2971_v57 }
 0x32b   : > { %2449 = vmatmul.mubr.bf16.vlgmr.msra.gmra.mxu0 %v6874_v4 }
 0x32c   : > { %2701 = vmatmul.mubr.bf16.vlgmr.msra.gmra.mxu1 %v6880_v5  ;;  %2921 = vmatpush1.bf16.msra.mxu0 %v6877_v6 }
 0x32d   : > { %2952 = vmatprep.mubr.bf16.mxu0 %v6930_v7  ;;  %2922 = vmatprep.subr.bf16.mxu0 %v6885_v8  ;;  %v2976_v8 = vrot.slane %v2967_v58, %v2975_v61 }
 0x330   : > { %2923 = vmatpush1.bf16.msra.mxu0 %v6883_v9 }
 0x331   : > { %2924 = vmatprep.subr.bf16.mxu0 %v6888_v10 }
 0x334   : > { %2925 = vmatpush1.bf16.msra.mxu0 %v6886_v11 }
 0x335   : > { %2926 = vmatprep.subr.bf16.mxu0 %v6891_v12 }
 0x338   : > { %2927 = vmatpush1.bf16.msra.mxu0 %v6889_v13 }
 0x339   : > { %2928 = vmatprep.subr.bf16.mxu0 %v6894_v14 }
 0x33c   : > { %2929 = vmatpush1.bf16.msra.mxu0 %v6892_v15 }
 0x33d   : > { %2930 = vmatprep.subr.bf16.mxu0 %v6897_v16 }
 0x340   : > { %2931 = vmatpush1.bf16.msra.mxu0 %v6895_v17 }
 0x341   : > { %2932 = vmatprep.subr.bf16.mxu0 %v6900_v18 }
 0x344   : > { %2933 = vmatpush1.bf16.msra.mxu0 %v6898_v19 }
 0x345   : > { %2934 = vmatprep.subr.bf16.mxu0 %v6903_v20 }
 0x348   : > { %2935 = vmatpush1.bf16.msra.mxu0 %v6901_v21 }
 0x349   : > { %2936 = vmatprep.subr.bf16.mxu0 %v6906_v22 }
 0x34c   : > { %2937 = vmatpush2.bf16.msra.mxu0 %v6904_v23 }
 0x34d   : > { %2938 = vmatprep.subr.bf16.mxu0 %v6909_v24 }
 0x350   : > { %2939 = vmatpush2.bf16.msra.mxu0 %v6907_v25 }
 0x351   : > { %2940 = vmatprep.subr.bf16.mxu0 %v6912_v26 }
 0x354   : > { %2941 = vmatpush2.bf16.msra.mxu0 %v6910_v27 }
 0x355   : > { %2942 = vmatprep.subr.bf16.mxu0 %v6915_v28 }
 0x358   : > { %2943 = vmatpush2.bf16.msra.mxu0 %v6913_v29 }
 0x359   : > { %2944 = vmatprep.subr.bf16.mxu0 %v6918_v30 }
 0x35c   : > { %2945 = vmatpush2.bf16.msra.mxu0 %v6916_v31 }
 0x35d   : > { %2946 = vmatprep.subr.bf16.mxu0 %v6921_v32 }
 0x360   : > { %2947 = vmatpush2.bf16.msra.mxu0 %v6919_v33 }
 0x361   : > { %2948 = vmatprep.subr.bf16.mxu0 %v6924_v34 }
 0x364   : > { %2949 = vmatpush2.bf16.msra.mxu0 %v6922_v35 }
 0x365   : > { %2950 = vmatprep.subr.bf16.mxu0 %v6927_v36 }
 0x368   : > { %2951 = vmatpush2.bf16.msra.mxu0 %v6925_v37 }
 0x36b   : > { %2953 = vmatmul.mubr.bf16.vlgmr.msra.gmra.mxu0 %v6928_v38 }
 0x3ab   : > { %v1989_v39 = vpop.f32.mrf.mxu0 }
 0x3ac   : > { %v2202_v40 = vpop.f32.mrf.mxu1 }
 0x3ad   : > { %v1991_v41 = vpop.f32.mrf.mxu0  ;;  %v2203_v52 = vadd.f32 %v2202_v40, %v1989_v39 }
 0x3ae   : > { %v2204_v42 = vpop.f32.mrf.mxu1 }
 0x3af   : > { %v1993_v43 = vpop.f32.mrf.mxu0  ;;  %v2205_v55 = vadd.f32 %v2204_v42, %v1991_v41 }
 0x3b0   : > { %v2206_v44 = vpop.f32.mrf.mxu1 }
 0x3b1   : > { %v1995_v45 = vpop.f32.mrf.mxu0  ;;  %v2207_v59 = vadd.f32 %v2206_v44, %v1993_v43 }
 0x3b2   : > { %v2208_v48 = vpop.f32.mrf.mxu1 }
 0x3b3   : > { %v2209_v0 = vadd.f32 %v2208_v48, %v1995_v45 }
 0x3eb   : > { %v2450_v46 = vpop.f32.mrf.mxu0 }
 0x3ec   : > { %v2702_v50 = vpop.f32.mrf.mxu1  ;;  %v2459_v56 = vadd.f32 %v2450_v46, %v2203_v52 }
 0x3ed   : > { %v2452_v49 = vpop.f32.mrf.mxu0 }
 0x3ee   : > { %v2704_v54 = vpop.f32.mrf.mxu1  ;;  %v2460_v60 = vadd.f32 %v2452_v49, %v2205_v55  ;;  %v2711_v1 = vadd.f32 %v2702_v50, %v2459_v56 }
 0x3ef   : > { %v2454_v53 = vpop.f32.mrf.mxu0 }
 0x3f0   : > { %v2706_v63 = vpop.f32.mrf.mxu1  ;;  %v2461_v2 = vadd.f32 %v2454_v53, %v2207_v59  ;;  %v2712_v5 = vadd.f32 %v2704_v54, %v2460_v60 }
 0x3f1   : > { %v2456_v62 = vpop.f32.mrf.mxu0 }
 0x3f2   : > { %v2462_v6 = vadd.f32 %v2456_v62, %v2209_v0  ;;  %v2708_v9 = vpop.f32.mrf.mxu1  ;;  %v2713_v11 = vadd.f32 %v2706_v63, %v2461_v2 }
 0x3f4   : > { %v2714_v15 = vadd.f32 %v2708_v9, %v2462_v6 }
 0x42b   : > { %v2954_v4 = vpop.f32.mrf.mxu0 }
 0x42c   : > { %v2963_v7 = vadd.f32 %v2954_v4, %v2711_v1 }
 0x42d   : > { %v2956_v10 = vpop.f32.mrf.mxu0 }
 0x42e   : > { %v2979_v12 = vadd.f32 %v2972_v3, %v2963_v7  ;;  %v2964_v13 = vadd.f32 %v2956_v10, %v2712_v5 }
 0x42f   : > { %v2958_v14 = vpop.f32.mrf.mxu0 }
 0x430   : > { %v2980_v16 = vadd.f32 %v2976_v8, %v2964_v13  ;;  %v2965_v17 = vadd.f32 %v2958_v14, %v2713_v11  ;;  %v2983_v19 = vmax.f32 %v2979_v12, 0.0 }
 0x431   : > { %v2960_v18 = vpop.f32.mrf.mxu0 }
 0x432   : > { %v2984_v20 = vmax.f32 %v2980_v16, 0.0  ;;  %v2981_v21 = vadd.f32 %v2972_v3, %v2965_v17  ;;  %v2966_v22 = vadd.f32 %v2960_v18, %v2714_v15 }
 0x434   : > { %v6205_v23 = vpack.c.bf16 %v2984_v20, %v2983_v19  ;;  %v2982_v24 = vadd.f32 %v2976_v8, %v2966_v22  ;;  %v2985_v25 = vmax.f32 %v2981_v21, 0.0 }
 0x436   : > { %3003 = vst [vmem:[%s3002_s7] sm:$0xff] %v6205_v23  ;;  %v2986_v26 = vmax.f32 %v2982_v24, 0.0 }
 0x438   : > { %v6206_v27 = vpack.c.bf16 %v2986_v26, %v2985_v25 }
 0x43a   : > { %3004 = vst [vmem:[%s3002_s7 + $0x8] sm:$0xff] %v6206_v27 }
 0x43b PF: > { %p3005_p13 = scmp.ge.s32.totalorder %s7775_s21, 10  ;;  %p3006_p4 = scmp.lt.s32.totalorder %s7775_s21, 15 }
 0x43d   : > { %p3007_p9 = pnand %p3006_p4, %p3005_p13 }
 0x43e   : > { %s6059_s15 = sadd.s32 (!%p3007_p9), 4294967286, %s7775_s21 }
 0x43f   : > { %3010 = sbr.rel (%p3007_p9) target bundleno = 1493 (0x5d5), region = 104  ;;  %s6210_s6 = sshll.u32 (!%p3007_p9), %s6059_s15, 4 }
 0x440   : > { %s4297_s20 = scalar_lea.vmem (!%p3007_p9), [#allocation2], %s6210_s6 }
 0x444   : > { %v6931_v28 = vld [vmem:[%s8147_s18 + $0x174] ss:$8 sps:$4 sm:$0xff]   ;;  %v6935_v30 = vld [vmem:[%s8147_s18 + $0x170] ss:$8 sps:$4 sm:$0xff]   ;;  %v6937_v32 = vld [vmem:[%s8147_s18 + $0x164] ss:$8 sps:$4 sm:$0xff]  }
 0x445   : > { %v6933_v29 = vld [vmem:[%s8147_s18 + $0x74] ss:$8 sps:$4 sm:$0xff]   ;;  %3250 = vmatprep.subr.bf16.mxu0 %v6931_v28  ;;  %v6936_v31 = vld [vmem:[%s8147_s18 + $0x70] ss:$8 sps:$4 sm:$0xff]   ;;  %v6939_v33 = vld [vmem:[%s8147_s18 + $0x64] ss:$8 sps:$4 sm:$0xff]  }
 0x446   : > { %3463 = vmatprep.subr.bf16.mxu1 %v6933_v29  ;;  %3251 = vmatpush1.bf16.msra.mxu0 %v6935_v30  ;;  %v6941_v34 = vld [vmem:[%s8147_s18 + $0x160] ss:$8 sps:$4 sm:$0xff]   ;;  %v6943_v36 = vld [vmem:[%s8147_s18 + $0x154] ss:$8 sps:$4 sm:$0xff]   ;;  %v6947_v38 = vld [vmem:[%s8147_s18 + $0x150] ss:$8 sps:$4 sm:$0xff]  }
 0x447   : > { %3464 = vmatpush1.bf16.msra.mxu1 %v6936_v31  ;;  %3252 = vmatprep.subr.bf16.mxu0 %v6937_v32  ;;  %v6942_v35 = vld [vmem:[%s8147_s18 + $0x60] ss:$8 sps:$4 sm:$0xff]   ;;  %v6945_v37 = vld [vmem:[%s8147_s18 + $0x54] ss:$8 sps:$4 sm:$0xff]   ;;  %v6948_v39 = vld [vmem:[%s8147_s18 + $0x50] ss:$8 sps:$4 sm:$0xff]  }
 0x448   : > { %3465 = vmatprep.subr.bf16.mxu1 %v6939_v33  ;;  %v6949_v40 = vld [vmem:[%s8147_s18 + $0x144] ss:$8 sps:$4 sm:$0xff]   ;;  %v6953_v42 = vld [vmem:[%s8147_s18 + $0x140] ss:$8 sps:$4 sm:$0xff]   ;;  %v6955_v44 = vld [vmem:[%s8147_s18 + $0x134] ss:$8 sps:$4 sm:$0xff]  }
 0x449   : > { %v6951_v41 = vld [vmem:[%s8147_s18 + $0x44] ss:$8 sps:$4 sm:$0xff]   ;;  %v6954_v43 = vld [vmem:[%s8147_s18 + $0x40] ss:$8 sps:$4 sm:$0xff]   ;;  %v6957_v45 = vld [vmem:[%s8147_s18 + $0x34] ss:$8 sps:$4 sm:$0xff]  }
 0x44a   : > { %3253 = vmatpush1.bf16.msra.mxu0 %v6941_v34  ;;  %v6959_v46 = vld [vmem:[%s8147_s18 + $0x130] ss:$8 sps:$4 sm:$0xff]   ;;  %v6961_v48 = vld [vmem:[%s8147_s18 + $0x124] ss:$8 sps:$4 sm:$0xff]   ;;  %v6965_v50 = vld [vmem:[%s8147_s18 + $0x120] ss:$8 sps:$4 sm:$0xff]  }
 0x44b   : > { %3466 = vmatpush1.bf16.msra.mxu1 %v6942_v35  ;;  %3254 = vmatprep.subr.bf16.mxu0 %v6943_v36  ;;  %v6960_v47 = vld [vmem:[%s8147_s18 + $0x30] ss:$8 sps:$4 sm:$0xff]   ;;  %v6963_v49 = vld [vmem:[%s8147_s18 + $0x24] ss:$8 sps:$4 sm:$0xff]   ;;  %v6966_v51 = vld [vmem:[%s8147_s18 + $0x20] ss:$8 sps:$4 sm:$0xff]  }
 0x44c   : > { %3467 = vmatprep.subr.bf16.mxu1 %v6945_v37  ;;  %v6967_v52 = vld [vmem:[%s8147_s18 + $0x114] ss:$8 sps:$4 sm:$0xff]   ;;  %v6971_v54 = vld [vmem:[%s8147_s18 + $0x110] ss:$8 sps:$4 sm:$0xff]   ;;  %v6973_v56 = vld [vmem:[%s8147_s18 + $0x104] ss:$8 sps:$4 sm:$0xff]  }
 0x44d   : > { %v6969_v53 = vld [vmem:[%s8147_s18 + $0x14] ss:$8 sps:$4 sm:$0xff]   ;;  %v6972_v55 = vld [vmem:[%s8147_s18 + $0x10] ss:$8 sps:$4 sm:$0xff]   ;;  %v6975_v57 = vld [vmem:[%s8147_s18 + $0x4] ss:$8 sps:$4 sm:$0xff]  }
 0x44e   : > { %3255 = vmatpush1.bf16.msra.mxu0 %v6947_v38  ;;  %v6977_v58 = vld [vmem:[%s8147_s18 + $0x100] ss:$8 sps:$4 sm:$0xff]   ;;  %v6979_v60 = vld [vmem:[%s8147_s18 + $0x1f4] ss:$8 sps:$4 sm:$0xff]   ;;  %v6983_v62 = vld [vmem:[%s8147_s18 + $0x1f0] ss:$8 sps:$4 sm:$0xff]  }
 0x44f   : > { %3468 = vmatpush1.bf16.msra.mxu1 %v6948_v39  ;;  %3256 = vmatprep.subr.bf16.mxu0 %v6949_v40  ;;  %v6978_v59 = vld [vmem:[%s8147_s18] ss:$8 sps:$4 sm:$0xff]   ;;  %v6981_v61 = vld [vmem:[%s8147_s18 + $0xf4] ss:$8 sps:$4 sm:$0xff]   ;;  %v6984_v63 = vld [vmem:[%s8147_s18 + $0xf0] ss:$8 sps:$4 sm:$0xff]  }
 0x450   : > { %3469 = vmatprep.subr.bf16.mxu1 %v6951_v41  ;;  %v6985_v0 = vld [vmem:[%s8147_s18 + $0x1e4] ss:$8 sps:$4 sm:$0xff]   ;;  %v6989_v2 = vld [vmem:[%s8147_s18 + $0x1e0] ss:$8 sps:$4 sm:$0xff]   ;;  %v6991_v4 = vld [vmem:[%s8147_s18 + $0x1d4] ss:$8 sps:$4 sm:$0xff]  }
 0x451   : > { %v6987_v1 = vld [vmem:[%s8147_s18 + $0xe4] ss:$8 sps:$4 sm:$0xff]   ;;  %v6990_v3 = vld [vmem:[%s8147_s18 + $0xe0] ss:$8 sps:$4 sm:$0xff]   ;;  %v6993_v5 = vld [vmem:[%s8147_s18 + $0xd4] ss:$8 sps:$4 sm:$0xff]  }
 0x452   : > { %3257 = vmatpush1.bf16.msra.mxu0 %v6953_v42  ;;  %v6995_v6 = vld [vmem:[%s8147_s18 + $0x1d0] ss:$8 sps:$4 sm:$0xff]   ;;  %v6997_v8 = vld [vmem:[%s8147_s18 + $0x1c4] ss:$8 sps:$4 sm:$0xff]   ;;  %v7001_v10 = vld [vmem:[%s8147_s18 + $0x1c0] ss:$8 sps:$4 sm:$0xff]  }
 0x453   : > { %3470 = vmatpush1.bf16.msra.mxu1 %v6954_v43  ;;  %3258 = vmatprep.subr.bf16.mxu0 %v6955_v44  ;;  %v6996_v7 = vld [vmem:[%s8147_s18 + $0xd0] ss:$8 sps:$4 sm:$0xff]   ;;  %v6999_v9 = vld [vmem:[%s8147_s18 + $0xc4] ss:$8 sps:$4 sm:$0xff]   ;;  %v7002_v11 = vld [vmem:[%s8147_s18 + $0xc0] ss:$8 sps:$4 sm:$0xff]  }
 0x454   : > { %3471 = vmatprep.subr.bf16.mxu1 %v6957_v45  ;;  %v7003_v12 = vld [vmem:[%s8147_s18 + $0x1b4] ss:$8 sps:$4 sm:$0xff]   ;;  %v7007_v16 = vld [vmem:[%s8147_s18 + $0x1b0] ss:$8 sps:$4 sm:$0xff]   ;;  %v7009_v18 = vld [vmem:[%s8147_s18 + $0x1a4] ss:$8 sps:$4 sm:$0xff]  }
 0x455   : > { %v7029_v13 = vld [vmem:[#allocation3 + $0x14] ss:$8 sps:$4 sm:$0xff]   ;;  %v7032_v15 = vld [vmem:[#allocation3 + $0x4] ss:$8 sps:$4 sm:$0xff]   ;;  %v7008_v17 = vld [vmem:[%s8147_s18 + $0xb0] ss:$8 sps:$4 sm:$0xff]  }
 0x456   : > { %3259 = vmatpush1.bf16.msra.mxu0 %v6959_v46  ;;  %v7005_v14 = vld [vmem:[%s8147_s18 + $0xb4] ss:$8 sps:$4 sm:$0xff]   ;;  %3282 = vmatprep.mubr.bf16.mxu0 %v7029_v13  ;;  %v7011_v19 = vld [vmem:[%s8147_s18 + $0xa4] ss:$8 sps:$4 sm:$0xff]   ;;  %v7013_v20 = vld [vmem:[%s8147_s18 + $0x1a0] ss:$8 sps:$4 sm:$0xff]  }
 0x457   : > { %3472 = vmatpush1.bf16.msra.mxu1 %v6960_v47  ;;  %3260 = vmatprep.subr.bf16.mxu0 %v6961_v48  ;;  %v7014_v21 = vld [vmem:[%s8147_s18 + $0xa0] ss:$8 sps:$4 sm:$0xff]   ;;  %v7015_v22 = vld [vmem:[%s8147_s18 + $0x194] ss:$8 sps:$4 sm:$0xff]   ;;  %v7019_v24 = vld [vmem:[%s8147_s18 + $0x190] ss:$8 sps:$4 sm:$0xff]  }
 0x458   : > { %3473 = vmatprep.subr.bf16.mxu1 %v6963_v49  ;;  %3495 = vmatprep.mubr.bf16.mxu1 %v7032_v15  ;;  %v7017_v23 = vld [vmem:[%s8147_s18 + $0x94] ss:$8 sps:$4 sm:$0xff]   ;;  %v7020_v25 = vld [vmem:[%s8147_s18 + $0x90] ss:$8 sps:$4 sm:$0xff]   ;;  %v7021_v26 = vld [vmem:[%s8147_s18 + $0x184] ss:$8 sps:$4 sm:$0xff]  }
 0x459   : > { %v7023_v27 = vld [vmem:[%s8147_s18 + $0x84] ss:$8 sps:$4 sm:$0xff]   ;;  %v7025_v28 = vld [vmem:[%s8147_s18 + $0x180] ss:$8 sps:$4 sm:$0xff]   ;;  %v7035_v30 = vld [vmem:[%s8147_s18 + $0x274] ss:$8 sps:$4 sm:$0xff]  }
 0x45a   : > { %3261 = vmatpush1.bf16.msra.mxu0 %v6965_v50  ;;  %v7026_v29 = vld [vmem:[%s8147_s18 + $0x80] ss:$8 sps:$4 sm:$0xff]   ;;  %v7038_v31 = vld [vmem:[%s8147_s18 + $0x374] ss:$8 sps:$4 sm:$0xff]   ;;  %v7033_v34 = vld [vmem:[%s8147_s18 + $0x270] ss:$8 sps:$4 sm:$0xff]  }
 0x45b   : > { %3474 = vmatpush1.bf16.msra.mxu1 %v6966_v51  ;;  %3262 = vmatprep.subr.bf16.mxu0 %v6967_v52  ;;  %v7027_v32 = vld [vmem:[#allocation3 + $0x10] ss:$8 sps:$4 sm:$0xff]   ;;  %v7030_v33 = vld [vmem:[#allocation3] ss:$8 sps:$4 sm:$0xff]   ;;  %v7041_v36 = vld [vmem:[%s8147_s18 + $0x264] ss:$8 sps:$4 sm:$0xff]  }
 0x45c   : > { %3475 = vmatprep.subr.bf16.mxu1 %v6969_v53  ;;  %v7036_v35 = vld [vmem:[%s8147_s18 + $0x370] ss:$8 sps:$4 sm:$0xff]   ;;  %v7044_v37 = vld [vmem:[%s8147_s18 + $0x364] ss:$8 sps:$4 sm:$0xff]   ;;  %v7039_v38 = vld [vmem:[%s8147_s18 + $0x260] ss:$8 sps:$4 sm:$0xff]  }
 0x45d   : > { %v7042_v39 = vld [vmem:[%s8147_s18 + $0x360] ss:$8 sps:$4 sm:$0xff]   ;;  %v7047_v40 = vld [vmem:[%s8147_s18 + $0x254] ss:$8 sps:$4 sm:$0xff]   ;;  %v7045_v42 = vld [vmem:[%s8147_s18 + $0x250] ss:$8 sps:$4 sm:$0xff]  }
 0x45e   : > { %3263 = vmatpush1.bf16.msra.mxu0 %v6971_v54  ;;  %v7050_v41 = vld [vmem:[%s8147_s18 + $0x354] ss:$8 sps:$4 sm:$0xff]   ;;  %v7048_v43 = vld [vmem:[%s8147_s18 + $0x350] ss:$8 sps:$4 sm:$0xff]   ;;  %v7053_v44 = vld [vmem:[%s8147_s18 + $0x244] ss:$8 sps:$4 sm:$0xff]  }
 0x45f   : > { %3476 = vmatpush1.bf16.msra.mxu1 %v6972_v55  ;;  %3264 = vmatprep.subr.bf16.mxu0 %v6973_v56  ;;  %v7056_v45 = vld [vmem:[%s8147_s18 + $0x344] ss:$8 sps:$4 sm:$0xff]   ;;  %v7051_v46 = vld [vmem:[%s8147_s18 + $0x240] ss:$8 sps:$4 sm:$0xff]   ;;  %v7059_v48 = vld [vmem:[%s8147_s18 + $0x234] ss:$8 sps:$4 sm:$0xff]  }
 0x460   : > { %3477 = vmatprep.subr.bf16.mxu1 %v6975_v57  ;;  %v7054_v47 = vld [vmem:[%s8147_s18 + $0x340] ss:$8 sps:$4 sm:$0xff]   ;;  %v7062_v49 = vld [vmem:[%s8147_s18 + $0x334] ss:$8 sps:$4 sm:$0xff]   ;;  %v7057_v50 = vld [vmem:[%s8147_s18 + $0x230] ss:$8 sps:$4 sm:$0xff]  }
 0x461   : > { %v7060_v51 = vld [vmem:[%s8147_s18 + $0x330] ss:$8 sps:$4 sm:$0xff]   ;;  %v7065_v52 = vld [vmem:[%s8147_s18 + $0x224] ss:$8 sps:$4 sm:$0xff]   ;;  %v7063_v54 = vld [vmem:[%s8147_s18 + $0x220] ss:$8 sps:$4 sm:$0xff]  }
 0x462   : > { %3265 = vmatpush1.bf16.msra.mxu0 %v6977_v58  ;;  %v7068_v53 = vld [vmem:[%s8147_s18 + $0x324] ss:$8 sps:$4 sm:$0xff]   ;;  %v7066_v55 = vld [vmem:[%s8147_s18 + $0x320] ss:$8 sps:$4 sm:$0xff]   ;;  %v7071_v56 = vld [vmem:[%s8147_s18 + $0x214] ss:$8 sps:$4 sm:$0xff]  }
 0x463   : > { %3478 = vmatpush1.bf16.msra.mxu1 %v6978_v59  ;;  %3266 = vmatprep.subr.bf16.mxu0 %v6979_v60  ;;  %v7074_v57 = vld [vmem:[%s8147_s18 + $0x314] ss:$8 sps:$4 sm:$0xff]   ;;  %v7069_v58 = vld [vmem:[%s8147_s18 + $0x210] ss:$8 sps:$4 sm:$0xff]   ;;  %v7077_v60 = vld [vmem:[%s8147_s18 + $0x204] ss:$8 sps:$4 sm:$0xff]  }
 0x464   : > { %3479 = vmatprep.subr.bf16.mxu1 %v6981_v61  ;;  %v7072_v59 = vld [vmem:[%s8147_s18 + $0x310] ss:$8 sps:$4 sm:$0xff]   ;;  %v7080_v61 = vld [vmem:[%s8147_s18 + $0x304] ss:$8 sps:$4 sm:$0xff]  }
 0x465   : > { %v7096_v13 = vld [vmem:[%s8147_s18 + $0x3d0] ss:$8 sps:$4 sm:$0xff]   ;;  %v7104_v15 = vld [vmem:[%s8147_s18 + $0x3c4] ss:$8 sps:$4 sm:$0xff]  }
 0x466   : > { %3267 = vmatpush2.bf16.msra.mxu0 %v6983_v62  ;;  %v7131_v62 = vld [vmem:[#allocation3 + $0x24] ss:$8 sps:$4 sm:$0xff]  }
 0x467   : > { %3480 = vmatpush2.bf16.msra.mxu1 %v6984_v63  ;;  %3268 = vmatprep.subr.bf16.mxu0 %v6985_v0  ;;  %v7075_v63 = vld [vmem:[%s8147_s18 + $0x200] ss:$8 sps:$4 sm:$0xff]  }
 0x468   : > { %3481 = vmatprep.subr.bf16.mxu1 %v6987_v1  ;;  %v7078_v0 = vld [vmem:[%s8147_s18 + $0x300] ss:$8 sps:$4 sm:$0xff]   ;;  %v7137_v1 = vld [vmem:[#allocation3 + $0x34] ss:$8 sps:$4 sm:$0xff]  }
 0x46a   : > { %3269 = vmatpush2.bf16.msra.mxu0 %v6989_v2  ;;  %v7083_v2 = vld [vmem:[%s8147_s18 + $0x2f4] ss:$8 sps:$4 sm:$0xff]  }
 0x46b   : > { %3482 = vmatpush2.bf16.msra.mxu1 %v6990_v3  ;;  %3270 = vmatprep.subr.bf16.mxu0 %v6991_v4  ;;  %v7086_v3 = vld [vmem:[%s8147_s18 + $0x3f4] ss:$8 sps:$4 sm:$0xff]   ;;  %v7081_v4 = vld [vmem:[%s8147_s18 + $0x2f0] ss:$8 sps:$4 sm:$0xff]  }
 0x46c   : > { %3483 = vmatprep.subr.bf16.mxu1 %v6993_v5  ;;  %v7084_v5 = vld [vmem:[%s8147_s18 + $0x3f0] ss:$8 sps:$4 sm:$0xff]  }
 0x46e   : > { %3271 = vmatpush2.bf16.msra.mxu0 %v6995_v6  ;;  %v7089_v6 = vld [vmem:[%s8147_s18 + $0x2e4] ss:$8 sps:$4 sm:$0xff]  }
 0x46f   : > { %3484 = vmatpush2.bf16.msra.mxu1 %v6996_v7  ;;  %3272 = vmatprep.subr.bf16.mxu0 %v6997_v8  ;;  %v7092_v7 = vld [vmem:[%s8147_s18 + $0x3e4] ss:$8 sps:$4 sm:$0xff]   ;;  %v7087_v8 = vld [vmem:[%s8147_s18 + $0x2e0] ss:$8 sps:$4 sm:$0xff]  }
 0x470   : > { %3485 = vmatprep.subr.bf16.mxu1 %v6999_v9  ;;  %v7090_v9 = vld [vmem:[%s8147_s18 + $0x3e0] ss:$8 sps:$4 sm:$0xff]  }
 0x472   : > { %3273 = vmatpush2.bf16.msra.mxu0 %v7001_v10  ;;  %v7095_v10 = vld [vmem:[%s8147_s18 + $0x2d4] ss:$8 sps:$4 sm:$0xff]  }
 0x473   : > { %3486 = vmatpush2.bf16.msra.mxu1 %v7002_v11  ;;  %3274 = vmatprep.subr.bf16.mxu0 %v7003_v12  ;;  %v7098_v11 = vld [vmem:[%s8147_s18 + $0x3d4] ss:$8 sps:$4 sm:$0xff]   ;;  %v7093_v12 = vld [vmem:[%s8147_s18 + $0x2d0] ss:$8 sps:$4 sm:$0xff]  }
 0x474   : > { %3487 = vmatprep.subr.bf16.mxu1 %v7005_v14  ;;  %v7101_v14 = vld [vmem:[%s8147_s18 + $0x2c4] ss:$8 sps:$4 sm:$0xff]  }
 0x476   : > { %3275 = vmatpush2.bf16.msra.mxu0 %v7007_v16  ;;  %v7099_v16 = vld [vmem:[%s8147_s18 + $0x2c0] ss:$8 sps:$4 sm:$0xff]  }
 0x477   : > { %3488 = vmatpush2.bf16.msra.mxu1 %v7008_v17  ;;  %3276 = vmatprep.subr.bf16.mxu0 %v7009_v18  ;;  %v7102_v17 = vld [vmem:[%s8147_s18 + $0x3c0] ss:$8 sps:$4 sm:$0xff]   ;;  %v7107_v18 = vld [vmem:[%s8147_s18 + $0x2b4] ss:$8 sps:$4 sm:$0xff]  }
 0x478   : > { %3489 = vmatprep.subr.bf16.mxu1 %v7011_v19  ;;  %v7110_v19 = vld [vmem:[%s8147_s18 + $0x3b4] ss:$8 sps:$4 sm:$0xff]  }
 0x47a   : > { %3277 = vmatpush2.bf16.msra.mxu0 %v7013_v20  ;;  %v7105_v20 = vld [vmem:[%s8147_s18 + $0x2b0] ss:$8 sps:$4 sm:$0xff]  }
 0x47b   : > { %3490 = vmatpush2.bf16.msra.mxu1 %v7014_v21  ;;  %3278 = vmatprep.subr.bf16.mxu0 %v7015_v22  ;;  %v7108_v21 = vld [vmem:[%s8147_s18 + $0x3b0] ss:$8 sps:$4 sm:$0xff]   ;;  %v7113_v22 = vld [vmem:[%s8147_s18 + $0x2a4] ss:$8 sps:$4 sm:$0xff]  }
 0x47c   : > { %3491 = vmatprep.subr.bf16.mxu1 %v7017_v23  ;;  %v7116_v23 = vld [vmem:[%s8147_s18 + $0x3a4] ss:$8 sps:$4 sm:$0xff]  }
 0x47e   : > { %3279 = vmatpush2.bf16.msra.mxu0 %v7019_v24  ;;  %v7111_v24 = vld [vmem:[%s8147_s18 + $0x2a0] ss:$8 sps:$4 sm:$0xff]  }
 0x47f   : > { %3492 = vmatpush2.bf16.msra.mxu1 %v7020_v25  ;;  %3280 = vmatprep.subr.bf16.mxu0 %v7021_v26  ;;  %v7114_v25 = vld [vmem:[%s8147_s18 + $0x3a0] ss:$8 sps:$4 sm:$0xff]   ;;  %v7119_v26 = vld [vmem:[%s8147_s18 + $0x294] ss:$8 sps:$4 sm:$0xff]  }
 0x480   : > { %3493 = vmatprep.subr.bf16.mxu1 %v7023_v27  ;;  %v7122_v27 = vld [vmem:[%s8147_s18 + $0x394] ss:$8 sps:$4 sm:$0xff]  }
 0x482   : > { %3281 = vmatpush2.bf16.msra.mxu0 %v7025_v28  ;;  %v7117_v28 = vld [vmem:[%s8147_s18 + $0x290] ss:$8 sps:$4 sm:$0xff]  }
 0x483   : > { %3494 = vmatpush2.bf16.msra.mxu1 %v7026_v29  ;;  %3711 = vmatprep.subr.bf16.mxu0 %v7035_v30  ;;  %v7120_v29 = vld [vmem:[%s8147_s18 + $0x390] ss:$8 sps:$4 sm:$0xff]   ;;  %v7125_v30 = vld [vmem:[%s8147_s18 + $0x284] ss:$8 sps:$4 sm:$0xff]  }
 0x484   : > { %3963 = vmatprep.subr.bf16.mxu1 %v7038_v31  ;;  %v7128_v31 = vld [vmem:[%s8147_s18 + $0x384] ss:$8 sps:$4 sm:$0xff]  }
 0x485   : > { %3283 = vmatmul.mubr.bf16.vlgmr.msra.gmra.mxu0 %v7027_v32  ;;  %v7123_v32 = vld [vmem:[%s8147_s18 + $0x280] ss:$8 sps:$4 sm:$0xff]  }
 0x486   : > { %3496 = vmatmul.mubr.bf16.vlgmr.msra.gmra.mxu1 %v7030_v33  ;;  %3712 = vmatpush1.bf16.msra.mxu0 %v7033_v34  ;;  %v7126_v33 = vld [vmem:[%s8147_s18 + $0x380] ss:$8 sps:$4 sm:$0xff]   ;;  %v7134_v34 = vld [vmem:[%s8147_s18 + $0x474] ss:$8 sps:$4 sm:$0xff]  }
 0x487   : > { %3964 = vmatpush1.bf16.msra.mxu1 %v7036_v35  ;;  %3713 = vmatprep.subr.bf16.mxu0 %v7041_v36  ;;  %v7129_v35 = vld [vmem:[#allocation3 + $0x20] ss:$8 sps:$4 sm:$0xff]   ;;  %v7135_v36 = vld [vmem:[#allocation3 + $0x30] ss:$8 sps:$4 sm:$0xff]  }
 0x488   : > { %3965 = vmatprep.subr.bf16.mxu1 %v7044_v37  ;;  %3743 = vmatprep.mubr.bf16.mxu0 %v7131_v62  ;;  %v7132_v37 = vld [vmem:[%s8147_s18 + $0x470] ss:$8 sps:$4 sm:$0xff]  }
 0x489   : > { %3995 = vmatprep.mubr.bf16.mxu1 %v7137_v1  ;;  %v7171_v62 = vld [vmem:[%s8147_s18 + $0x4b0] ss:$8 sps:$4 sm:$0xff]   ;;  %v7179_v1 = vld [vmem:[%s8147_s18 + $0x494] ss:$8 sps:$4 sm:$0xff]  }
 0x48a   : > { %3714 = vmatpush1.bf16.msra.mxu0 %v7039_v38  ;;  %v7185_v38 = vld [vmem:[#allocation3 + $0x44] ss:$8 sps:$4 sm:$0xff]  }
 0x48b   : > { %3966 = vmatpush1.bf16.msra.mxu1 %v7042_v39  ;;  %3715 = vmatprep.subr.bf16.mxu0 %v7047_v40  ;;  %v7140_v39 = vld [vmem:[%s8147_s18 + $0x464] ss:$8 sps:$4 sm:$0xff]   ;;  %v7138_v40 = vld [vmem:[%s8147_s18 + $0x460] ss:$8 sps:$4 sm:$0xff]  }
 0x48c   : > { %3967 = vmatprep.subr.bf16.mxu1 %v7050_v41  ;;  %v7143_v41 = vld [vmem:[%s8147_s18 + $0x454] ss:$8 sps:$4 sm:$0xff]  }
 0x48e   : > { %3716 = vmatpush1.bf16.msra.mxu0 %v7045_v42  ;;  %v7141_v42 = vld [vmem:[%s8147_s18 + $0x450] ss:$8 sps:$4 sm:$0xff]  }
 0x48f   : > { %3968 = vmatpush1.bf16.msra.mxu1 %v7048_v43  ;;  %3717 = vmatprep.subr.bf16.mxu0 %v7053_v44  ;;  %v7146_v43 = vld [vmem:[%s8147_s18 + $0x444] ss:$8 sps:$4 sm:$0xff]   ;;  %v7144_v44 = vld [vmem:[%s8147_s18 + $0x440] ss:$8 sps:$4 sm:$0xff]  }
 0x490   : > { %3969 = vmatprep.subr.bf16.mxu1 %v7056_v45  ;;  %v7149_v45 = vld [vmem:[%s8147_s18 + $0x434] ss:$8 sps:$4 sm:$0xff]  }
 0x492   : > { %3718 = vmatpush1.bf16.msra.mxu0 %v7051_v46  ;;  %v7147_v46 = vld [vmem:[%s8147_s18 + $0x430] ss:$8 sps:$4 sm:$0xff]  }
 0x493   : > { %3970 = vmatpush1.bf16.msra.mxu1 %v7054_v47  ;;  %3719 = vmatprep.subr.bf16.mxu0 %v7059_v48  ;;  %v7152_v47 = vld [vmem:[%s8147_s18 + $0x424] ss:$8 sps:$4 sm:$0xff]   ;;  %v7150_v48 = vld [vmem:[%s8147_s18 + $0x420] ss:$8 sps:$4 sm:$0xff]  }
 0x494   : > { %3971 = vmatprep.subr.bf16.mxu1 %v7062_v49  ;;  %v7155_v49 = vld [vmem:[%s8147_s18 + $0x414] ss:$8 sps:$4 sm:$0xff]  }
 0x496   : > { %3720 = vmatpush1.bf16.msra.mxu0 %v7057_v50  ;;  %v7153_v50 = vld [vmem:[%s8147_s18 + $0x410] ss:$8 sps:$4 sm:$0xff]  }
 0x497   : > { %3972 = vmatpush1.bf16.msra.mxu1 %v7060_v51  ;;  %3721 = vmatprep.subr.bf16.mxu0 %v7065_v52  ;;  %v7158_v51 = vld [vmem:[%s8147_s18 + $0x404] ss:$8 sps:$4 sm:$0xff]   ;;  %v7156_v52 = vld [vmem:[%s8147_s18 + $0x400] ss:$8 sps:$4 sm:$0xff]  }
 0x498   : > { %3973 = vmatprep.subr.bf16.mxu1 %v7068_v53  ;;  %v7161_v53 = vld [vmem:[%s8147_s18 + $0x4f4] ss:$8 sps:$4 sm:$0xff]  }
 0x49a   : > { %3722 = vmatpush1.bf16.msra.mxu0 %v7063_v54  ;;  %v7159_v54 = vld [vmem:[%s8147_s18 + $0x4f0] ss:$8 sps:$4 sm:$0xff]  }
 0x49b   : > { %3974 = vmatpush1.bf16.msra.mxu1 %v7066_v55  ;;  %3723 = vmatprep.subr.bf16.mxu0 %v7071_v56  ;;  %v7164_v55 = vld [vmem:[%s8147_s18 + $0x4e4] ss:$8 sps:$4 sm:$0xff]   ;;  %v7162_v56 = vld [vmem:[%s8147_s18 + $0x4e0] ss:$8 sps:$4 sm:$0xff]  }
 0x49c   : > { %3975 = vmatprep.subr.bf16.mxu1 %v7074_v57  ;;  %v7167_v57 = vld [vmem:[%s8147_s18 + $0x4d4] ss:$8 sps:$4 sm:$0xff]  }
 0x49e   : > { %3724 = vmatpush1.bf16.msra.mxu0 %v7069_v58  ;;  %v7165_v58 = vld [vmem:[%s8147_s18 + $0x4d0] ss:$8 sps:$4 sm:$0xff]  }
 0x49f   : > { %3976 = vmatpush1.bf16.msra.mxu1 %v7072_v59  ;;  %3725 = vmatprep.subr.bf16.mxu0 %v7077_v60  ;;  %v7170_v59 = vld [vmem:[%s8147_s18 + $0x4c4] ss:$8 sps:$4 sm:$0xff]   ;;  %v7168_v60 = vld [vmem:[%s8147_s18 + $0x4c0] ss:$8 sps:$4 sm:$0xff]  }
 0x4a0   : > { %3977 = vmatprep.subr.bf16.mxu1 %v7080_v61  ;;  %v7173_v61 = vld [vmem:[%s8147_s18 + $0x4b4] ss:$8 sps:$4 sm:$0xff]  }
 0x4a2   : > { %3726 = vmatpush1.bf16.msra.mxu0 %v7075_v63  ;;  %v7176_v63 = vld [vmem:[%s8147_s18 + $0x4a4] ss:$8 sps:$4 sm:$0xff]  }
 0x4a3   : > { %3978 = vmatpush1.bf16.msra.mxu1 %v7078_v0  ;;  %3727 = vmatprep.subr.bf16.mxu0 %v7083_v2  ;;  %v7174_v0 = vld [vmem:[%s8147_s18 + $0x4a0] ss:$8 sps:$4 sm:$0xff]   ;;  %v7177_v2 = vld [vmem:[%s8147_s18 + $0x490] ss:$8 sps:$4 sm:$0xff]  }
 0x4a4   : > { %3979 = vmatprep.subr.bf16.mxu1 %v7086_v3  ;;  %v7182_v3 = vld [vmem:[%s8147_s18 + $0x484] ss:$8 sps:$4 sm:$0xff]  }
 0x4a6   : > { %3728 = vmatpush2.bf16.msra.mxu0 %v7081_v4  ;;  %v7180_v4 = vld [vmem:[%s8147_s18 + $0x480] ss:$8 sps:$4 sm:$0xff]  }
 0x4a7   : > { %3980 = vmatpush2.bf16.msra.mxu1 %v7084_v5  ;;  %3729 = vmatprep.subr.bf16.mxu0 %v7089_v6  ;;  %v7183_v5 = vld [vmem:[#allocation3 + $0x40] ss:$8 sps:$4 sm:$0xff]  }
 0x4a8   : > { %3981 = vmatprep.subr.bf16.mxu1 %v7092_v7 }
 0x4aa   : > { %3730 = vmatpush2.bf16.msra.mxu0 %v7087_v8 }
 0x4ab   : > { %3982 = vmatpush2.bf16.msra.mxu1 %v7090_v9  ;;  %3731 = vmatprep.subr.bf16.mxu0 %v7095_v10 }
 0x4ac   : > { %3983 = vmatprep.subr.bf16.mxu1 %v7098_v11 }
 0x4ae   : > { %3732 = vmatpush2.bf16.msra.mxu0 %v7093_v12 }
 0x4af   : > { %3984 = vmatpush2.bf16.msra.mxu1 %v7096_v13  ;;  %3733 = vmatprep.subr.bf16.mxu0 %v7101_v14  ;;  %v4264_v14 = vlaneseq }
 0x4b0   : > { %3985 = vmatprep.subr.bf16.mxu1 %v7104_v15 }
 0x4b2   : > { %3734 = vmatpush2.bf16.msra.mxu0 %v7099_v16 }
 0x4b3   : > { %3986 = vmatpush2.bf16.msra.mxu1 %v7102_v17  ;;  %3735 = vmatprep.subr.bf16.mxu0 %v7107_v18  ;;  %v4265_v18 = vshrl.u32 %v4264_v14, 7 }
 0x4b4   : > { %3987 = vmatprep.subr.bf16.mxu1 %v7110_v19 }
 0x4b6   : > { %3736 = vmatpush2.bf16.msra.mxu0 %v7105_v20 }
 0x4b7   : > { %3988 = vmatpush2.bf16.msra.mxu1 %v7108_v21  ;;  %3737 = vmatprep.subr.bf16.mxu0 %v7113_v22 }
 0x4b8   : > { %3989 = vmatprep.subr.bf16.mxu1 %v7116_v23 }
 0x4ba   : > { %3738 = vmatpush2.bf16.msra.mxu0 %v7111_v24  ;;  %v4266_v24 = vsub.s32 0, %v4265_v18 }
 0x4bb   : > { %3990 = vmatpush2.bf16.msra.mxu1 %v7114_v25  ;;  %3739 = vmatprep.subr.bf16.mxu0 %v7119_v26  ;;  %v4262_v25 = vld [vmem:[%s587_s12] sm:$0x3] }
 0x4bc   : > { %3991 = vmatprep.subr.bf16.mxu1 %v7122_v27 }
 0x4be   : > { %3740 = vmatpush2.bf16.msra.mxu0 %v7117_v28  ;;  %v4270_v28 = vsub.s32 1, %v4265_v18 }
 0x4bf   : > { %3992 = vmatpush2.bf16.msra.mxu1 %v7120_v29  ;;  %3741 = vmatprep.subr.bf16.mxu0 %v7125_v30 }
 0x4c0   : > { %3993 = vmatprep.subr.bf16.mxu1 %v7128_v31 }
 0x4c2   : > { %3742 = vmatpush2.bf16.msra.mxu0 %v7123_v32 }
 0x4c3   : > { %3994 = vmatpush2.bf16.msra.mxu1 %v7126_v33  ;;  %4215 = vmatprep.subr.bf16.mxu0 %v7134_v34  ;;  %v4267_v34 = vrot.slane %v4262_v25, %v4266_v24 }
 0x4c5   : > { %3744 = vmatmul.mubr.bf16.vlgmr.msra.gmra.mxu0 %v7129_v35 }
 0x4c6   : > { %3996 = vmatmul.mubr.bf16.vlgmr.msra.gmra.mxu1 %v7135_v36  ;;  %4216 = vmatpush1.bf16.msra.mxu0 %v7132_v37 }
 0x4c7   : > { %4247 = vmatprep.mubr.bf16.mxu0 %v7185_v38  ;;  %4217 = vmatprep.subr.bf16.mxu0 %v7140_v39  ;;  %v4271_v39 = vrot.slane %v4262_v25, %v4270_v28 }
 0x4ca   : > { %4218 = vmatpush1.bf16.msra.mxu0 %v7138_v40 }
 0x4cb   : > { %4219 = vmatprep.subr.bf16.mxu0 %v7143_v41 }
 0x4ce   : > { %4220 = vmatpush1.bf16.msra.mxu0 %v7141_v42 }
 0x4cf   : > { %4221 = vmatprep.subr.bf16.mxu0 %v7146_v43 }
 0x4d2   : > { %4222 = vmatpush1.bf16.msra.mxu0 %v7144_v44 }
 0x4d3   : > { %4223 = vmatprep.subr.bf16.mxu0 %v7149_v45 }
 0x4d6   : > { %4224 = vmatpush1.bf16.msra.mxu0 %v7147_v46 }
 0x4d7   : > { %4225 = vmatprep.subr.bf16.mxu0 %v7152_v47 }
 0x4da   : > { %4226 = vmatpush1.bf16.msra.mxu0 %v7150_v48 }
 0x4db   : > { %4227 = vmatprep.subr.bf16.mxu0 %v7155_v49 }
 0x4de   : > { %4228 = vmatpush1.bf16.msra.mxu0 %v7153_v50 }
 0x4df   : > { %4229 = vmatprep.subr.bf16.mxu0 %v7158_v51 }
 0x4e2   : > { %4230 = vmatpush1.bf16.msra.mxu0 %v7156_v52 }
 0x4e3   : > { %4231 = vmatprep.subr.bf16.mxu0 %v7161_v53 }
 0x4e6   : > { %4232 = vmatpush2.bf16.msra.mxu0 %v7159_v54 }
 0x4e7   : > { %4233 = vmatprep.subr.bf16.mxu0 %v7164_v55 }
 0x4ea   : > { %4234 = vmatpush2.bf16.msra.mxu0 %v7162_v56 }
 0x4eb   : > { %4235 = vmatprep.subr.bf16.mxu0 %v7167_v57 }
 0x4ee   : > { %4236 = vmatpush2.bf16.msra.mxu0 %v7165_v58 }
 0x4ef   : > { %4237 = vmatprep.subr.bf16.mxu0 %v7170_v59 }
 0x4f2   : > { %4238 = vmatpush2.bf16.msra.mxu0 %v7168_v60 }
 0x4f3   : > { %4239 = vmatprep.subr.bf16.mxu0 %v7173_v61 }
 0x4f6   : > { %4240 = vmatpush2.bf16.msra.mxu0 %v7171_v62 }
 0x4f7   : > { %4241 = vmatprep.subr.bf16.mxu0 %v7176_v63 }
 0x4fa   : > { %4242 = vmatpush2.bf16.msra.mxu0 %v7174_v0 }
 0x4fb   : > { %4243 = vmatprep.subr.bf16.mxu0 %v7179_v1 }
 0x4fe   : > { %4244 = vmatpush2.bf16.msra.mxu0 %v7177_v2 }
 0x4ff   : > { %4245 = vmatprep.subr.bf16.mxu0 %v7182_v3 }
 0x502   : > { %4246 = vmatpush2.bf16.msra.mxu0 %v7180_v4 }
 0x505   : > { %4248 = vmatmul.mubr.bf16.vlgmr.msra.gmra.mxu0 %v7183_v5 }
 0x545   : > { %v3284_v6 = vpop.f32.mrf.mxu0 }
 0x546   : > { %v3497_v7 = vpop.f32.mrf.mxu1 }
 0x547   : > { %v3286_v8 = vpop.f32.mrf.mxu0  ;;  %v3498_v19 = vadd.f32 %v3497_v7, %v3284_v6 }
 0x548   : > { %v3499_v9 = vpop.f32.mrf.mxu1 }
 0x549   : > { %v3288_v10 = vpop.f32.mrf.mxu0  ;;  %v3500_v22 = vadd.f32 %v3499_v9, %v3286_v8 }
 0x54a   : > { %v3501_v11 = vpop.f32.mrf.mxu1 }
 0x54b   : > { %v3290_v12 = vpop.f32.mrf.mxu0  ;;  %v3502_v26 = vadd.f32 %v3501_v11, %v3288_v10 }
 0x54c   : > { %v3503_v15 = vpop.f32.mrf.mxu1 }
 0x54d   : > { %v3504_v31 = vadd.f32 %v3503_v15, %v3290_v12 }
 0x585   : > { %v3745_v13 = vpop.f32.mrf.mxu0 }
 0x586   : > { %v3997_v17 = vpop.f32.mrf.mxu1  ;;  %v3754_v23 = vadd.f32 %v3745_v13, %v3498_v19 }
 0x587   : > { %v3747_v16 = vpop.f32.mrf.mxu0 }
 0x588   : > { %v3999_v21 = vpop.f32.mrf.mxu1  ;;  %v3755_v27 = vadd.f32 %v3747_v16, %v3500_v22  ;;  %v4006_v32 = vadd.f32 %v3997_v17, %v3754_v23 }
 0x589   : > { %v3749_v20 = vpop.f32.mrf.mxu0 }
 0x58a   : > { %v4001_v30 = vpop.f32.mrf.mxu1  ;;  %v3756_v33 = vadd.f32 %v3749_v20, %v3502_v26  ;;  %v4007_v36 = vadd.f32 %v3999_v21, %v3755_v27 }
 0x58b   : > { %v3751_v29 = vpop.f32.mrf.mxu0 }
 0x58c   : > { %v3757_v37 = vadd.f32 %v3751_v29, %v3504_v31  ;;  %v4003_v40 = vpop.f32.mrf.mxu1  ;;  %v4008_v42 = vadd.f32 %v4001_v30, %v3756_v33 }
 0x58e   : > { %v4009_v46 = vadd.f32 %v4003_v40, %v3757_v37 }
 0x5c5   : > { %v4249_v35 = vpop.f32.mrf.mxu0 }
 0x5c6   : > { %v4258_v38 = vadd.f32 %v4249_v35, %v4006_v32 }
 0x5c7   : > { %v4251_v41 = vpop.f32.mrf.mxu0 }
 0x5c8   : > { %v4274_v43 = vadd.f32 %v4267_v34, %v4258_v38  ;;  %v4259_v44 = vadd.f32 %v4251_v41, %v4007_v36 }
 0x5c9   : > { %v4253_v45 = vpop.f32.mrf.mxu0 }
 0x5ca   : > { %v4275_v47 = vadd.f32 %v4271_v39, %v4259_v44  ;;  %v4260_v48 = vadd.f32 %v4253_v45, %v4008_v42  ;;  %v4278_v50 = vmax.f32 %v4274_v43, 0.0 }
 0x5cb   : > { %v4255_v49 = vpop.f32.mrf.mxu0 }
 0x5cc   : > { %v4279_v51 = vmax.f32 %v4275_v47, 0.0  ;;  %v4276_v52 = vadd.f32 %v4267_v34, %v4260_v48  ;;  %v4261_v53 = vadd.f32 %v4255_v49, %v4009_v46 }
 0x5ce   : > { %v6208_v54 = vpack.c.bf16 %v4279_v51, %v4278_v50  ;;  %v4277_v55 = vadd.f32 %v4271_v39, %v4261_v53  ;;  %v4280_v56 = vmax.f32 %v4276_v52, 0.0 }
 0x5d0   : > { %4298 = vst [vmem:[%s4297_s20] sm:$0xff] %v6208_v54  ;;  %v4281_v57 = vmax.f32 %v4277_v55, 0.0 }
 0x5d2   : > { %v6209_v58 = vpack.c.bf16 %v4281_v57, %v4280_v56 }
 0x5d4   : > { %4299 = vst [vmem:[%s4297_s20 + $0x8] sm:$0xff] %v6209_v58 }
 0x5d5 PF: > { %p6064_p3 = scmp.ne.s32.totalorder %s7775_s21, 15 }
 0x5d7   : > { %4303 = sbr.rel (%p6064_p3) target bundleno = 1807 (0x70f), region = 108 }
 0x5dc   : > { %v7186_v59 = vld [vmem:[#allocation16 + $0xf8] sm:$0xff]   ;;  %v7190_v63 = vld [vmem:[#allocation16 + $0xf0] sm:$0xff]   ;;  %v7194_v3 = vld [vmem:[#allocation16 + $0xe8] sm:$0xff]  }
 0x5dd   : > { %v7187_v60 = vld [vmem:[#allocation16 + $0x78] sm:$0xff]   ;;  %6211 = vmatprep.subr.bf16.mxu0 %v7186_v59  ;;  %v7191_v0 = vld [vmem:[#allocation16 + $0x70] sm:$0xff]   ;;  %v7195_v4 = vld [vmem:[#allocation16 + $0x68] sm:$0xff]  }
 0x5de   : > { %v7188_v61 = vld [vmem:[#allocation16 + $0xb8] sm:$0xff]   ;;  %6233 = vmatprep.subr.bf16.mxu1 %v7187_v60  ;;  %v7192_v1 = vld [vmem:[#allocation16 + $0xb0] sm:$0xff]   ;;  %v7196_v5 = vld [vmem:[#allocation16 + $0xa8] sm:$0xff]  }
 0x5df   : > { %v7189_v62 = vld [vmem:[#allocation16 + $0x38] sm:$0xff]   ;;  %6212 = vmatpush3.bf16.msra.mxu0 %v7188_v61  ;;  %v7193_v2 = vld [vmem:[#allocation16 + $0x30] sm:$0xff]   ;;  %v7197_v6 = vld [vmem:[#allocation16 + $0x28] sm:$0xff]  }
 0x5e0   : > { %6234 = vmatpush3.bf16.msra.mxu1 %v7189_v62  ;;  %6213 = vmatprep.subr.bf16.mxu0 %v7190_v63  ;;  %v7198_v7 = vld [vmem:[#allocation16 + $0xe0] sm:$0xff]   ;;  %v7202_v11 = vld [vmem:[#allocation16 + $0xd8] sm:$0xff]   ;;  %v7206_v15 = vld [vmem:[#allocation16 + $0xd0] sm:$0xff]  }
 0x5e1   : > { %6235 = vmatprep.subr.bf16.mxu1 %v7191_v0  ;;  %v7199_v8 = vld [vmem:[#allocation16 + $0x60] sm:$0xff]   ;;  %v7203_v12 = vld [vmem:[#allocation16 + $0x58] sm:$0xff]   ;;  %v7207_v16 = vld [vmem:[#allocation16 + $0x50] sm:$0xff]  }
 0x5e2   : > { %v7200_v9 = vld [vmem:[#allocation16 + $0xa0] sm:$0xff]   ;;  %v7204_v13 = vld [vmem:[#allocation16 + $0x98] sm:$0xff]   ;;  %v7208_v17 = vld [vmem:[#allocation16 + $0x90] sm:$0xff]  }
 0x5e3   : > { %6214 = vmatpush3.bf16.msra.mxu0 %v7192_v1  ;;  %v7201_v10 = vld [vmem:[#allocation16 + $0x20] sm:$0xff]   ;;  %v7205_v14 = vld [vmem:[#allocation16 + $0x18] sm:$0xff]   ;;  %v7209_v18 = vld [vmem:[#allocation16 + $0x10] sm:$0xff]  }
 0x5e4   : > { %6236 = vmatpush3.bf16.msra.mxu1 %v7193_v2  ;;  %6215 = vmatprep.subr.bf16.mxu0 %v7194_v3  ;;  %v7210_v19 = vld [vmem:[#allocation16 + $0xc8] sm:$0xff]   ;;  %v7214_v23 = vld [vmem:[#allocation16 + $0xc0] sm:$0xff]   ;;  %v7221_v29 = vld [vmem:[#allocation2] ss:$8 sps:$4 sm:$0xff]  }
 0x5e5   : > { %6237 = vmatprep.subr.bf16.mxu1 %v7195_v4  ;;  %v7211_v20 = vld [vmem:[#allocation16 + $0x48] sm:$0xff]   ;;  %v7215_v24 = vld [vmem:[#allocation16 + $0x40] sm:$0xff]   ;;  %v7224_v31 = vld [vmem:[#allocation16 + $0x178] sm:$0xff]  }
 0x5e6   : > { %v7212_v21 = vld [vmem:[#allocation16 + $0x88] sm:$0xff]   ;;  %v7216_v25 = vld [vmem:[#allocation16 + $0x80] sm:$0xff]   ;;  %v7225_v32 = vld [vmem:[#allocation16 + $0x138] sm:$0xff]  }
 0x5e7   : > { %6216 = vmatpush3.bf16.msra.mxu0 %v7196_v5  ;;  %v7213_v22 = vld [vmem:[#allocation16 + $0x8] sm:$0xff]   ;;  %v7217_v26 = vld [vmem:[#allocation16] sm:$0xff]   ;;  %v7226_v33 = vld [vmem:[#allocation16 + $0x1f8] sm:$0xff]  }
 0x5e8   : > { %6238 = vmatpush3.bf16.msra.mxu1 %v7197_v6  ;;  %6217 = vmatprep.subr.bf16.mxu0 %v7198_v7  ;;  %v7218_v27 = vld [vmem:[#allocation2 + $0x10] ss:$8 sps:$4 sm:$0xff]   ;;  %v7220_v28 = vld [vmem:[#allocation2 + $0x14] ss:$8 sps:$4 sm:$0xff]   ;;  %v7223_v30 = vld [vmem:[#allocation2 + $0x4] ss:$8 sps:$4 sm:$0xff]  }
 0x5e9   : > { %6239 = vmatprep.subr.bf16.mxu1 %v7199_v8  ;;  %4511 = vmatprep.mubr.bf16.mxu0 %v7220_v28  ;;  %v7227_v34 = vld [vmem:[#allocation16 + $0x1b8] sm:$0xff]   ;;  %v7228_v35 = vld [vmem:[#allocation16 + $0x170] sm:$0xff]   ;;  %v7232_v39 = vld [vmem:[#allocation16 + $0x168] sm:$0xff]  }
 0x5ea   : > { %4658 = vmatprep.mubr.bf16.mxu1 %v7223_v30  ;;  %v7229_v36 = vld [vmem:[#allocation16 + $0x130] sm:$0xff]   ;;  %v7233_v40 = vld [vmem:[#allocation16 + $0x128] sm:$0xff]   ;;  %v7236_v43 = vld [vmem:[#allocation16 + $0x160] sm:$0xff]  }
 0x5eb   : > { %6218 = vmatpush3.bf16.msra.mxu0 %v7200_v9  ;;  %v7230_v37 = vld [vmem:[#allocation16 + $0x1f0] sm:$0xff]   ;;  %v7234_v41 = vld [vmem:[#allocation16 + $0x1e8] sm:$0xff]   ;;  %v7237_v44 = vld [vmem:[#allocation16 + $0x120] sm:$0xff]  }
 0x5ec   : > { %6240 = vmatpush3.bf16.msra.mxu1 %v7201_v10  ;;  %6219 = vmatprep.subr.bf16.mxu0 %v7202_v11  ;;  %v7231_v38 = vld [vmem:[#allocation16 + $0x1b0] sm:$0xff]   ;;  %v7235_v42 = vld [vmem:[#allocation16 + $0x1a8] sm:$0xff]   ;;  %v7238_v45 = vld [vmem:[#allocation16 + $0x1e0] sm:$0xff]  }
 0x5ed   : > { %6241 = vmatprep.subr.bf16.mxu1 %v7203_v12  ;;  %v7239_v46 = vld [vmem:[#allocation16 + $0x1a0] sm:$0xff]   ;;  %v7240_v47 = vld [vmem:[#allocation16 + $0x158] sm:$0xff]   ;;  %v7244_v51 = vld [vmem:[#allocation16 + $0x150] sm:$0xff]  }
 0x5ee   : > { %v7241_v48 = vld [vmem:[#allocation16 + $0x118] sm:$0xff]   ;;  %v7245_v52 = vld [vmem:[#allocation16 + $0x110] sm:$0xff]   ;;  %v7248_v55 = vld [vmem:[#allocation16 + $0x148] sm:$0xff]  }
 0x5ef   : > { %6220 = vmatpush3.bf16.msra.mxu0 %v7204_v13  ;;  %v7242_v49 = vld [vmem:[#allocation16 + $0x1d8] sm:$0xff]   ;;  %v7246_v53 = vld [vmem:[#allocation16 + $0x1d0] sm:$0xff]   ;;  %v7249_v56 = vld [vmem:[#allocation16 + $0x108] sm:$0xff]  }
 0x5f0   : > { %6242 = vmatpush3.bf16.msra.mxu1 %v7205_v14  ;;  %6221 = vmatprep.subr.bf16.mxu0 %v7206_v15  ;;  %v7243_v50 = vld [vmem:[#allocation16 + $0x198] sm:$0xff]   ;;  %v7247_v54 = vld [vmem:[#allocation16 + $0x190] sm:$0xff]   ;;  %v7250_v57 = vld [vmem:[#allocation16 + $0x1c8] sm:$0xff]  }
 0x5f1   : > { %6243 = vmatprep.subr.bf16.mxu1 %v7207_v16  ;;  %v7251_v58 = vld [vmem:[#allocation16 + $0x188] sm:$0xff]   ;;  %v7252_v59 = vld [vmem:[#allocation16 + $0x140] sm:$0xff]   ;;  %v7255_v62 = vld [vmem:[#allocation2 + $0x20] ss:$8 sps:$4 sm:$0xff]  }
 0x5f2   : > { %v7253_v60 = vld [vmem:[#allocation16 + $0x100] sm:$0xff]   ;;  %v7259_v1 = vld [vmem:[#allocation16 + $0x278] sm:$0xff]   ;;  %v7262_v3 = vld [vmem:[#allocation2 + $0x34] ss:$8 sps:$4 sm:$0xff]  }
 0x5f3   : > { %6222 = vmatpush3.bf16.msra.mxu0 %v7208_v17  ;;  %v7254_v61 = vld [vmem:[#allocation16 + $0x1c0] sm:$0xff]   ;;  %v7263_v4 = vld [vmem:[#allocation16 + $0x238] sm:$0xff]   ;;  %v7264_v5 = vld [vmem:[#allocation16 + $0x270] sm:$0xff]  }
 0x5f4   : > { %6244 = vmatpush3.bf16.msra.mxu1 %v7209_v18  ;;  %6223 = vmatprep.subr.bf16.mxu0 %v7210_v19  ;;  %v7257_v63 = vld [vmem:[#allocation2 + $0x24] ss:$8 sps:$4 sm:$0xff]   ;;  %v7260_v2 = vld [vmem:[#allocation2 + $0x30] ss:$8 sps:$4 sm:$0xff]   ;;  %v7265_v6 = vld [vmem:[#allocation16 + $0x230] sm:$0xff]  }
 0x5f5   : > { %6245 = vmatprep.subr.bf16.mxu1 %v7211_v20  ;;  %v7258_v0 = vld [vmem:[#allocation16 + $0x180] sm:$0xff]   ;;  %v7266_v7 = vld [vmem:[#allocation16 + $0x268] sm:$0xff]   ;;  %v7270_v11 = vld [vmem:[#allocation16 + $0x258] sm:$0xff]  }
 0x5f6   : > { %v7267_v8 = vld [vmem:[#allocation16 + $0x228] sm:$0xff]   ;;  %v7268_v9 = vld [vmem:[#allocation16 + $0x260] sm:$0xff]   ;;  %v7271_v12 = vld [vmem:[#allocation16 + $0x218] sm:$0xff]  }
 0x5f7   : > { %6224 = vmatpush3.bf16.msra.mxu0 %v7212_v21  ;;  %v7269_v10 = vld [vmem:[#allocation16 + $0x220] sm:$0xff]   ;;  %v7272_v13 = vld [vmem:[#allocation16 + $0x250] sm:$0xff]   ;;  %v7274_v16 = vld [vmem:[#allocation16 + $0x248] sm:$0xff]  }
 0x5f8   : > { %6246 = vmatpush3.bf16.msra.mxu1 %v7213_v22  ;;  %6225 = vmatprep.subr.bf16.mxu0 %v7214_v23  ;;  %v7280_v14 = vld [vmem:[#allocation2 + $0x44] ss:$8 sps:$4 sm:$0xff]   ;;  %v7273_v15 = vld [vmem:[#allocation16 + $0x210] sm:$0xff]   ;;  %v7275_v17 = vld [vmem:[#allocation16 + $0x208] sm:$0xff]  }
 0x5f9   : > { %6247 = vmatprep.subr.bf16.mxu1 %v7215_v24  ;;  %v7276_v18 = vld [vmem:[#allocation16 + $0x240] sm:$0xff]   ;;  %v7278_v20 = vld [vmem:[#allocation2 + $0x40] ss:$8 sps:$4 sm:$0xff]  }
 0x5fa   : > { %v7277_v19 = vld [vmem:[#allocation16 + $0x200] sm:$0xff]  }
 0x5fb   : > { %6226 = vmatpush3.bf16.msra.mxu0 %v7216_v25 }
 0x5fc   : > { %6248 = vmatpush3.bf16.msra.mxu1 %v7217_v26  ;;  %6255 = vmatprep.subr.bf16.mxu0 %v7224_v31 }
 0x5fd   : > { %6277 = vmatprep.subr.bf16.mxu1 %v7226_v33 }
 0x5fe   : > { %4512 = vmatmul.mubr.bf16.vlgmr.msra.gmra.mxu0 %v7218_v27 }
 0x5ff   : > { %4659 = vmatmul.mubr.bf16.vlgmr.msra.gmra.mxu1 %v7221_v29  ;;  %6256 = vmatpush3.bf16.msra.mxu0 %v7225_v32 }
 0x600   : > { %6278 = vmatpush3.bf16.msra.mxu1 %v7227_v34  ;;  %6257 = vmatprep.subr.bf16.mxu0 %v7228_v35 }
 0x601   : > { %6279 = vmatprep.subr.bf16.mxu1 %v7230_v37  ;;  %4840 = vmatprep.mubr.bf16.mxu0 %v7257_v63 }
 0x602   : > { %5024 = vmatprep.mubr.bf16.mxu1 %v7262_v3 }
 0x603   : > { %6258 = vmatpush3.bf16.msra.mxu0 %v7229_v36 }
 0x604   : > { %6280 = vmatpush3.bf16.msra.mxu1 %v7231_v38  ;;  %6259 = vmatprep.subr.bf16.mxu0 %v7232_v39 }
 0x605   : > { %6281 = vmatprep.subr.bf16.mxu1 %v7234_v41 }
 0x607   : > { %6260 = vmatpush3.bf16.msra.mxu0 %v7233_v40 }
 0x608   : > { %6282 = vmatpush3.bf16.msra.mxu1 %v7235_v42  ;;  %6261 = vmatprep.subr.bf16.mxu0 %v7236_v43  ;;  %v5228_v42 = vlaneseq }
 0x609   : > { %6283 = vmatprep.subr.bf16.mxu1 %v7238_v45 }
 0x60b   : > { %6262 = vmatpush3.bf16.msra.mxu0 %v7237_v44 }
 0x60c   : > { %6284 = vmatpush3.bf16.msra.mxu1 %v7239_v46  ;;  %6263 = vmatprep.subr.bf16.mxu0 %v7240_v47 }
 0x60d   : > { %6285 = vmatprep.subr.bf16.mxu1 %v7242_v49  ;;  %v5229_v49 = vand.u32 127, %v5228_v42 }
 0x60f   : > { %6264 = vmatpush3.bf16.msra.mxu0 %v7241_v48  ;;  %vm5230_vm0 = vcmp.ge.s32.totalorder %v5229_v49, 32  ;;  %vm5231_vm1 = vcmp.lt.s32.totalorder %v5229_v49, 64 }
 0x610   : > { %6286 = vmatpush3.bf16.msra.mxu1 %v7243_v50  ;;  %6265 = vmatprep.subr.bf16.mxu0 %v7244_v51  ;;  %vm5232_vm2 = vmand %vm5230_vm0, %vm5231_vm1 }
 0x611   : > { %6287 = vmatprep.subr.bf16.mxu1 %v7246_v53 }
 0x613   : > { %6266 = vmatpush3.bf16.msra.mxu0 %v7245_v52 }
 0x614   : > { %6288 = vmatpush3.bf16.msra.mxu1 %v7247_v54  ;;  %6267 = vmatprep.subr.bf16.mxu0 %v7248_v55  ;;  %v6155_v55 = vld [vmem:[#allocation18] ss:$0 sm:$0xff] }
 0x615   : > { %6289 = vmatprep.subr.bf16.mxu1 %v7250_v57 }
 0x617   : > { %6268 = vmatpush3.bf16.msra.mxu0 %v7249_v56 }
 0x618   : > { %6290 = vmatpush3.bf16.msra.mxu1 %v7251_v58  ;;  %6269 = vmatprep.subr.bf16.mxu0 %v7252_v59 }
 0x619   : > { %6291 = vmatprep.subr.bf16.mxu1 %v7254_v61 }
 0x61b   : > { %6270 = vmatpush3.bf16.msra.mxu0 %v7253_v60 }
 0x61c   : > { %6292 = vmatpush3.bf16.msra.mxu1 %v7258_v0  ;;  %6299 = vmatprep.subr.bf16.mxu0 %v7259_v1 }
 0x61e   : > { %4841 = vmatmul.mubr.bf16.vlgmr.msra.gmra.mxu0 %v7255_v62 }
 0x61f   : > { %6300 = vmatpush3.bf16.msra.mxu0 %v7263_v4  ;;  %5025 = vmatmul.mubr.bf16.vlgmr.msra.gmra.mxu1 %v7260_v2 }
 0x620   : > { %6301 = vmatprep.subr.bf16.mxu0 %v7264_v5  ;;  %5208 = vmatprep.mubr.bf16.mxu0 %v7280_v14 }
 0x623   : > { %6302 = vmatpush3.bf16.msra.mxu0 %v7265_v6 }
 0x624   : > { %6303 = vmatprep.subr.bf16.mxu0 %v7266_v7 }
 0x627   : > { %6304 = vmatpush3.bf16.msra.mxu0 %v7267_v8 }
 0x628   : > { %6305 = vmatprep.subr.bf16.mxu0 %v7268_v9 }
 0x62b   : > { %6306 = vmatpush3.bf16.msra.mxu0 %v7269_v10 }
 0x62c   : > { %6307 = vmatprep.subr.bf16.mxu0 %v7270_v11 }
 0x62f   : > { %6308 = vmatpush3.bf16.msra.mxu0 %v7271_v12 }
 0x630   : > { %6309 = vmatprep.subr.bf16.mxu0 %v7272_v13 }
 0x633   : > { %6310 = vmatpush3.bf16.msra.mxu0 %v7273_v15 }
 0x634   : > { %6311 = vmatprep.subr.bf16.mxu0 %v7274_v16 }
 0x637   : > { %6312 = vmatpush3.bf16.msra.mxu0 %v7275_v17 }
 0x638   : > { %6313 = vmatprep.subr.bf16.mxu0 %v7276_v18 }
 0x63b   : > { %6314 = vmatpush3.bf16.msra.mxu0 %v7277_v19 }
 0x63e   : > { %5209 = vmatmul.mubr.bf16.vlgmr.msra.gmra.mxu0 %v7278_v20 }
 0x6be   : > { %v6227_v21 = vpop.f32.mrf.mxu0 }
 0x6bf   : > { %v6249_v22 = vpop.f32.mrf.mxu1 }
 0x6c0   : > { %v6228_v23 = vpop.f32.mrf.mxu0 }
 0x6c1   : > { %v6250_v24 = vpop.f32.mrf.mxu1  ;;  %v6229_v34 = vadd.f32 %v6228_v23, %v6227_v21 }
 0x6c2   : > { %v6230_v25 = vpop.f32.mrf.mxu0  ;;  %v6251_v35 = vadd.f32 %v6250_v24, %v6249_v22 }
 0x6c3   : > { %v6252_v26 = vpop.f32.mrf.mxu1 }
 0x6c4   : > { %v6231_v27 = vpop.f32.mrf.mxu0  ;;  %v4661_v39 = vadd.f32 %v6251_v35, %v6229_v34 }
 0x6c5   : > { %v6253_v29 = vpop.f32.mrf.mxu1  ;;  %v6232_v40 = vadd.f32 %v6231_v27, %v6230_v25 }
 0x6c6   : > { %v6254_v41 = vadd.f32 %v6253_v29, %v6252_v26 }
 0x6c8   : > { %v4664_v48 = vadd.f32 %v6254_v41, %v6232_v40 }
 0x6de   : > { %v6271_v28 = vpop.f32.mrf.mxu0 }
 0x6df   : > { %v6293_v31 = vpop.f32.mrf.mxu1 }
 0x6e0   : > { %v6272_v30 = vpop.f32.mrf.mxu0 }
 0x6e1   : > { %v6294_v33 = vpop.f32.mrf.mxu1  ;;  %v6273_v36 = vadd.f32 %v6272_v30, %v6271_v28 }
 0x6e2   : > { %v6274_v32 = vpop.f32.mrf.mxu0  ;;  %v6295_v44 = vadd.f32 %v6294_v33, %v6293_v31 }
 0x6e3   : > { %v6296_v38 = vpop.f32.mrf.mxu1  ;;  %v4849_v43 = vadd.f32 %v6273_v36, %v4661_v39 }
 0x6e4   : > { %v6275_v37 = vpop.f32.mrf.mxu0 }
 0x6e5   : > { %v6276_v45 = vadd.f32 %v6275_v37, %v6274_v32  ;;  %v6297_v46 = vpop.f32.mrf.mxu1  ;;  %v5033_v51 = vadd.f32 %v6295_v44, %v4849_v43 }
 0x6e6   : > { %v6298_v53 = vadd.f32 %v6297_v46, %v6296_v38 }
 0x6e7   : > { %v4850_v52 = vadd.f32 %v6276_v45, %v4664_v48 }
 0x6e9   : > { %v5034_v59 = vadd.f32 %v6298_v53, %v4850_v52 }
 0x6fe   : > { %v6315_v47 = vpop.f32.mrf.mxu0 }
 0x700   : > { %v6316_v50 = vpop.f32.mrf.mxu0 }
 0x701   : > { %v6317_v54 = vadd.f32 %v6316_v50, %v6315_v47 }
 0x702   : > { %v6318_v56 = vpop.f32.mrf.mxu0 }
 0x703   : > { %v5217_v57 = vadd.f32 %v6317_v54, %v5033_v51 }
 0x704   : > { %v6319_v58 = vpop.f32.mrf.mxu0 }
 0x705   : > { %v5226_v60 = vadd.f32 %v6155_v55, %v5217_v57  ;;  %v6320_v61 = vadd.f32 %v6319_v58, %v6318_v56 }
 0x707   : > { %v5233_v62 = vmin.f32 %v5226_v60, 0.0  ;;  %v5218_v63 = vadd.f32 %v6320_v61, %v5034_v59 }
 0x709   : > { %v5235_v0 = vsel %vm5232_vm2, %v5233_v62, %v5226_v60  ;;  %v5227_v1 = vadd.f32 %v6155_v55, %v5218_v63 }
 0x70a   : > { %5237 = vst [vmem:[#allocation19] sm:$0xff] %v5235_v0 }
 0x70b   : > { %v5234_v2 = vmin.f32 %v5227_v1, 0.0 }
 0x70d   : > { %v5236_v3 = vsel %vm5232_vm2, %v5234_v2, %v5227_v1 }
 0x70e   : > { %5238 = vst [vmem:[#allocation19 + $0x8] sm:$0xff] %v5236_v3 }
 0x70f PF: > { %p6389_p0 = scmp.eq.s32.totalorder %s7775_s21, 15  ;;  %s7671_s19 = smov [#allocation19]  }
 0x710   : > { %s5245_s25 = sshll.u32 %s7671_s19, 4  ;;  %s5246_s25 = int_to_ptr.vmem [resolvable:$true] %s5245_s25 }
 0x711   : > { %s7527_s22 = scalar_lea.vmem %s5246_s25, 256  ;;  %p7534_p6 = scmp.lt.s32.totalorder %s5246_s25, %s5246_s25 }
 0x712   : > { %p7528_p10 = scmp.ne.s32.totalorder %s5246_s25, %s7527_s22  ;;  %p7535_p2 = scmp.lt.s32.totalorder %s7527_s22, %s7527_s22 }
 0x714   : > { %p7529_p1 = pnand %p7528_p10, %p6389_p0  ;;  %p7536_p8 = por %p7535_p2, %p7534_p6 }
 0x716   : > { %p7530_p11 = pneg %p7529_p1 }
 0x718   : > { %p7537_p7 = pnand %p7536_p8, %p7530_p11 }
 0x71a   : > { %7540 = shalt.err (!%p7537_p7)
}
 0x71b   : > { %s7672_s13 = smov 128   ;;  %s7673_s26 = smov 8  }
 0x71c   : > { %s8806_s16 = sld [smem:[#allocation41_spill]] }
 0x722   : > { %6350 = dma.vmem_to_hbm [thread:$0]  (%p6389_p0), %s5246_s25, 256, %s8806_s16, [#allocation6], %s7672_s13, %s7672_s13, %s7673_s26  }
 0x723   : > { %7612 = dma.done.wait (%p6389_p0), [#allocation6], 256  }
 0x724   : > { %7614 = vsyncadd (%p6389_p0), [#allocation6], 4294967040 }
 0x725 PF: > { %s8807_s18 = sld [smem:[#allocation29_spill]]  ;;  %s8813_s30 = smov %s7621_s10 }
 0x726   : > { %s8808_s23 = sld [smem:[#allocation35_spill]]  ;;  %s8814_s10 = smov %s7625_s11 }
 0x727   : > { %s8809_s12 = sld [smem:[#allocation26_spill]]  ;;  %s8816_s13 = smov %s7637_s14 }
 0x728   : > { %s8810_s3 = sld [smem:[#allocation33_spill]]  ;;  %s8818_s16 = smov %s7649_s17 }
 0x729   : > { %s8811_s15 = sld [smem:[#allocation27_spill]] }
 0x72a   : > { %s8812_s27 = sld [smem:[#allocation30_spill]] }
 0x72b   : > { %p28_p12 = scmp.ge.s32.totalorder %s8807_s18, 18  }
 0x72c   : > { %s8815_s11 = smov %s8808_s23 }
 0x72d   :  { %30 = sbr.rel (!%p28_p12) target bundleno = 20 (0x14), region = 196 }
 0x72e   : > { %s8817_s14 = smov %s8810_s3 }
 0x730   : > { %s8819_s17 = smov %s8812_s27 }
 0x732   :  { %5261 = vsyncpa [#allocation5], 1 }
 0x733   :  { %5263 = vsyncpa [#allocation5 + $0x1], 1 }
 0x734   :  { %5264 = vsyncpa [#allocation8], 1 }
 0x735   :  { %5266 = vsyncpa [#allocation8 + $0x1], 1 }
 0x736   :  { %5267 = vsyncpa [#allocation11], 1 }
 0x737   :  { %5269 = vsyncpa [#allocation11 + $0x1], 1 }
 0x738   :  { %5270 = vsyncpa [#allocation14], 1 }
 0x739   :  { %5272 = vsyncpa [#allocation14 + $0x1], 1 }
 0x73a   :  { %5273 = vsyncpa [#allocation17], 1 }
 0x73b   :  { %5274 = vsyncpa [#allocation6], 1 }
 0x73c   :  { %5276 = vsyncpa [#allocation6 + $0x1], 1 }

</bundles_post_ra>
